<compile_context>
chip_gen: v6e
topology: v6e:2x2x1
jax: 0.10.0
libtpu: 0.0.40
codegen_flags: <defaults>
</compile_context>

<pallas_src>
import math

import numpy as np
import jax
import jax.numpy as jnp
from jax.experimental import pallas as pl
from jax.experimental.pallas import tpu as pltpu

BN_EPS = 1e-5
CP = 128            # lane-padded channel width (full 128-lane vreg)
KP = 128            # lane-padded stem im2col contraction width (27 -> 128)
NUM_CLASSES = 10

# Tiny inverted-residual setting (expand_ratio, kernel, stride, in_ch, out_ch, num_layers)
SETTINGS = [
    dict(expand=1, kernel=3, stride=1, inc=8, out=8, num_layers=1),
    dict(expand=4, kernel=3, stride=2, inc=8, out=16, num_layers=2),
]


def _silu(x):
    return x * jax.nn.sigmoid(x)


# ----------------------------------------------------------------------------
# Fused whole-network Pallas kernel
# ----------------------------------------------------------------------------
def _make_fused_kernel(block_cfgs):
    """One kernel: stem + all MBConv blocks + head, for NB samples per grid step.

    Ref order: patches, stem_w, stem_b,
               per block: [ew, eb]?, g_cat, dww, dwb, sw1, sb1, sw2, sb2, pw, pb,
               last_w, last_b, fc_w, fc_b, out.
    """
    def kernel(*refs):
        it = iter(refs)
        x_ref = next(it)                                   # (NB, HWs, KP) f32 patches
        stem_w, stem_b = next(it), next(it)
        b_refs = []
        for cfg in block_cfgs:
            d = {}
            if cfg['has_expand']:
                d['ew'], d['eb'] = next(it), next(it)
            for nm in ('g', 'dww', 'dwb', 'sw1', 'sb1', 'sw2', 'sb2', 'pw', 'pb'):
                d[nm] = next(it)
            b_refs.append(d)
        lw, lb, fw, fb = next(it), next(it), next(it), next(it)
        o_ref = next(it)

        nb, hw_stem, kp = x_ref.shape

        # ---- stem: 3x3 stride-2 conv (im2col) + folded-BN bias + SiLU ----
        x2 = x_ref[...].reshape(nb * hw_stem, kp).astype(jnp.bfloat16)
        h = jnp.dot(x2, stem_w[...], preferred_element_type=jnp.float32)
        act = _silu(h + stem_b[...]).astype(jnp.bfloat16)  # (nb*HWs, CP)

        # ---- MBConv blocks ----
        for cfg, d in zip(block_cfgs, b_refs):
            hw_in, hw_out, taps = cfg['hw_in'], cfg['hw_out'], cfg['taps']
            xin = act                                      # (nb*hw_in, CP) bf16

            # 1x1 expand conv + BN + SiLU (skipped when expand_ratio == 1)
            if cfg['has_expand']:
                h = jnp.dot(xin, d['ew'][...], preferred_element_type=jnp.float32)
                h = _silu(h + d['eb'][...]).astype(jnp.bfloat16)
            else:
                h = xin

            # depthwise KxK + BN: per-channel tap weights (BN scale folded) applied in
            # bf16, then ONE MXU contraction per sample against the concatenated 0/1
            # spatial operator G_cat (shifted windows / stride / zero padding).
            g_cat = d['g'][...]                            # (hw_out, taps*hw_in) bf16
            dw_out = []
            for s in range(nb):
                hn = h[s * hw_in:(s + 1) * hw_in, :]       # (hw_in, CP) bf16
                h_cat = jnp.concatenate(
                    [hn * d['dww'][t] for t in range(taps)], axis=0)
                dw_out.append(jnp.dot(g_cat, h_cat,
                                      preferred_element_type=jnp.float32))
            acc = jnp.concatenate(dw_out, axis=0) if nb > 1 else dw_out[0]
            hdw = _silu(acc + d['dwb'][...])               # (nb*hw_out, CP) f32

            # squeeze-and-excitation: per-sample global avg pool + two tiny matmuls
            hdw3 = hdw.reshape(nb, hw_out, hdw.shape[-1])
            pooled = jnp.mean(hdw3, axis=1)                # (nb, CP)
            se = jnp.dot(pooled.astype(jnp.bfloat16), d['sw1'][...],
                         preferred_element_type=jnp.float32) + d['sb1'][...]
            se = _silu(se)
            se = jnp.dot(se.astype(jnp.bfloat16), d['sw2'][...],
                         preferred_element_type=jnp.float32) + d['sb2'][...]
            gate = jax.nn.sigmoid(se)                      # (nb, CP)
            hse = (hdw3 * gate[:, None, :]).reshape(nb * hw_out, hdw.shape[-1])
            hse = hse.astype(jnp.bfloat16)

            # 1x1 project conv + BN (no activation) + residual
            # TODO(synk): StochasticDepth is train-time randomness; identity in eval.
            y = (jnp.dot(hse, d['pw'][...], preferred_element_type=jnp.float32)
                 + d['pb'][...])
            if cfg['has_res']:
                y = y + xin.astype(jnp.float32)
            act = y.astype(jnp.bfloat16)                   # (nb*hw_out, CP)

        # ---- head: last 1x1 conv + BN + SiLU -> global avg pool -> classifier ----
        hw_last = block_cfgs[-1]['hw_out']
        h = jnp.dot(act, lw[...], preferred_element_type=jnp.float32)
        h = _silu(h + lb[...])
        pooled = jnp.mean(h.reshape(nb, hw_last, h.shape[-1]), axis=1)  # (nb, CP)
        # TODO(synk): nn.Dropout is train-time randomness; identity in eval mode.
        y = jnp.dot(pooled.astype(jnp.bfloat16), fw[...],
                    preferred_element_type=jnp.float32) + fb[...]
        o_ref[...] = y.astype(o_ref.dtype)
    return kernel


def _pick_samples_per_step(n):
    """Largest divisor of n that still leaves >= 2 grid steps (v7x has 2 TCs),
    capped at 8 samples per step."""
    best = 1
    for cand in range(2, min(8, n // 2) + 1):
        if n % cand == 0:
            best = cand
    return best


def fused_forward(patches, prep):
    """patches: (N, HWs, KP) f32 -> logits (N, CP) f32, one pallas_call."""
    n, hw_stem, kp = patches.shape
    nb = _pick_samples_per_step(n)
    steps = n // nb
    cfgs = prep['block_cfgs']
    kernel = _make_fused_kernel(cfgs)

    def const_spec(a):
        if a.ndim == 2:
            return pl.BlockSpec(a.shape, lambda i: (0, 0))
        return pl.BlockSpec(a.shape, lambda i: (0, 0, 0))

    in_specs = [pl.BlockSpec((nb, hw_stem, kp), lambda i: (i, 0, 0))]
    args = [patches]
    for name in ('stem_w', 'stem_b'):
        in_specs.append(const_spec(prep[name])); args.append(prep[name])
    for cfg, bw in zip(cfgs, prep['blocks']):
        names = (['ew', 'eb'] if cfg['has_expand'] else []) + \
                ['g', 'dww', 'dwb', 'sw1', 'sb1', 'sw2', 'sb2', 'pw', 'pb']
        for nm in names:
            in_specs.append(const_spec(bw[nm])); args.append(bw[nm])
    for name in ('last_w', 'last_b', 'fc_w', 'fc_b'):
        in_specs.append(const_spec(prep[name])); args.append(prep[name])

    out = pl.pallas_call(
        kernel,
        grid=(steps,),
        in_specs=in_specs,
        out_specs=pl.BlockSpec((None, nb, CP), lambda i: (i, 0, 0)),
        out_shape=jax.ShapeDtypeStruct((steps, nb, CP), jnp.float32),
        compiler_params=pltpu.CompilerParams(dimension_semantics=("parallel",)),
    )(*args)
    return out.reshape(n, CP)


# ----------------------------------------------------------------------------
# Glue (plain JAX / numpy): patch extraction, spatial operators, parameters
# ----------------------------------------------------------------------------
def extract_patches(x, k, stride, pad):
    """x: (N,H,W,C) -> patches (N,Ho,Wo,k*k,C), tap order (kh,kw).  Stem only."""
    N, H, W, C = x.shape
    xp = jnp.pad(x, ((0, 0), (pad, pad), (pad, pad), (0, 0)))
    Ho = (H + 2 * pad - k) // stride + 1
    Wo = (W + 2 * pad - k) // stride + 1
    taps = []
    for kh in range(k):
        for kw in range(k):
            taps.append(xp[:, kh:kh + stride * Ho:stride, kw:kw + stride * Wo:stride, :])
    p = jnp.stack(taps, axis=3)
    return p, Ho, Wo


def dw_operator(h, w, k, stride, pad):
    """Per-tap 0/1 spatial operators: G[t] @ flat(x) is the (kh,kw)-shifted,
    zero-padded, strided window of x flattened over (H,W).  numpy (k*k, Ho*Wo, H*W)."""
    ho = (h + 2 * pad - k) // stride + 1
    wo = (w + 2 * pad - k) // stride + 1
    g = np.zeros((k * k, ho * wo, h * w), np.float32)
    for kh in range(k):
        for kw in range(k):
            t = kh * k + kw
            for oh in range(ho):
                ih = oh * stride + kh - pad
                if ih < 0 or ih >= h:
                    continue
                for ow in range(wo):
                    iw = ow * stride + kw - pad
                    if iw < 0 or iw >= w:
                        continue
                    g[t, oh * wo + ow, ih * w + iw] = 1.0
    return g, ho, wo


def _make_divisible(v, divisor=8, min_value=None):
    if min_value is None:
        min_value = divisor
    new_v = max(min_value, int(v + divisor / 2) // divisor * divisor)
    if new_v < 0.9 * v:
        new_v += divisor
    return new_v


class KeyGen:
    def __init__(self, seed):
        self.key = jax.random.PRNGKey(seed)

    def __call__(self):
        self.key, sub = jax.random.split(self.key)
        return sub


def conv_weight(kg, cout, cin, k):
    # kaiming_normal_(mode='fan_out'): std = sqrt(2 / (cout * k * k))
    std = math.sqrt(2.0 / (cout * k * k))
    return jax.random.normal(kg(), (cout, cin, k, k), jnp.float32) * std


def bn_affine(c):
    # gamma=1, beta=0, running_mean=0, running_var=1 (PyTorch defaults), eval mode.
    scale = jnp.full((c,), 1.0 / math.sqrt(1.0 + BN_EPS), jnp.float32)
    bias = jnp.zeros((c,), jnp.float32)
    return scale, bias


def build_params(seed=42):
    kg = KeyGen(seed)
    params = {}

    stem_out = SETTINGS[0]['inc']
    sw = conv_weight(kg, stem_out, 3, 3)                                    # (Cout,3,3,3)
    ss, sb = bn_affine(stem_out)
    params['stem'] = dict(w=sw, scale=ss, bias=sb)

    blocks = []
    for cfg in SETTINGS:
        for li in range(cfg['num_layers']):
            in_ch = cfg['inc'] if li == 0 else cfg['out']
            stride = cfg['stride'] if li == 0 else 1
            out_ch = cfg['out']
            k = cfg['kernel']
            exp = _make_divisible(in_ch * cfg['expand'], 8)
            sq = max(1, in_ch // 4)
            bp = dict(inc=in_ch, out=out_ch, stride=stride, k=k, exp=exp)
            if exp != in_ch:
                ew = conv_weight(kg, exp, in_ch, 1).reshape(exp, in_ch).T   # (in, exp)
                es, eb = bn_affine(exp)
                bp.update(expand_w=ew, expand_scale=es, expand_bias=eb)
            dw = conv_weight(kg, exp, 1, k)                                 # (exp,1,K,K)
            bp['dw_w'] = jnp.transpose(dw[:, 0], (1, 2, 0)).reshape(k * k, exp)
            bp['dw_scale'], bp['dw_bias'] = bn_affine(exp)
            bp['se_w1'] = conv_weight(kg, sq, exp, 1).reshape(sq, exp).T    # (exp, sq)
            bp['se_b1'] = jnp.zeros((sq,), jnp.float32)
            bp['se_w2'] = conv_weight(kg, exp, sq, 1).reshape(exp, sq).T    # (sq, exp)
            bp['se_b2'] = jnp.zeros((exp,), jnp.float32)
            bp['proj_w'] = conv_weight(kg, out_ch, exp, 1).reshape(out_ch, exp).T
            bp['proj_scale'], bp['proj_bias'] = bn_affine(out_ch)
            blocks.append(bp)
    params['blocks'] = blocks

    last_in = SETTINGS[-1]['out']
    last_out = 4 * last_in
    lw = conv_weight(kg, last_out, last_in, 1).reshape(last_out, last_in).T
    ls, lb = bn_affine(last_out)
    params['last'] = dict(w=lw, scale=ls, bias=lb)

    init_range = 1.0 / math.sqrt(NUM_CLASSES)
    fcw = jax.random.uniform(kg(), (NUM_CLASSES, last_out), jnp.float32,
                             minval=-init_range, maxval=init_range)
    params['fc_w'] = fcw.T                                                  # (C, num_classes)
    params['fc_b'] = jnp.zeros((NUM_CLASSES,), jnp.float32)
    return params


def _pad2(w, rows, cols):
    r, c = w.shape
    return jnp.pad(w, ((0, rows - r), (0, cols - c)))


def _pad_bias(b, cols):
    b = jnp.asarray(b, jnp.float32).reshape(1, -1)
    return jnp.pad(b, ((0, 0), (0, cols - b.shape[1])))


def prepare_params(params, in_h, in_w):
    """Fold BN scale into weights, zero-pad channels to CP lanes, cast MXU operands to
    bf16, and build the per-block concatenated depthwise spatial operators."""
    prep = {}

    sw = params['stem']['w']                                      # (Cout, 3, 3, 3)
    cout = sw.shape[0]
    wmat = jnp.transpose(sw, (2, 3, 1, 0)).reshape(9 * 3, cout)
    wmat = wmat * params['stem']['scale'][None, :]
    prep['stem_w'] = _pad2(wmat, KP, CP).astype(jnp.bfloat16)     # K padded 27 -> 128
    prep['stem_b'] = _pad_bias(params['stem']['bias'], CP)

    h = (in_h + 2 - 3) // 2 + 1
    w = (in_w + 2 - 3) // 2 + 1

    blocks, cfgs = [], []
    for bp in params['blocks']:
        k, s = bp['k'], bp['stride']
        g, ho, wo = dw_operator(h, w, k, s, (k - 1) // 2)         # np (T, HWout, HWin)
        T = k * k
        # Single-contraction layout: columns grouped per tap -> (HWout, T*HWin)
        g_cat = np.transpose(g, (1, 0, 2)).reshape(ho * wo, T * h * w)
        blk = dict(g=jnp.asarray(g_cat, jnp.bfloat16))
        cfg = dict(has_expand='expand_w' in bp,
                   has_res=(s == 1 and bp['inc'] == bp['out']),
                   taps=T, hw_in=h * w, hw_out=ho * wo)
        if cfg['has_expand']:
            ew = bp['expand_w'] * bp['expand_scale'][None, :]
            blk['ew'] = _pad2(ew, CP, CP).astype(jnp.bfloat16)
            blk['eb'] = _pad_bias(bp['expand_bias'], CP)
        dww = bp['dw_w'] * bp['dw_scale'][None, :]                # (T, exp)
        dww = jnp.pad(dww, ((0, 0), (0, CP - dww.shape[1])))
        blk['dww'] = dww[:, None, :].astype(jnp.bfloat16)         # (T, 1, CP) bf16
        blk['dwb'] = _pad_bias(bp['dw_bias'], CP)
        blk['sw1'] = _pad2(bp['se_w1'], CP, CP).astype(jnp.bfloat16)
        blk['sb1'] = _pad_bias(bp['se_b1'], CP)
        blk['sw2'] = _pad2(bp['se_w2'], CP, CP).astype(jnp.bfloat16)
        blk['sb2'] = _pad_bias(bp['se_b2'], CP)
        pw = bp['proj_w'] * bp['proj_scale'][None, :]
        blk['pw'] = _pad2(pw, CP, CP).astype(jnp.bfloat16)
        blk['pb'] = _pad_bias(bp['proj_bias'], CP)
        blocks.append(blk)
        cfgs.append(cfg)
        h, w = ho, wo
    prep['blocks'] = blocks
    prep['block_cfgs'] = cfgs

    lw = params['last']['w'] * params['last']['scale'][None, :]
    prep['last_w'] = _pad2(lw, CP, CP).astype(jnp.bfloat16)
    prep['last_b'] = _pad_bias(params['last']['bias'], CP)
    prep['fc_w'] = _pad2(params['fc_w'], CP, CP).astype(jnp.bfloat16)
    prep['fc_b'] = _pad_bias(params['fc_b'], CP)
    return prep


def efficientnet_forward(prep, x_nchw):
    x = jnp.transpose(x_nchw, (0, 2, 3, 1))                       # NCHW -> NHWC
    n = x.shape[0]
    # stem im2col in the wrapper (tiny raw input); cast to bf16 happens in-kernel.
    p, ho, wo = extract_patches(x, 3, 2, 1)
    patches = p.reshape(n, ho * wo, 9 * 3)
    patches = jnp.pad(patches, ((0, 0), (0, 0), (0, KP - 9 * 3)))  # (N, HWs, 128) f32
    logits = fused_forward(patches, prep)
    return logits[:, :NUM_CLASSES]


if __name__ == "__main__":
    params = build_params(seed=42)
    prep = prepare_params(params, in_h=16, in_w=16)
    x = jax.random.normal(jax.random.PRNGKey(0), (2, 3, 16, 16), jnp.float32)  # NCHW
    fwd = jax.jit(lambda inp: efficientnet_forward(prep, inp))
    logits = jax.block_until_ready(fwd(x))
    assert logits.shape == (2, NUM_CLASSES)
    assert bool(jnp.all(jnp.isfinite(logits)))
    print("KERNEL_OK")
</pallas_src>

<mosaic_0001>
module attributes {stable_mosaic.version = 11 : i64} {
  func.func @kernel(%arg0: i32, %arg1: memref<1x64x128xf32, #tpu.memory_space<vmem>>, %arg2: memref<128x128xbf16, #tpu.memory_space<vmem>>, %arg3: memref<1x128xf32, #tpu.memory_space<vmem>>, %arg4: memref<64x576xbf16, #tpu.memory_space<vmem>>, %arg5: memref<9x1x128xbf16, #tpu.memory_space<vmem>>, %arg6: memref<1x128xf32, #tpu.memory_space<vmem>>, %arg7: memref<128x128xbf16, #tpu.memory_space<vmem>>, %arg8: memref<1x128xf32, #tpu.memory_space<vmem>>, %arg9: memref<128x128xbf16, #tpu.memory_space<vmem>>, %arg10: memref<1x128xf32, #tpu.memory_space<vmem>>, %arg11: memref<128x128xbf16, #tpu.memory_space<vmem>>, %arg12: memref<1x128xf32, #tpu.memory_space<vmem>>, %arg13: memref<128x128xbf16, #tpu.memory_space<vmem>>, %arg14: memref<1x128xf32, #tpu.memory_space<vmem>>, %arg15: memref<16x576xbf16, #tpu.memory_space<vmem>>, %arg16: memref<9x1x128xbf16, #tpu.memory_space<vmem>>, %arg17: memref<1x128xf32, #tpu.memory_space<vmem>>, %arg18: memref<128x128xbf16, #tpu.memory_space<vmem>>, %arg19: memref<1x128xf32, #tpu.memory_space<vmem>>, %arg20: memref<128x128xbf16, #tpu.memory_space<vmem>>, %arg21: memref<1x128xf32, #tpu.memory_space<vmem>>, %arg22: memref<128x128xbf16, #tpu.memory_space<vmem>>, %arg23: memref<1x128xf32, #tpu.memory_space<vmem>>, %arg24: memref<128x128xbf16, #tpu.memory_space<vmem>>, %arg25: memref<1x128xf32, #tpu.memory_space<vmem>>, %arg26: memref<16x144xbf16, #tpu.memory_space<vmem>>, %arg27: memref<9x1x128xbf16, #tpu.memory_space<vmem>>, %arg28: memref<1x128xf32, #tpu.memory_space<vmem>>, %arg29: memref<128x128xbf16, #tpu.memory_space<vmem>>, %arg30: memref<1x128xf32, #tpu.memory_space<vmem>>, %arg31: memref<128x128xbf16, #tpu.memory_space<vmem>>, %arg32: memref<1x128xf32, #tpu.memory_space<vmem>>, %arg33: memref<128x128xbf16, #tpu.memory_space<vmem>>, %arg34: memref<1x128xf32, #tpu.memory_space<vmem>>, %arg35: memref<128x128xbf16, #tpu.memory_space<vmem>>, %arg36: memref<1x128xf32, #tpu.memory_space<vmem>>, %arg37: memref<128x128xbf16, #tpu.memory_space<vmem>>, %arg38: memref<1x128xf32, #tpu.memory_space<vmem>>, %arg39: memref<1x1x128xf32, #tpu.memory_space<vmem>>) attributes {dimension_semantics = [#tpu.dimension_semantics<parallel>], iteration_bounds = array<i64: 2>, scalar_prefetch = 0 : i64, scratch_operands = 0 : i64, tpu.core_type = #tpu.core_type<tc>, window_params = [{transform_indices = @transform_0, window_bounds = array<i64: 1, 64, 128>}, {pipeline_mode = #tpu.pipeline_mode<synchronous>, transform_indices = @transform_1, window_bounds = array<i64: 128, 128>}, {pipeline_mode = #tpu.pipeline_mode<synchronous>, transform_indices = @transform_2, window_bounds = array<i64: 1, 128>}, {pipeline_mode = #tpu.pipeline_mode<synchronous>, transform_indices = @transform_3, window_bounds = array<i64: 64, 576>}, {pipeline_mode = #tpu.pipeline_mode<synchronous>, transform_indices = @transform_4, window_bounds = array<i64: 9, 1, 128>}, {pipeline_mode = #tpu.pipeline_mode<synchronous>, transform_indices = @transform_5, window_bounds = array<i64: 1, 128>}, {pipeline_mode = #tpu.pipeline_mode<synchronous>, transform_indices = @transform_6, window_bounds = array<i64: 128, 128>}, {pipeline_mode = #tpu.pipeline_mode<synchronous>, transform_indices = @transform_7, window_bounds = array<i64: 1, 128>}, {pipeline_mode = #tpu.pipeline_mode<synchronous>, transform_indices = @transform_8, window_bounds = array<i64: 128, 128>}, {pipeline_mode = #tpu.pipeline_mode<synchronous>, transform_indices = @transform_9, window_bounds = array<i64: 1, 128>}, {pipeline_mode = #tpu.pipeline_mode<synchronous>, transform_indices = @transform_10, window_bounds = array<i64: 128, 128>}, {pipeline_mode = #tpu.pipeline_mode<synchronous>, transform_indices = @transform_11, window_bounds = array<i64: 1, 128>}, {pipeline_mode = #tpu.pipeline_mode<synchronous>, transform_indices = @transform_12, window_bounds = array<i64: 128, 128>}, {pipeline_mode = #tpu.pipeline_mode<synchronous>, transform_indices = @transform_13, window_bounds = array<i64: 1, 128>}, {pipeline_mode = #tpu.pipeline_mode<synchronous>, transform_indices = @transform_14, window_bounds = array<i64: 16, 576>}, {pipeline_mode = #tpu.pipeline_mode<synchronous>, transform_indices = @transform_15, window_bounds = array<i64: 9, 1, 128>}, {pipeline_mode = #tpu.pipeline_mode<synchronous>, transform_indices = @transform_16, window_bounds = array<i64: 1, 128>}, {pipeline_mode = #tpu.pipeline_mode<synchronous>, transform_indices = @transform_17, window_bounds = array<i64: 128, 128>}, {pipeline_mode = #tpu.pipeline_mode<synchronous>, transform_indices = @transform_18, window_bounds = array<i64: 1, 128>}, {pipeline_mode = #tpu.pipeline_mode<synchronous>, transform_indices = @transform_19, window_bounds = array<i64: 128, 128>}, {pipeline_mode = #tpu.pipeline_mode<synchronous>, transform_indices = @transform_20, window_bounds = array<i64: 1, 128>}, {pipeline_mode = #tpu.pipeline_mode<synchronous>, transform_indices = @transform_21, window_bounds = array<i64: 128, 128>}, {pipeline_mode = #tpu.pipeline_mode<synchronous>, transform_indices = @transform_22, window_bounds = array<i64: 1, 128>}, {pipeline_mode = #tpu.pipeline_mode<synchronous>, transform_indices = @transform_23, window_bounds = array<i64: 128, 128>}, {pipeline_mode = #tpu.pipeline_mode<synchronous>, transform_indices = @transform_24, window_bounds = array<i64: 1, 128>}, {pipeline_mode = #tpu.pipeline_mode<synchronous>, transform_indices = @transform_25, window_bounds = array<i64: 16, 144>}, {pipeline_mode = #tpu.pipeline_mode<synchronous>, transform_indices = @transform_26, window_bounds = array<i64: 9, 1, 128>}, {pipeline_mode = #tpu.pipeline_mode<synchronous>, transform_indices = @transform_27, window_bounds = array<i64: 1, 128>}, {pipeline_mode = #tpu.pipeline_mode<synchronous>, transform_indices = @transform_28, window_bounds = array<i64: 128, 128>}, {pipeline_mode = #tpu.pipeline_mode<synchronous>, transform_indices = @transform_29, window_bounds = array<i64: 1, 128>}, {pipeline_mode = #tpu.pipeline_mode<synchronous>, transform_indices = @transform_30, window_bounds = array<i64: 128, 128>}, {pipeline_mode = #tpu.pipeline_mode<synchronous>, transform_indices = @transform_31, window_bounds = array<i64: 1, 128>}, {pipeline_mode = #tpu.pipeline_mode<synchronous>, transform_indices = @transform_32, window_bounds = array<i64: 128, 128>}, {pipeline_mode = #tpu.pipeline_mode<synchronous>, transform_indices = @transform_33, window_bounds = array<i64: 1, 128>}, {pipeline_mode = #tpu.pipeline_mode<synchronous>, transform_indices = @transform_34, window_bounds = array<i64: 128, 128>}, {pipeline_mode = #tpu.pipeline_mode<synchronous>, transform_indices = @transform_35, window_bounds = array<i64: 1, 128>}, {pipeline_mode = #tpu.pipeline_mode<synchronous>, transform_indices = @transform_36, window_bounds = array<i64: 128, 128>}, {pipeline_mode = #tpu.pipeline_mode<synchronous>, transform_indices = @transform_37, window_bounds = array<i64: 1, 128>}, {transform_indices = @transform_38, window_bounds = array<i64: 1, 1, 128>}]} {
    %c0 = arith.constant 0 : index
    %c0_0 = arith.constant 0 : index
    %c0_1 = arith.constant 0 : index
    %0 = vector.load %arg1[%c0, %c0_0, %c0_1] : memref<1x64x128xf32, #tpu.memory_space<vmem>>, vector<1x64x128xf32>
    %1 = vector.shape_cast %0 : vector<1x64x128xf32> to vector<64x128xf32>
    %2 = arith.truncf %1 : vector<64x128xf32> to vector<64x128xbf16>
    %c0_2 = arith.constant 0 : index
    %c0_3 = arith.constant 0 : index
    %3 = vector.load %arg2[%c0_2, %c0_3] : memref<128x128xbf16, #tpu.memory_space<vmem>>, vector<128x128xbf16>
    %cst = arith.constant dense<0.000000e+00> : vector<64x128xf32>
    %4 = tpu.matmul %2, %3, %cst {dimension_numbers = #tpu.dot_dimension_numbers<[1], [0], [0], [1], [0, 0, 1, 1], [], []>} : vector<64x128xbf16>, vector<128x128xbf16>, vector<64x128xf32> -> vector<64x128xf32>
    %c0_4 = arith.constant 0 : index
    %c0_5 = arith.constant 0 : index
    %5 = vector.load %arg3[%c0_4, %c0_5] : memref<1x128xf32, #tpu.memory_space<vmem>>, vector<1x128xf32>
    %6 = vector.broadcast %5 : vector<1x128xf32> to vector<64x128xf32>
    %7 = arith.addf %4, %6 : vector<64x128xf32>
    %8 = arith.negf %7 : vector<64x128xf32>
    %9 = math.exp %8 : vector<64x128xf32>
    %cst_6 = arith.constant 1.000000e+00 : f32
    %10 = vector.broadcast %cst_6 : f32 to vector<64x128xf32>
    %11 = arith.addf %10, %9 : vector<64x128xf32>
    %12 = arith.divf %10, %11 : vector<64x128xf32>
    %13 = arith.mulf %7, %12 : vector<64x128xf32>
    %14 = arith.truncf %13 : vector<64x128xf32> to vector<64x128xbf16>
    %c0_7 = arith.constant 0 : index
    %c0_8 = arith.constant 0 : index
    %15 = vector.load %arg4[%c0_7, %c0_8] : memref<64x576xbf16, #tpu.memory_space<vmem>>, vector<64x576xbf16>
    %c0_9 = arith.constant 0 : index
    %c0_10 = arith.constant 0 : index
    %c0_11 = arith.constant 0 : index
    %16 = vector.load %arg5[%c0_9, %c0_10, %c0_11] : memref<9x1x128xbf16, #tpu.memory_space<vmem>>, vector<1x1x128xbf16>
    %17 = vector.shape_cast %16 : vector<1x1x128xbf16> to vector<1x128xbf16>
    %18 = vector.broadcast %17 : vector<1x128xbf16> to vector<64x128xbf16>
    %19 = arith.mulf %14, %18 : vector<64x128xbf16>
    %c1 = arith.constant 1 : index
    %c0_12 = arith.constant 0 : index
    %c0_13 = arith.constant 0 : index
    %20 = vector.load %arg5[%c1, %c0_12, %c0_13] : memref<9x1x128xbf16, #tpu.memory_space<vmem>>, vector<1x1x128xbf16>
    %21 = vector.shape_cast %20 : vector<1x1x128xbf16> to vector<1x128xbf16>
    %22 = vector.broadcast %21 : vector<1x128xbf16> to vector<64x128xbf16>
    %23 = arith.mulf %14, %22 : vector<64x128xbf16>
    %c2 = arith.constant 2 : index
    %c0_14 = arith.constant 0 : index
    %c0_15 = arith.constant 0 : index
    %24 = vector.load %arg5[%c2, %c0_14, %c0_15] : memref<9x1x128xbf16, #tpu.memory_space<vmem>>, vector<1x1x128xbf16>
    %25 = vector.shape_cast %24 : vector<1x1x128xbf16> to vector<1x128xbf16>
    %26 = vector.broadcast %25 : vector<1x128xbf16> to vector<64x128xbf16>
    %27 = arith.mulf %14, %26 : vector<64x128xbf16>
    %c3 = arith.constant 3 : index
    %c0_16 = arith.constant 0 : index
    %c0_17 = arith.constant 0 : index
    %28 = vector.load %arg5[%c3, %c0_16, %c0_17] : memref<9x1x128xbf16, #tpu.memory_space<vmem>>, vector<1x1x128xbf16>
    %29 = vector.shape_cast %28 : vector<1x1x128xbf16> to vector<1x128xbf16>
    %30 = vector.broadcast %29 : vector<1x128xbf16> to vector<64x128xbf16>
    %31 = arith.mulf %14, %30 : vector<64x128xbf16>
    %c4 = arith.constant 4 : index
    %c0_18 = arith.constant 0 : index
    %c0_19 = arith.constant 0 : index
    %32 = vector.load %arg5[%c4, %c0_18, %c0_19] : memref<9x1x128xbf16, #tpu.memory_space<vmem>>, vector<1x1x128xbf16>
    %33 = vector.shape_cast %32 : vector<1x1x128xbf16> to vector<1x128xbf16>
    %34 = vector.broadcast %33 : vector<1x128xbf16> to vector<64x128xbf16>
    %35 = arith.mulf %14, %34 : vector<64x128xbf16>
    %c5 = arith.constant 5 : index
    %c0_20 = arith.constant 0 : index
    %c0_21 = arith.constant 0 : index
    %36 = vector.load %arg5[%c5, %c0_20, %c0_21] : memref<9x1x128xbf16, #tpu.memory_space<vmem>>, vector<1x1x128xbf16>
    %37 = vector.shape_cast %36 : vector<1x1x128xbf16> to vector<1x128xbf16>
    %38 = vector.broadcast %37 : vector<1x128xbf16> to vector<64x128xbf16>
    %39 = arith.mulf %14, %38 : vector<64x128xbf16>
    %c6 = arith.constant 6 : index
    %c0_22 = arith.constant 0 : index
    %c0_23 = arith.constant 0 : index
    %40 = vector.load %arg5[%c6, %c0_22, %c0_23] : memref<9x1x128xbf16, #tpu.memory_space<vmem>>, vector<1x1x128xbf16>
    %41 = vector.shape_cast %40 : vector<1x1x128xbf16> to vector<1x128xbf16>
    %42 = vector.broadcast %41 : vector<1x128xbf16> to vector<64x128xbf16>
    %43 = arith.mulf %14, %42 : vector<64x128xbf16>
    %c7 = arith.constant 7 : index
    %c0_24 = arith.constant 0 : index
    %c0_25 = arith.constant 0 : index
    %44 = vector.load %arg5[%c7, %c0_24, %c0_25] : memref<9x1x128xbf16, #tpu.memory_space<vmem>>, vector<1x1x128xbf16>
    %45 = vector.shape_cast %44 : vector<1x1x128xbf16> to vector<1x128xbf16>
    %46 = vector.broadcast %45 : vector<1x128xbf16> to vector<64x128xbf16>
    %47 = arith.mulf %14, %46 : vector<64x128xbf16>
    %c8 = arith.constant 8 : index
    %c0_26 = arith.constant 0 : index
    %c0_27 = arith.constant 0 : index
    %48 = vector.load %arg5[%c8, %c0_26, %c0_27] : memref<9x1x128xbf16, #tpu.memory_space<vmem>>, vector<1x1x128xbf16>
    %49 = vector.shape_cast %48 : vector<1x1x128xbf16> to vector<1x128xbf16>
    %50 = vector.broadcast %49 : vector<1x128xbf16> to vector<64x128xbf16>
    %51 = arith.mulf %14, %50 : vector<64x128xbf16>
    %52 = tpu.concatenate %19, %23, %27, %31, %35, %39, %43, %47, %51 in 0 : vector<64x128xbf16>, vector<64x128xbf16>, vector<64x128xbf16>, vector<64x128xbf16>, vector<64x128xbf16>, vector<64x128xbf16>, vector<64x128xbf16>, vector<64x128xbf16>, vector<64x128xbf16> -> vector<576x128xbf16>
    %cst_28 = arith.constant dense<0.000000e+00> : vector<64x128xf32>
    %53 = tpu.matmul %15, %52, %cst_28 {dimension_numbers = #tpu.dot_dimension_numbers<[1], [0], [0], [1], [0, 0, 1, 1], [], []>} : vector<64x576xbf16>, vector<576x128xbf16>, vector<64x128xf32> -> vector<64x128xf32>
    %c0_29 = arith.constant 0 : index
    %c0_30 = arith.constant 0 : index
    %54 = vector.load %arg6[%c0_29, %c0_30] : memref<1x128xf32, #tpu.memory_space<vmem>>, vector<1x128xf32>
    %55 = vector.broadcast %54 : vector<1x128xf32> to vector<64x128xf32>
    %56 = arith.addf %53, %55 : vector<64x128xf32>
    %57 = arith.negf %56 : vector<64x128xf32>
    %58 = math.exp %57 : vector<64x128xf32>
    %cst_31 = arith.constant 1.000000e+00 : f32
    %59 = vector.broadcast %cst_31 : f32 to vector<64x128xf32>
    %60 = arith.addf %59, %58 : vector<64x128xf32>
    %61 = arith.divf %59, %60 : vector<64x128xf32>
    %62 = arith.mulf %56, %61 : vector<64x128xf32>
    %63 = vector.shape_cast %62 : vector<64x128xf32> to vector<1x64x128xf32>
    %cst_32 = arith.constant dense<0.000000e+00> : vector<1x128xf32>
    %64 = vector.multi_reduction <add>, %63, %cst_32 [1] : vector<1x64x128xf32> to vector<1x128xf32>
    %cst_33 = arith.constant 6.400000e+01 : f32
    %65 = vector.broadcast %cst_33 : f32 to vector<1x128xf32>
    %66 = arith.divf %64, %65 : vector<1x128xf32>
    %67 = arith.truncf %66 : vector<1x128xf32> to vector<1x128xbf16>
    %c0_34 = arith.constant 0 : index
    %c0_35 = arith.constant 0 : index
    %68 = vector.load %arg7[%c0_34, %c0_35] : memref<128x128xbf16, #tpu.memory_space<vmem>>, vector<128x128xbf16>
    %cst_36 = arith.constant dense<0.000000e+00> : vector<1x128xf32>
    %69 = tpu.matmul %67, %68, %cst_36 {dimension_numbers = #tpu.dot_dimension_numbers<[1], [0], [0], [1], [0, 0, 1, 1], [], []>} : vector<1x128xbf16>, vector<128x128xbf16>, vector<1x128xf32> -> vector<1x128xf32>
    %c0_37 = arith.constant 0 : index
    %c0_38 = arith.constant 0 : index
    %70 = vector.load %arg8[%c0_37, %c0_38] : memref<1x128xf32, #tpu.memory_space<vmem>>, vector<1x128xf32>
    %71 = arith.addf %69, %70 : vector<1x128xf32>
    %72 = arith.negf %71 : vector<1x128xf32>
    %73 = math.exp %72 : vector<1x128xf32>
    %cst_39 = arith.constant 1.000000e+00 : f32
    %74 = vector.broadcast %cst_39 : f32 to vector<1x128xf32>
    %75 = arith.addf %74, %73 : vector<1x128xf32>
    %76 = arith.divf %74, %75 : vector<1x128xf32>
    %77 = arith.mulf %71, %76 : vector<1x128xf32>
    %78 = arith.truncf %77 : vector<1x128xf32> to vector<1x128xbf16>
    %c0_40 = arith.constant 0 : index
    %c0_41 = arith.constant 0 : index
    %79 = vector.load %arg9[%c0_40, %c0_41] : memref<128x128xbf16, #tpu.memory_space<vmem>>, vector<128x128xbf16>
    %cst_42 = arith.constant dense<0.000000e+00> : vector<1x128xf32>
    %80 = tpu.matmul %78, %79, %cst_42 {dimension_numbers = #tpu.dot_dimension_numbers<[1], [0], [0], [1], [0, 0, 1, 1], [], []>} : vector<1x128xbf16>, vector<128x128xbf16>, vector<1x128xf32> -> vector<1x128xf32>
    %c0_43 = arith.constant 0 : index
    %c0_44 = arith.constant 0 : index
    %81 = vector.load %arg10[%c0_43, %c0_44] : memref<1x128xf32, #tpu.memory_space<vmem>>, vector<1x128xf32>
    %82 = arith.addf %80, %81 : vector<1x128xf32>
    %83 = arith.negf %82 : vector<1x128xf32>
    %84 = math.exp %83 : vector<1x128xf32>
    %cst_45 = arith.constant 1.000000e+00 : f32
    %85 = vector.broadcast %cst_45 : f32 to vector<1x128xf32>
    %86 = arith.addf %85, %84 : vector<1x128xf32>
    %87 = arith.divf %85, %86 : vector<1x128xf32>
    %88 = vector.shape_cast %87 : vector<1x128xf32> to vector<1x1x128xf32>
    %89 = vector.broadcast %88 : vector<1x1x128xf32> to vector<1x64x128xf32>
    %90 = arith.mulf %63, %89 : vector<1x64x128xf32>
    %91 = vector.shape_cast %90 : vector<1x64x128xf32> to vector<64x128xf32>
    %92 = arith.truncf %91 : vector<64x128xf32> to vector<64x128xbf16>
    %c0_46 = arith.constant 0 : index
    %c0_47 = arith.constant 0 : index
    %93 = vector.load %arg11[%c0_46, %c0_47] : memref<128x128xbf16, #tpu.memory_space<vmem>>, vector<128x128xbf16>
    %cst_48 = arith.constant dense<0.000000e+00> : vector<64x128xf32>
    %94 = tpu.matmul %92, %93, %cst_48 {dimension_numbers = #tpu.dot_dimension_numbers<[1], [0], [0], [1], [0, 0, 1, 1], [], []>} : vector<64x128xbf16>, vector<128x128xbf16>, vector<64x128xf32> -> vector<64x128xf32>
    %c0_49 = arith.constant 0 : index
    %c0_50 = arith.constant 0 : index
    %95 = vector.load %arg12[%c0_49, %c0_50] : memref<1x128xf32, #tpu.memory_space<vmem>>, vector<1x128xf32>
    %96 = vector.broadcast %95 : vector<1x128xf32> to vector<64x128xf32>
    %97 = arith.addf %94, %96 : vector<64x128xf32>
    %98 = arith.extf %14 : vector<64x128xbf16> to vector<64x128xf32>
    %99 = arith.addf %97, %98 : vector<64x128xf32>
    %100 = arith.truncf %99 : vector<64x128xf32> to vector<64x128xbf16>
    %c0_51 = arith.constant 0 : index
    %c0_52 = arith.constant 0 : index
    %101 = vector.load %arg13[%c0_51, %c0_52] : memref<128x128xbf16, #tpu.memory_space<vmem>>, vector<128x128xbf16>
    %cst_53 = arith.constant dense<0.000000e+00> : vector<64x128xf32>
    %102 = tpu.matmul %100, %101, %cst_53 {dimension_numbers = #tpu.dot_dimension_numbers<[1], [0], [0], [1], [0, 0, 1, 1], [], []>} : vector<64x128xbf16>, vector<128x128xbf16>, vector<64x128xf32> -> vector<64x128xf32>
    %c0_54 = arith.constant 0 : index
    %c0_55 = arith.constant 0 : index
    %103 = vector.load %arg14[%c0_54, %c0_55] : memref<1x128xf32, #tpu.memory_space<vmem>>, vector<1x128xf32>
    %104 = vector.broadcast %103 : vector<1x128xf32> to vector<64x128xf32>
    %105 = arith.addf %102, %104 : vector<64x128xf32>
    %106 = arith.negf %105 : vector<64x128xf32>
    %107 = math.exp %106 : vector<64x128xf32>
    %cst_56 = arith.constant 1.000000e+00 : f32
    %108 = vector.broadcast %cst_56 : f32 to vector<64x128xf32>
    %109 = arith.addf %108, %107 : vector<64x128xf32>
    %110 = arith.divf %108, %109 : vector<64x128xf32>
    %111 = arith.mulf %105, %110 : vector<64x128xf32>
    %112 = arith.truncf %111 : vector<64x128xf32> to vector<64x128xbf16>
    %c0_57 = arith.constant 0 : index
    %c0_58 = arith.constant 0 : index
    %113 = vector.load %arg15[%c0_57, %c0_58] : memref<16x576xbf16, #tpu.memory_space<vmem>>, vector<16x576xbf16>
    %c0_59 = arith.constant 0 : index
    %c0_60 = arith.constant 0 : index
    %c0_61 = arith.constant 0 : index
    %114 = vector.load %arg16[%c0_59, %c0_60, %c0_61] : memref<9x1x128xbf16, #tpu.memory_space<vmem>>, vector<1x1x128xbf16>
    %115 = vector.shape_cast %114 : vector<1x1x128xbf16> to vector<1x128xbf16>
    %116 = vector.broadcast %115 : vector<1x128xbf16> to vector<64x128xbf16>
    %117 = arith.mulf %112, %116 : vector<64x128xbf16>
    %c1_62 = arith.constant 1 : index
    %c0_63 = arith.constant 0 : index
    %c0_64 = arith.constant 0 : index
    %118 = vector.load %arg16[%c1_62, %c0_63, %c0_64] : memref<9x1x128xbf16, #tpu.memory_space<vmem>>, vector<1x1x128xbf16>
    %119 = vector.shape_cast %118 : vector<1x1x128xbf16> to vector<1x128xbf16>
    %120 = vector.broadcast %119 : vector<1x128xbf16> to vector<64x128xbf16>
    %121 = arith.mulf %112, %120 : vector<64x128xbf16>
    %c2_65 = arith.constant 2 : index
    %c0_66 = arith.constant 0 : index
    %c0_67 = arith.constant 0 : index
    %122 = vector.load %arg16[%c2_65, %c0_66, %c0_67] : memref<9x1x128xbf16, #tpu.memory_space<vmem>>, vector<1x1x128xbf16>
    %123 = vector.shape_cast %122 : vector<1x1x128xbf16> to vector<1x128xbf16>
    %124 = vector.broadcast %123 : vector<1x128xbf16> to vector<64x128xbf16>
    %125 = arith.mulf %112, %124 : vector<64x128xbf16>
    %c3_68 = arith.constant 3 : index
    %c0_69 = arith.constant 0 : index
    %c0_70 = arith.constant 0 : index
    %126 = vector.load %arg16[%c3_68, %c0_69, %c0_70] : memref<9x1x128xbf16, #tpu.memory_space<vmem>>, vector<1x1x128xbf16>
    %127 = vector.shape_cast %126 : vector<1x1x128xbf16> to vector<1x128xbf16>
    %128 = vector.broadcast %127 : vector<1x128xbf16> to vector<64x128xbf16>
    %129 = arith.mulf %112, %128 : vector<64x128xbf16>
    %c4_71 = arith.constant 4 : index
    %c0_72 = arith.constant 0 : index
    %c0_73 = arith.constant 0 : index
    %130 = vector.load %arg16[%c4_71, %c0_72, %c0_73] : memref<9x1x128xbf16, #tpu.memory_space<vmem>>, vector<1x1x128xbf16>
    %131 = vector.shape_cast %130 : vector<1x1x128xbf16> to vector<1x128xbf16>
    %132 = vector.broadcast %131 : vector<1x128xbf16> to vector<64x128xbf16>
    %133 = arith.mulf %112, %132 : vector<64x128xbf16>
    %c5_74 = arith.constant 5 : index
    %c0_75 = arith.constant 0 : index
    %c0_76 = arith.constant 0 : index
    %134 = vector.load %arg16[%c5_74, %c0_75, %c0_76] : memref<9x1x128xbf16, #tpu.memory_space<vmem>>, vector<1x1x128xbf16>
    %135 = vector.shape_cast %134 : vector<1x1x128xbf16> to vector<1x128xbf16>
    %136 = vector.broadcast %135 : vector<1x128xbf16> to vector<64x128xbf16>
    %137 = arith.mulf %112, %136 : vector<64x128xbf16>
    %c6_77 = arith.constant 6 : index
    %c0_78 = arith.constant 0 : index
    %c0_79 = arith.constant 0 : index
    %138 = vector.load %arg16[%c6_77, %c0_78, %c0_79] : memref<9x1x128xbf16, #tpu.memory_space<vmem>>, vector<1x1x128xbf16>
    %139 = vector.shape_cast %138 : vector<1x1x128xbf16> to vector<1x128xbf16>
    %140 = vector.broadcast %139 : vector<1x128xbf16> to vector<64x128xbf16>
    %141 = arith.mulf %112, %140 : vector<64x128xbf16>
    %c7_80 = arith.constant 7 : index
    %c0_81 = arith.constant 0 : index
    %c0_82 = arith.constant 0 : index
    %142 = vector.load %arg16[%c7_80, %c0_81, %c0_82] : memref<9x1x128xbf16, #tpu.memory_space<vmem>>, vector<1x1x128xbf16>
    %143 = vector.shape_cast %142 : vector<1x1x128xbf16> to vector<1x128xbf16>
    %144 = vector.broadcast %143 : vector<1x128xbf16> to vector<64x128xbf16>
    %145 = arith.mulf %112, %144 : vector<64x128xbf16>
    %c8_83 = arith.constant 8 : index
    %c0_84 = arith.constant 0 : index
    %c0_85 = arith.constant 0 : index
    %146 = vector.load %arg16[%c8_83, %c0_84, %c0_85] : memref<9x1x128xbf16, #tpu.memory_space<vmem>>, vector<1x1x128xbf16>
    %147 = vector.shape_cast %146 : vector<1x1x128xbf16> to vector<1x128xbf16>
    %148 = vector.broadcast %147 : vector<1x128xbf16> to vector<64x128xbf16>
    %149 = arith.mulf %112, %148 : vector<64x128xbf16>
    %150 = tpu.concatenate %117, %121, %125, %129, %133, %137, %141, %145, %149 in 0 : vector<64x128xbf16>, vector<64x128xbf16>, vector<64x128xbf16>, vector<64x128xbf16>, vector<64x128xbf16>, vector<64x128xbf16>, vector<64x128xbf16>, vector<64x128xbf16>, vector<64x128xbf16> -> vector<576x128xbf16>
    %cst_86 = arith.constant dense<0.000000e+00> : vector<16x128xf32>
    %151 = tpu.matmul %113, %150, %cst_86 {dimension_numbers = #tpu.dot_dimension_numbers<[1], [0], [0], [1], [0, 0, 1, 1], [], []>} : vector<16x576xbf16>, vector<576x128xbf16>, vector<16x128xf32> -> vector<16x128xf32>
    %c0_87 = arith.constant 0 : index
    %c0_88 = arith.constant 0 : index
    %152 = vector.load %arg17[%c0_87, %c0_88] : memref<1x128xf32, #tpu.memory_space<vmem>>, vector<1x128xf32>
    %153 = vector.broadcast %152 : vector<1x128xf32> to vector<16x128xf32>
    %154 = arith.addf %151, %153 : vector<16x128xf32>
    %155 = arith.negf %154 : vector<16x128xf32>
    %156 = math.exp %155 : vector<16x128xf32>
    %cst_89 = arith.constant 1.000000e+00 : f32
    %157 = vector.broadcast %cst_89 : f32 to vector<16x128xf32>
    %158 = arith.addf %157, %156 : vector<16x128xf32>
    %159 = arith.divf %157, %158 : vector<16x128xf32>
    %160 = arith.mulf %154, %159 : vector<16x128xf32>
    %161 = vector.shape_cast %160 : vector<16x128xf32> to vector<1x16x128xf32>
    %cst_90 = arith.constant dense<0.000000e+00> : vector<1x128xf32>
    %162 = vector.multi_reduction <add>, %161, %cst_90 [1] : vector<1x16x128xf32> to vector<1x128xf32>
    %cst_91 = arith.constant 1.600000e+01 : f32
    %163 = vector.broadcast %cst_91 : f32 to vector<1x128xf32>
    %164 = arith.divf %162, %163 : vector<1x128xf32>
    %165 = arith.truncf %164 : vector<1x128xf32> to vector<1x128xbf16>
    %c0_92 = arith.constant 0 : index
    %c0_93 = arith.constant 0 : index
    %166 = vector.load %arg18[%c0_92, %c0_93] : memref<128x128xbf16, #tpu.memory_space<vmem>>, vector<128x128xbf16>
    %cst_94 = arith.constant dense<0.000000e+00> : vector<1x128xf32>
    %167 = tpu.matmul %165, %166, %cst_94 {dimension_numbers = #tpu.dot_dimension_numbers<[1], [0], [0], [1], [0, 0, 1, 1], [], []>} : vector<1x128xbf16>, vector<128x128xbf16>, vector<1x128xf32> -> vector<1x128xf32>
    %c0_95 = arith.constant 0 : index
    %c0_96 = arith.constant 0 : index
    %168 = vector.load %arg19[%c0_95, %c0_96] : memref<1x128xf32, #tpu.memory_space<vmem>>, vector<1x128xf32>
    %169 = arith.addf %167, %168 : vector<1x128xf32>
    %170 = arith.negf %169 : vector<1x128xf32>
    %171 = math.exp %170 : vector<1x128xf32>
    %cst_97 = arith.constant 1.000000e+00 : f32
    %172 = vector.broadcast %cst_97 : f32 to vector<1x128xf32>
    %173 = arith.addf %172, %171 : vector<1x128xf32>
    %174 = arith.divf %172, %173 : vector<1x128xf32>
    %175 = arith.mulf %169, %174 : vector<1x128xf32>
    %176 = arith.truncf %175 : vector<1x128xf32> to vector<1x128xbf16>
    %c0_98 = arith.constant 0 : index
    %c0_99 = arith.constant 0 : index
    %177 = vector.load %arg20[%c0_98, %c0_99] : memref<128x128xbf16, #tpu.memory_space<vmem>>, vector<128x128xbf16>
    %cst_100 = arith.constant dense<0.000000e+00> : vector<1x128xf32>
    %178 = tpu.matmul %176, %177, %cst_100 {dimension_numbers = #tpu.dot_dimension_numbers<[1], [0], [0], [1], [0, 0, 1, 1], [], []>} : vector<1x128xbf16>, vector<128x128xbf16>, vector<1x128xf32> -> vector<1x128xf32>
    %c0_101 = arith.constant 0 : index
    %c0_102 = arith.constant 0 : index
    %179 = vector.load %arg21[%c0_101, %c0_102] : memref<1x128xf32, #tpu.memory_space<vmem>>, vector<1x128xf32>
    %180 = arith.addf %178, %179 : vector<1x128xf32>
    %181 = arith.negf %180 : vector<1x128xf32>
    %182 = math.exp %181 : vector<1x128xf32>
    %cst_103 = arith.constant 1.000000e+00 : f32
    %183 = vector.broadcast %cst_103 : f32 to vector<1x128xf32>
    %184 = arith.addf %183, %182 : vector<1x128xf32>
    %185 = arith.divf %183, %184 : vector<1x128xf32>
    %186 = vector.shape_cast %185 : vector<1x128xf32> to vector<1x1x128xf32>
    %187 = vector.broadcast %186 : vector<1x1x128xf32> to vector<1x16x128xf32>
    %188 = arith.mulf %161, %187 : vector<1x16x128xf32>
    %189 = vector.shape_cast %188 : vector<1x16x128xf32> to vector<16x128xf32>
    %190 = arith.truncf %189 : vector<16x128xf32> to vector<16x128xbf16>
    %c0_104 = arith.constant 0 : index
    %c0_105 = arith.constant 0 : index
    %191 = vector.load %arg22[%c0_104, %c0_105] : memref<128x128xbf16, #tpu.memory_space<vmem>>, vector<128x128xbf16>
    %cst_106 = arith.constant dense<0.000000e+00> : vector<16x128xf32>
    %192 = tpu.matmul %190, %191, %cst_106 {dimension_numbers = #tpu.dot_dimension_numbers<[1], [0], [0], [1], [0, 0, 1, 1], [], []>} : vector<16x128xbf16>, vector<128x128xbf16>, vector<16x128xf32> -> vector<16x128xf32>
    %c0_107 = arith.constant 0 : index
    %c0_108 = arith.constant 0 : index
    %193 = vector.load %arg23[%c0_107, %c0_108] : memref<1x128xf32, #tpu.memory_space<vmem>>, vector<1x128xf32>
    %194 = vector.broadcast %193 : vector<1x128xf32> to vector<16x128xf32>
    %195 = arith.addf %192, %194 : vector<16x128xf32>
    %196 = arith.truncf %195 : vector<16x128xf32> to vector<16x128xbf16>
    %c0_109 = arith.constant 0 : index
    %c0_110 = arith.constant 0 : index
    %197 = vector.load %arg24[%c0_109, %c0_110] : memref<128x128xbf16, #tpu.memory_space<vmem>>, vector<128x128xbf16>
    %cst_111 = arith.constant dense<0.000000e+00> : vector<16x128xf32>
    %198 = tpu.matmul %196, %197, %cst_111 {dimension_numbers = #tpu.dot_dimension_numbers<[1], [0], [0], [1], [0, 0, 1, 1], [], []>} : vector<16x128xbf16>, vector<128x128xbf16>, vector<16x128xf32> -> vector<16x128xf32>
    %c0_112 = arith.constant 0 : index
    %c0_113 = arith.constant 0 : index
    %199 = vector.load %arg25[%c0_112, %c0_113] : memref<1x128xf32, #tpu.memory_space<vmem>>, vector<1x128xf32>
    %200 = vector.broadcast %199 : vector<1x128xf32> to vector<16x128xf32>
    %201 = arith.addf %198, %200 : vector<16x128xf32>
    %202 = arith.negf %201 : vector<16x128xf32>
    %203 = math.exp %202 : vector<16x128xf32>
    %cst_114 = arith.constant 1.000000e+00 : f32
    %204 = vector.broadcast %cst_114 : f32 to vector<16x128xf32>
    %205 = arith.addf %204, %203 : vector<16x128xf32>
    %206 = arith.divf %204, %205 : vector<16x128xf32>
    %207 = arith.mulf %201, %206 : vector<16x128xf32>
    %208 = arith.truncf %207 : vector<16x128xf32> to vector<16x128xbf16>
    %c0_115 = arith.constant 0 : index
    %c0_116 = arith.constant 0 : index
    %209 = vector.load %arg26[%c0_115, %c0_116] : memref<16x144xbf16, #tpu.memory_space<vmem>>, vector<16x144xbf16>
    %c0_117 = arith.constant 0 : index
    %c0_118 = arith.constant 0 : index
    %c0_119 = arith.constant 0 : index
    %210 = vector.load %arg27[%c0_117, %c0_118, %c0_119] : memref<9x1x128xbf16, #tpu.memory_space<vmem>>, vector<1x1x128xbf16>
    %211 = vector.shape_cast %210 : vector<1x1x128xbf16> to vector<1x128xbf16>
    %212 = vector.broadcast %211 : vector<1x128xbf16> to vector<16x128xbf16>
    %213 = arith.mulf %208, %212 : vector<16x128xbf16>
    %c1_120 = arith.constant 1 : index
    %c0_121 = arith.constant 0 : index
    %c0_122 = arith.constant 0 : index
    %214 = vector.load %arg27[%c1_120, %c0_121, %c0_122] : memref<9x1x128xbf16, #tpu.memory_space<vmem>>, vector<1x1x128xbf16>
    %215 = vector.shape_cast %214 : vector<1x1x128xbf16> to vector<1x128xbf16>
    %216 = vector.broadcast %215 : vector<1x128xbf16> to vector<16x128xbf16>
    %217 = arith.mulf %208, %216 : vector<16x128xbf16>
    %c2_123 = arith.constant 2 : index
    %c0_124 = arith.constant 0 : index
    %c0_125 = arith.constant 0 : index
    %218 = vector.load %arg27[%c2_123, %c0_124, %c0_125] : memref<9x1x128xbf16, #tpu.memory_space<vmem>>, vector<1x1x128xbf16>
    %219 = vector.shape_cast %218 : vector<1x1x128xbf16> to vector<1x128xbf16>
    %220 = vector.broadcast %219 : vector<1x128xbf16> to vector<16x128xbf16>
    %221 = arith.mulf %208, %220 : vector<16x128xbf16>
    %c3_126 = arith.constant 3 : index
    %c0_127 = arith.constant 0 : index
    %c0_128 = arith.constant 0 : index
    %222 = vector.load %arg27[%c3_126, %c0_127, %c0_128] : memref<9x1x128xbf16, #tpu.memory_space<vmem>>, vector<1x1x128xbf16>
    %223 = vector.shape_cast %222 : vector<1x1x128xbf16> to vector<1x128xbf16>
    %224 = vector.broadcast %223 : vector<1x128xbf16> to vector<16x128xbf16>
    %225 = arith.mulf %208, %224 : vector<16x128xbf16>
    %c4_129 = arith.constant 4 : index
    %c0_130 = arith.constant 0 : index
    %c0_131 = arith.constant 0 : index
    %226 = vector.load %arg27[%c4_129, %c0_130, %c0_131] : memref<9x1x128xbf16, #tpu.memory_space<vmem>>, vector<1x1x128xbf16>
    %227 = vector.shape_cast %226 : vector<1x1x128xbf16> to vector<1x128xbf16>
    %228 = vector.broadcast %227 : vector<1x128xbf16> to vector<16x128xbf16>
    %229 = arith.mulf %208, %228 : vector<16x128xbf16>
    %c5_132 = arith.constant 5 : index
    %c0_133 = arith.constant 0 : index
    %c0_134 = arith.constant 0 : index
    %230 = vector.load %arg27[%c5_132, %c0_133, %c0_134] : memref<9x1x128xbf16, #tpu.memory_space<vmem>>, vector<1x1x128xbf16>
    %231 = vector.shape_cast %230 : vector<1x1x128xbf16> to vector<1x128xbf16>
    %232 = vector.broadcast %231 : vector<1x128xbf16> to vector<16x128xbf16>
    %233 = arith.mulf %208, %232 : vector<16x128xbf16>
    %c6_135 = arith.constant 6 : index
    %c0_136 = arith.constant 0 : index
    %c0_137 = arith.constant 0 : index
    %234 = vector.load %arg27[%c6_135, %c0_136, %c0_137] : memref<9x1x128xbf16, #tpu.memory_space<vmem>>, vector<1x1x128xbf16>
    %235 = vector.shape_cast %234 : vector<1x1x128xbf16> to vector<1x128xbf16>
    %236 = vector.broadcast %235 : vector<1x128xbf16> to vector<16x128xbf16>
    %237 = arith.mulf %208, %236 : vector<16x128xbf16>
    %c7_138 = arith.constant 7 : index
    %c0_139 = arith.constant 0 : index
    %c0_140 = arith.constant 0 : index
    %238 = vector.load %arg27[%c7_138, %c0_139, %c0_140] : memref<9x1x128xbf16, #tpu.memory_space<vmem>>, vector<1x1x128xbf16>
    %239 = vector.shape_cast %238 : vector<1x1x128xbf16> to vector<1x128xbf16>
    %240 = vector.broadcast %239 : vector<1x128xbf16> to vector<16x128xbf16>
    %241 = arith.mulf %208, %240 : vector<16x128xbf16>
    %c8_141 = arith.constant 8 : index
    %c0_142 = arith.constant 0 : index
    %c0_143 = arith.constant 0 : index
    %242 = vector.load %arg27[%c8_141, %c0_142, %c0_143] : memref<9x1x128xbf16, #tpu.memory_space<vmem>>, vector<1x1x128xbf16>
    %243 = vector.shape_cast %242 : vector<1x1x128xbf16> to vector<1x128xbf16>
    %244 = vector.broadcast %243 : vector<1x128xbf16> to vector<16x128xbf16>
    %245 = arith.mulf %208, %244 : vector<16x128xbf16>
    %246 = tpu.concatenate %213, %217, %221, %225, %229, %233, %237, %241, %245 in 0 : vector<16x128xbf16>, vector<16x128xbf16>, vector<16x128xbf16>, vector<16x128xbf16>, vector<16x128xbf16>, vector<16x128xbf16>, vector<16x128xbf16>, vector<16x128xbf16>, vector<16x128xbf16> -> vector<144x128xbf16>
    %cst_144 = arith.constant dense<0.000000e+00> : vector<16x128xf32>
    %247 = tpu.matmul %209, %246, %cst_144 {dimension_numbers = #tpu.dot_dimension_numbers<[1], [0], [0], [1], [0, 0, 1, 1], [], []>} : vector<16x144xbf16>, vector<144x128xbf16>, vector<16x128xf32> -> vector<16x128xf32>
    %c0_145 = arith.constant 0 : index
    %c0_146 = arith.constant 0 : index
    %248 = vector.load %arg28[%c0_145, %c0_146] : memref<1x128xf32, #tpu.memory_space<vmem>>, vector<1x128xf32>
    %249 = vector.broadcast %248 : vector<1x128xf32> to vector<16x128xf32>
    %250 = arith.addf %247, %249 : vector<16x128xf32>
    %251 = arith.negf %250 : vector<16x128xf32>
    %252 = math.exp %251 : vector<16x128xf32>
    %cst_147 = arith.constant 1.000000e+00 : f32
    %253 = vector.broadcast %cst_147 : f32 to vector<16x128xf32>
    %254 = arith.addf %253, %252 : vector<16x128xf32>
    %255 = arith.divf %253, %254 : vector<16x128xf32>
    %256 = arith.mulf %250, %255 : vector<16x128xf32>
    %257 = vector.shape_cast %256 : vector<16x128xf32> to vector<1x16x128xf32>
    %cst_148 = arith.constant dense<0.000000e+00> : vector<1x128xf32>
    %258 = vector.multi_reduction <add>, %257, %cst_148 [1] : vector<1x16x128xf32> to vector<1x128xf32>
    %cst_149 = arith.constant 1.600000e+01 : f32
    %259 = vector.broadcast %cst_149 : f32 to vector<1x128xf32>
    %260 = arith.divf %258, %259 : vector<1x128xf32>
    %261 = arith.truncf %260 : vector<1x128xf32> to vector<1x128xbf16>
    %c0_150 = arith.constant 0 : index
    %c0_151 = arith.constant 0 : index
    %262 = vector.load %arg29[%c0_150, %c0_151] : memref<128x128xbf16, #tpu.memory_space<vmem>>, vector<128x128xbf16>
    %cst_152 = arith.constant dense<0.000000e+00> : vector<1x128xf32>
    %263 = tpu.matmul %261, %262, %cst_152 {dimension_numbers = #tpu.dot_dimension_numbers<[1], [0], [0], [1], [0, 0, 1, 1], [], []>} : vector<1x128xbf16>, vector<128x128xbf16>, vector<1x128xf32> -> vector<1x128xf32>
    %c0_153 = arith.constant 0 : index
    %c0_154 = arith.constant 0 : index
    %264 = vector.load %arg30[%c0_153, %c0_154] : memref<1x128xf32, #tpu.memory_space<vmem>>, vector<1x128xf32>
    %265 = arith.addf %263, %264 : vector<1x128xf32>
    %266 = arith.negf %265 : vector<1x128xf32>
    %267 = math.exp %266 : vector<1x128xf32>
    %cst_155 = arith.constant 1.000000e+00 : f32
    %268 = vector.broadcast %cst_155 : f32 to vector<1x128xf32>
    %269 = arith.addf %268, %267 : vector<1x128xf32>
    %270 = arith.divf %268, %269 : vector<1x128xf32>
    %271 = arith.mulf %265, %270 : vector<1x128xf32>
    %272 = arith.truncf %271 : vector<1x128xf32> to vector<1x128xbf16>
    %c0_156 = arith.constant 0 : index
    %c0_157 = arith.constant 0 : index
    %273 = vector.load %arg31[%c0_156, %c0_157] : memref<128x128xbf16, #tpu.memory_space<vmem>>, vector<128x128xbf16>
    %cst_158 = arith.constant dense<0.000000e+00> : vector<1x128xf32>
    %274 = tpu.matmul %272, %273, %cst_158 {dimension_numbers = #tpu.dot_dimension_numbers<[1], [0], [0], [1], [0, 0, 1, 1], [], []>} : vector<1x128xbf16>, vector<128x128xbf16>, vector<1x128xf32> -> vector<1x128xf32>
    %c0_159 = arith.constant 0 : index
    %c0_160 = arith.constant 0 : index
    %275 = vector.load %arg32[%c0_159, %c0_160] : memref<1x128xf32, #tpu.memory_space<vmem>>, vector<1x128xf32>
    %276 = arith.addf %274, %275 : vector<1x128xf32>
    %277 = arith.negf %276 : vector<1x128xf32>
    %278 = math.exp %277 : vector<1x128xf32>
    %cst_161 = arith.constant 1.000000e+00 : f32
    %279 = vector.broadcast %cst_161 : f32 to vector<1x128xf32>
    %280 = arith.addf %279, %278 : vector<1x128xf32>
    %281 = arith.divf %279, %280 : vector<1x128xf32>
    %282 = vector.shape_cast %281 : vector<1x128xf32> to vector<1x1x128xf32>
    %283 = vector.broadcast %282 : vector<1x1x128xf32> to vector<1x16x128xf32>
    %284 = arith.mulf %257, %283 : vector<1x16x128xf32>
    %285 = vector.shape_cast %284 : vector<1x16x128xf32> to vector<16x128xf32>
    %286 = arith.truncf %285 : vector<16x128xf32> to vector<16x128xbf16>
    %c0_162 = arith.constant 0 : index
    %c0_163 = arith.constant 0 : index
    %287 = vector.load %arg33[%c0_162, %c0_163] : memref<128x128xbf16, #tpu.memory_space<vmem>>, vector<128x128xbf16>
    %cst_164 = arith.constant dense<0.000000e+00> : vector<16x128xf32>
    %288 = tpu.matmul %286, %287, %cst_164 {dimension_numbers = #tpu.dot_dimension_numbers<[1], [0], [0], [1], [0, 0, 1, 1], [], []>} : vector<16x128xbf16>, vector<128x128xbf16>, vector<16x128xf32> -> vector<16x128xf32>
    %c0_165 = arith.constant 0 : index
    %c0_166 = arith.constant 0 : index
    %289 = vector.load %arg34[%c0_165, %c0_166] : memref<1x128xf32, #tpu.memory_space<vmem>>, vector<1x128xf32>
    %290 = vector.broadcast %289 : vector<1x128xf32> to vector<16x128xf32>
    %291 = arith.addf %288, %290 : vector<16x128xf32>
    %292 = arith.extf %196 : vector<16x128xbf16> to vector<16x128xf32>
    %293 = arith.addf %291, %292 : vector<16x128xf32>
    %294 = arith.truncf %293 : vector<16x128xf32> to vector<16x128xbf16>
    %c0_167 = arith.constant 0 : index
    %c0_168 = arith.constant 0 : index
    %295 = vector.load %arg35[%c0_167, %c0_168] : memref<128x128xbf16, #tpu.memory_space<vmem>>, vector<128x128xbf16>
    %cst_169 = arith.constant dense<0.000000e+00> : vector<16x128xf32>
    %296 = tpu.matmul %294, %295, %cst_169 {dimension_numbers = #tpu.dot_dimension_numbers<[1], [0], [0], [1], [0, 0, 1, 1], [], []>} : vector<16x128xbf16>, vector<128x128xbf16>, vector<16x128xf32> -> vector<16x128xf32>
    %c0_170 = arith.constant 0 : index
    %c0_171 = arith.constant 0 : index
    %297 = vector.load %arg36[%c0_170, %c0_171] : memref<1x128xf32, #tpu.memory_space<vmem>>, vector<1x128xf32>
    %298 = vector.broadcast %297 : vector<1x128xf32> to vector<16x128xf32>
    %299 = arith.addf %296, %298 : vector<16x128xf32>
    %300 = arith.negf %299 : vector<16x128xf32>
    %301 = math.exp %300 : vector<16x128xf32>
    %cst_172 = arith.constant 1.000000e+00 : f32
    %302 = vector.broadcast %cst_172 : f32 to vector<16x128xf32>
    %303 = arith.addf %302, %301 : vector<16x128xf32>
    %304 = arith.divf %302, %303 : vector<16x128xf32>
    %305 = arith.mulf %299, %304 : vector<16x128xf32>
    %306 = vector.shape_cast %305 : vector<16x128xf32> to vector<1x16x128xf32>
    %cst_173 = arith.constant dense<0.000000e+00> : vector<1x128xf32>
    %307 = vector.multi_reduction <add>, %306, %cst_173 [1] : vector<1x16x128xf32> to vector<1x128xf32>
    %cst_174 = arith.constant 1.600000e+01 : f32
    %308 = vector.broadcast %cst_174 : f32 to vector<1x128xf32>
    %309 = arith.divf %307, %308 : vector<1x128xf32>
    %310 = arith.truncf %309 : vector<1x128xf32> to vector<1x128xbf16>
    %c0_175 = arith.constant 0 : index
    %c0_176 = arith.constant 0 : index
    %311 = vector.load %arg37[%c0_175, %c0_176] : memref<128x128xbf16, #tpu.memory_space<vmem>>, vector<128x128xbf16>
    %cst_177 = arith.constant dense<0.000000e+00> : vector<1x128xf32>
    %312 = tpu.matmul %310, %311, %cst_177 {dimension_numbers = #tpu.dot_dimension_numbers<[1], [0], [0], [1], [0, 0, 1, 1], [], []>} : vector<1x128xbf16>, vector<128x128xbf16>, vector<1x128xf32> -> vector<1x128xf32>
    %c0_178 = arith.constant 0 : index
    %c0_179 = arith.constant 0 : index
    %313 = vector.load %arg38[%c0_178, %c0_179] : memref<1x128xf32, #tpu.memory_space<vmem>>, vector<1x128xf32>
    %314 = arith.addf %312, %313 : vector<1x128xf32>
    %c0_180 = arith.constant 0 : index
    %c0_181 = arith.constant 0 : index
    %c0_182 = arith.constant 0 : index
    %315 = vector.load %arg39[%c0_180, %c0_181, %c0_182] : memref<1x1x128xf32, #tpu.memory_space<vmem>>, vector<1x1x128xf32>
    %316 = vector.shape_cast %315 : vector<1x1x128xf32> to vector<1x128xf32>
    %317 = vector.shape_cast %314 : vector<1x128xf32> to vector<1x1x128xf32>
    tpu.vector_store %arg39[%c0_180, %c0_181, %c0_182], %317 {strides = array<i32>} : memref<1x1x128xf32, #tpu.memory_space<vmem>>, vector<1x1x128xf32>,
    return
  }
  func.func @transform_0(%arg0: i32) -> (i32, i32, i32) {
    %c0_i32 = arith.constant 0 : i32
    %c0_i32_0 = arith.constant 0 : i32
    %c0_i32_1 = arith.constant 0 : i32
    return %arg0, %c0_i32, %c0_i32_0 : i32, i32, i32
  }
  func.func @transform_1(%arg0: i32) -> (i32, i32) {
    %c0_i32 = arith.constant 0 : i32
    %c0_i32_0 = arith.constant 0 : i32
    %c0_i32_1 = arith.constant 0 : i32
    return %c0_i32, %c0_i32_0 : i32, i32
  }
  func.func @transform_2(%arg0: i32) -> (i32, i32) {
    %c0_i32 = arith.constant 0 : i32
    %c0_i32_0 = arith.constant 0 : i32
    %c0_i32_1 = arith.constant 0 : i32
    return %c0_i32, %c0_i32_0 : i32, i32
  }
  func.func @transform_3(%arg0: i32) -> (i32, i32) {
    %c0_i32 = arith.constant 0 : i32
    %c0_i32_0 = arith.constant 0 : i32
    %c0_i32_1 = arith.constant 0 : i32
    return %c0_i32, %c0_i32_0 : i32, i32
  }
  func.func @transform_4(%arg0: i32) -> (i32, i32, i32) {
    %c0_i32 = arith.constant 0 : i32
    %c0_i32_0 = arith.constant 0 : i32
    %c0_i32_1 = arith.constant 0 : i32
    %c0_i32_2 = arith.constant 0 : i32
    return %c0_i32, %c0_i32_0, %c0_i32_1 : i32, i32, i32
  }
  func.func @transform_5(%arg0: i32) -> (i32, i32) {
    %c0_i32 = arith.constant 0 : i32
    %c0_i32_0 = arith.constant 0 : i32
    %c0_i32_1 = arith.constant 0 : i32
    return %c0_i32, %c0_i32_0 : i32, i32
  }
  func.func @transform_6(%arg0: i32) -> (i32, i32) {
    %c0_i32 = arith.constant 0 : i32
    %c0_i32_0 = arith.constant 0 : i32
    %c0_i32_1 = arith.constant 0 : i32
    return %c0_i32, %c0_i32_0 : i32, i32
  }
  func.func @transform_7(%arg0: i32) -> (i32, i32) {
    %c0_i32 = arith.constant 0 : i32
    %c0_i32_0 = arith.constant 0 : i32
    %c0_i32_1 = arith.constant 0 : i32
    return %c0_i32, %c0_i32_0 : i32, i32
  }
  func.func @transform_8(%arg0: i32) -> (i32, i32) {
    %c0_i32 = arith.constant 0 : i32
    %c0_i32_0 = arith.constant 0 : i32
    %c0_i32_1 = arith.constant 0 : i32
    return %c0_i32, %c0_i32_0 : i32, i32
  }
  func.func @transform_9(%arg0: i32) -> (i32, i32) {
    %c0_i32 = arith.constant 0 : i32
    %c0_i32_0 = arith.constant 0 : i32
    %c0_i32_1 = arith.constant 0 : i32
    return %c0_i32, %c0_i32_0 : i32, i32
  }
  func.func @transform_10(%arg0: i32) -> (i32, i32) {
    %c0_i32 = arith.constant 0 : i32
    %c0_i32_0 = arith.constant 0 : i32
    %c0_i32_1 = arith.constant 0 : i32
    return %c0_i32, %c0_i32_0 : i32, i32
  }
  func.func @transform_11(%arg0: i32) -> (i32, i32) {
    %c0_i32 = arith.constant 0 : i32
    %c0_i32_0 = arith.constant 0 : i32
    %c0_i32_1 = arith.constant 0 : i32
    return %c0_i32, %c0_i32_0 : i32, i32
  }
  func.func @transform_12(%arg0: i32) -> (i32, i32) {
    %c0_i32 = arith.constant 0 : i32
    %c0_i32_0 = arith.constant 0 : i32
    %c0_i32_1 = arith.constant 0 : i32
    return %c0_i32, %c0_i32_0 : i32, i32
  }
  func.func @transform_13(%arg0: i32) -> (i32, i32) {
    %c0_i32 = arith.constant 0 : i32
    %c0_i32_0 = arith.constant 0 : i32
    %c0_i32_1 = arith.constant 0 : i32
    return %c0_i32, %c0_i32_0 : i32, i32
  }
  func.func @transform_14(%arg0: i32) -> (i32, i32) {
    %c0_i32 = arith.constant 0 : i32
    %c0_i32_0 = arith.constant 0 : i32
    %c0_i32_1 = arith.constant 0 : i32
    return %c0_i32, %c0_i32_0 : i32, i32
  }
  func.func @transform_15(%arg0: i32) -> (i32, i32, i32) {
    %c0_i32 = arith.constant 0 : i32
    %c0_i32_0 = arith.constant 0 : i32
    %c0_i32_1 = arith.constant 0 : i32
    %c0_i32_2 = arith.constant 0 : i32
    return %c0_i32, %c0_i32_0, %c0_i32_1 : i32, i32, i32
  }
  func.func @transform_16(%arg0: i32) -> (i32, i32) {
    %c0_i32 = arith.constant 0 : i32
    %c0_i32_0 = arith.constant 0 : i32
    %c0_i32_1 = arith.constant 0 : i32
    return %c0_i32, %c0_i32_0 : i32, i32
  }
  func.func @transform_17(%arg0: i32) -> (i32, i32) {
    %c0_i32 = arith.constant 0 : i32
    %c0_i32_0 = arith.constant 0 : i32
    %c0_i32_1 = arith.constant 0 : i32
    return %c0_i32, %c0_i32_0 : i32, i32
  }
  func.func @transform_18(%arg0: i32) -> (i32, i32) {
    %c0_i32 = arith.constant 0 : i32
    %c0_i32_0 = arith.constant 0 : i32
    %c0_i32_1 = arith.constant 0 : i32
    return %c0_i32, %c0_i32_0 : i32, i32
  }
  func.func @transform_19(%arg0: i32) -> (i32, i32) {
    %c0_i32 = arith.constant 0 : i32
    %c0_i32_0 = arith.constant 0 : i32
    %c0_i32_1 = arith.constant 0 : i32
    return %c0_i32, %c0_i32_0 : i32, i32
  }
  func.func @transform_20(%arg0: i32) -> (i32, i32) {
    %c0_i32 = arith.constant 0 : i32
    %c0_i32_0 = arith.constant 0 : i32
    %c0_i32_1 = arith.constant 0 : i32
    return %c0_i32, %c0_i32_0 : i32, i32
  }
  func.func @transform_21(%arg0: i32) -> (i32, i32) {
    %c0_i32 = arith.constant 0 : i32
    %c0_i32_0 = arith.constant 0 : i32
    %c0_i32_1 = arith.constant 0 : i32
    return %c0_i32, %c0_i32_0 : i32, i32
  }
  func.func @transform_22(%arg0: i32) -> (i32, i32) {
    %c0_i32 = arith.constant 0 : i32
    %c0_i32_0 = arith.constant 0 : i32
    %c0_i32_1 = arith.constant 0 : i32
    return %c0_i32, %c0_i32_0 : i32, i32
  }
  func.func @transform_23(%arg0: i32) -> (i32, i32) {
    %c0_i32 = arith.constant 0 : i32
    %c0_i32_0 = arith.constant 0 : i32
    %c0_i32_1 = arith.constant 0 : i32
    return %c0_i32, %c0_i32_0 : i32, i32
  }
  func.func @transform_24(%arg0: i32) -> (i32, i32) {
    %c0_i32 = arith.constant 0 : i32
    %c0_i32_0 = arith.constant 0 : i32
    %c0_i32_1 = arith.constant 0 : i32
    return %c0_i32, %c0_i32_0 : i32, i32
  }
  func.func @transform_25(%arg0: i32) -> (i32, i32) {
    %c0_i32 = arith.constant 0 : i32
    %c0_i32_0 = arith.constant 0 : i32
    %c0_i32_1 = arith.constant 0 : i32
    return %c0_i32, %c0_i32_0 : i32, i32
  }
  func.func @transform_26(%arg0: i32) -> (i32, i32, i32) {
    %c0_i32 = arith.constant 0 : i32
    %c0_i32_0 = arith.constant 0 : i32
    %c0_i32_1 = arith.constant 0 : i32
    %c0_i32_2 = arith.constant 0 : i32
    return %c0_i32, %c0_i32_0, %c0_i32_1 : i32, i32, i32
  }
  func.func @transform_27(%arg0: i32) -> (i32, i32) {
    %c0_i32 = arith.constant 0 : i32
    %c0_i32_0 = arith.constant 0 : i32
    %c0_i32_1 = arith.constant 0 : i32
    return %c0_i32, %c0_i32_0 : i32, i32
  }
  func.func @transform_28(%arg0: i32) -> (i32, i32) {
    %c0_i32 = arith.constant 0 : i32
    %c0_i32_0 = arith.constant 0 : i32
    %c0_i32_1 = arith.constant 0 : i32
    return %c0_i32, %c0_i32_0 : i32, i32
  }
  func.func @transform_29(%arg0: i32) -> (i32, i32) {
    %c0_i32 = arith.constant 0 : i32
    %c0_i32_0 = arith.constant 0 : i32
    %c0_i32_1 = arith.constant 0 : i32
    return %c0_i32, %c0_i32_0 : i32, i32
  }
  func.func @transform_30(%arg0: i32) -> (i32, i32) {
    %c0_i32 = arith.constant 0 : i32
    %c0_i32_0 = arith.constant 0 : i32
    %c0_i32_1 = arith.constant 0 : i32
    return %c0_i32, %c0_i32_0 : i32, i32
  }
  func.func @transform_31(%arg0: i32) -> (i32, i32) {
    %c0_i32 = arith.constant 0 : i32
    %c0_i32_0 = arith.constant 0 : i32
    %c0_i32_1 = arith.constant 0 : i32
    return %c0_i32, %c0_i32_0 : i32, i32
  }
  func.func @transform_32(%arg0: i32) -> (i32, i32) {
    %c0_i32 = arith.constant 0 : i32
    %c0_i32_0 = arith.constant 0 : i32
    %c0_i32_1 = arith.constant 0 : i32
    return %c0_i32, %c0_i32_0 : i32, i32
  }
  func.func @transform_33(%arg0: i32) -> (i32, i32) {
    %c0_i32 = arith.constant 0 : i32
    %c0_i32_0 = arith.constant 0 : i32
    %c0_i32_1 = arith.constant 0 : i32
    return %c0_i32, %c0_i32_0 : i32, i32
  }
  func.func @transform_34(%arg0: i32) -> (i32, i32) {
    %c0_i32 = arith.constant 0 : i32
    %c0_i32_0 = arith.constant 0 : i32
    %c0_i32_1 = arith.constant 0 : i32
    return %c0_i32, %c0_i32_0 : i32, i32
  }
  func.func @transform_35(%arg0: i32) -> (i32, i32) {
    %c0_i32 = arith.constant 0 : i32
    %c0_i32_0 = arith.constant 0 : i32
    %c0_i32_1 = arith.constant 0 : i32
    return %c0_i32, %c0_i32_0 : i32, i32
  }
  func.func @transform_36(%arg0: i32) -> (i32, i32) {
    %c0_i32 = arith.constant 0 : i32
    %c0_i32_0 = arith.constant 0 : i32
    %c0_i32_1 = arith.constant 0 : i32
    return %c0_i32, %c0_i32_0 : i32, i32
  }
  func.func @transform_37(%arg0: i32) -> (i32, i32) {
    %c0_i32 = arith.constant 0 : i32
    %c0_i32_0 = arith.constant 0 : i32
    %c0_i32_1 = arith.constant 0 : i32
    return %c0_i32, %c0_i32_0 : i32, i32
  }
  func.func @transform_38(%arg0: i32) -> (i32, i32, i32) {
    %c0_i32 = arith.constant 0 : i32
    %c0_i32_0 = arith.constant 0 : i32
    %c0_i32_1 = arith.constant 0 : i32
    return %arg0, %c0_i32, %c0_i32_0 : i32, i32, i32
  }
}

</mosaic_0001>

<bundles_post_ra>
// kernel: _lambda_.1
= control target key start
LH: loop header
LB: loop body
LE: loop exit
PB: predicated region body
PF: predicated region fallthrough
CT: control target
= control target key end

     0   :  { %s5388_s6 = smov 1   ;;  %s5389_s10 = smov 2   ;;  %s6267_s0 = inlined_call_operand.smem [shape: u32[39], index: -1, kind: input, shape index: {}] }
   0x1   :  { %s5438_s5 = sld [smem:[%s6267_s0]]   ;;  %s5390_s14 = smov 3  }
   0x2   :  { %s5443_s9 = sld [smem:[%s6267_s0 + %s5388_s6]]   ;;  %s5391_s18 = smov 4  }
   0x3   :  { %s5448_s13 = sld [smem:[%s6267_s0 + %s5389_s10]]   ;;  %s5392_s22 = smov 5  }
   0x4   :  { %s5453_s17 = sld [smem:[%s6267_s0 + %s5390_s14]]   ;;  %s5393_s26 = smov 6  }
   0x5   :  { %s5458_s21 = sld [smem:[%s6267_s0 + %s5391_s18]]   ;;  %s5394_s30 = smov 7  }
   0x6   :  { %s5463_s25 = sld [smem:[%s6267_s0 + %s5392_s22]]   ;;  %s5395_s4 = smov 8  }
   0x7   :  { %6291 = sst [smem:[#allocation5_spill]] %s5438_s5  ;;  %s5396_s10 = smov 9  }
   0x8   :  { %6292 = sst [smem:[#allocation6_spill]] %s5443_s9  ;;  %s5397_s15 = smov 10  }
   0x9   :  { %6293 = sst [smem:[#allocation7_spill]] %s5448_s13  ;;  %s5398_s20 = smov 11  }
   0xa   :  { %s5468_s29 = sld [smem:[%s6267_s0 + %s5393_s26]]   ;;  %s5399_s26 = smov 12  }
   0xb   :  { %s5473_s3 = sld [smem:[%s6267_s0 + %s5394_s30]]   ;;  %s5400_s1 = smov 13  }
   0xc   :  { %s5478_s8 = sld [smem:[%s6267_s0 + %s5395_s4]]   ;;  %s5401_s7 = smov 14  }
   0xd   :  { %s5483_s14 = sld [smem:[%s6267_s0 + %s5396_s10]]   ;;  %s5403_s22 = smov 16  }
   0xe   :  { %s5488_s19 = sld [smem:[%s6267_s0 + %s5397_s15]]   ;;  %s5402_s15 = smov 15  }
   0xf   :  { %s5493_s24 = sld [smem:[%s6267_s0 + %s5398_s20]]   ;;  %s5404_s28 = smov 17  }
  0x10   :  { %s5498_s30 = sld [smem:[%s6267_s0 + %s5399_s26]]  }
  0x11   :  { %6294 = sst [smem:[#allocation8_spill]] %s5473_s3 }
  0x12   :  { %6295 = sst [smem:[#allocation9_spill]] %s5478_s8 }
  0x13   :  { %s5503_s6 = sld [smem:[%s6267_s0 + %s5400_s1]]  }
  0x14   :  { %s5508_s12 = sld [smem:[%s6267_s0 + %s5401_s7]]   ;;  %s5405_s7 = smov 18  }
  0x15   :  { %s5513_s20 = sld [smem:[%s6267_s0 + %s5402_s15]]   ;;  %s5406_s15 = smov 19  }
  0x16   :  { %s5518_s27 = sld [smem:[%s6267_s0 + %s5403_s22]]   ;;  %s5407_s22 = smov 20  }
  0x17   :  { %s5523_s4 = sld [smem:[%s6267_s0 + %s5404_s28]]   ;;  %s5408_s28 = smov 21  }
  0x19   :  { %6296 = sst [smem:[#allocation10_spill]] %s5503_s6 }
  0x1a   :  { %6297 = sst [smem:[#allocation11_spill]] %s5508_s12 }
  0x1b   :  { %6298 = sst [smem:[#allocation12_spill]] %s5513_s20 }
  0x1c   :  { %6299 = sst [smem:[#allocation13_spill]] %s5518_s27 }
  0x1d   :  { %6300 = sst [smem:[#allocation14_spill]] %s5523_s4 }
  0x1e   :  { %s5528_s6 = sld [smem:[%s6267_s0 + %s5405_s7]]   ;;  %s5409_s7 = smov 22  }
  0x1f   :  { %s5533_s20 = sld [smem:[%s6267_s0 + %s5406_s15]]   ;;  %s5410_s15 = smov 23  }
  0x20   :  { %s5538_s27 = sld [smem:[%s6267_s0 + %s5407_s22]]   ;;  %s5411_s22 = smov 24  }
  0x21   :  { %s5543_s4 = sld [smem:[%s6267_s0 + %s5408_s28]]   ;;  %s5412_s28 = smov 25  }
  0x24   :  { %6301 = sst [smem:[#allocation15_spill]] %s5528_s6 }
  0x25   :  { %6302 = sst [smem:[#allocation16_spill]] %s5533_s20 }
  0x26   :  { %6303 = sst [smem:[#allocation17_spill]] %s5538_s27 }
  0x27   :  { %6304 = sst [smem:[#allocation18_spill]] %s5543_s4 }
  0x28   :  { %s5548_s6 = sld [smem:[%s6267_s0 + %s5409_s7]]   ;;  %s5413_s7 = smov 26  }
  0x29   :  { %s5553_s20 = sld [smem:[%s6267_s0 + %s5410_s15]]   ;;  %s5414_s15 = smov 27  }
  0x2a   :  { %s5558_s27 = sld [smem:[%s6267_s0 + %s5411_s22]]   ;;  %s5415_s22 = smov 28  }
  0x2b   :  { %s5563_s4 = sld [smem:[%s6267_s0 + %s5412_s28]]   ;;  %s5416_s28 = smov 29  }
  0x2e   :  { %6305 = sst [smem:[#allocation19_spill]] %s5548_s6 }
  0x2f   :  { %6306 = sst [smem:[#allocation20_spill]] %s5553_s20 }
  0x30   :  { %6307 = sst [smem:[#allocation21_spill]] %s5558_s27 }
  0x31   :  { %6308 = sst [smem:[#allocation22_spill]] %s5563_s4 }
  0x32   :  { %s5568_s6 = sld [smem:[%s6267_s0 + %s5413_s7]]   ;;  %s5417_s7 = smov 30  }
  0x33   :  { %s5573_s20 = sld [smem:[%s6267_s0 + %s5414_s15]]   ;;  %s5418_s15 = smov 31  }
  0x34   :  { %s5578_s27 = sld [smem:[%s6267_s0 + %s5415_s22]]   ;;  %s5419_s22 = smov 32  }
  0x35   :  { %s5583_s4 = sld [smem:[%s6267_s0 + %s5416_s28]]   ;;  %s5420_s28 = smov 33  }
  0x38   :  { %6309 = sst [smem:[#allocation23_spill]] %s5568_s6 }
  0x39   :  { %6310 = sst [smem:[#allocation24_spill]] %s5573_s20 }
  0x3a   :  { %6311 = sst [smem:[#allocation25_spill]] %s5578_s27 }
  0x3b   :  { %6312 = sst [smem:[#allocation26_spill]] %s5583_s4 }
  0x3c   :  { %s5588_s6 = sld [smem:[%s6267_s0 + %s5417_s7]]   ;;  %s5421_s7 = smov 34  }
  0x3d   :  { %s5593_s20 = sld [smem:[%s6267_s0 + %s5418_s15]]   ;;  %s5422_s15 = smov 35  }
  0x3e   :  { %s5598_s27 = sld [smem:[%s6267_s0 + %s5419_s22]]   ;;  %s5423_s22 = smov 36  }
  0x3f   :  { %s5603_s4 = sld [smem:[%s6267_s0 + %s5420_s28]]   ;;  %s5424_s28 = smov 37  }
  0x42   :  { %6313 = sst [smem:[#allocation27_spill]] %s5588_s6 }
  0x43   :  { %6314 = sst [smem:[#allocation28_spill]] %s5593_s20 }
  0x44   :  { %6315 = sst [smem:[#allocation29_spill]] %s5598_s27 }
  0x45   :  { %6316 = sst [smem:[#allocation30_spill]] %s5603_s4 }
  0x46   :  { %s5608_s6 = sld [smem:[%s6267_s0 + %s5421_s7]]   ;;  %s5425_s7 = smov 38  }
  0x47   :  { %s5613_s20 = sld [smem:[%s6267_s0 + %s5422_s15]]  }
  0x48   :  { %s5618_s27 = sld [smem:[%s6267_s0 + %s5423_s22]]  }
  0x49   :  { %s5623_s4 = sld [smem:[%s6267_s0 + %s5424_s28]]  }
  0x4c   :  { %6317 = sst [smem:[#allocation31_spill]] %s5608_s6 }
  0x4d   :  { %s5628_s6 = sld [smem:[%s6267_s0 + %s5425_s7]]  }
  0x4f   :  { %6318 = sst [smem:[#allocation32_spill]] %s5623_s4 }
  0x50   :  { %82 = vsyncpa [#allocation3], 0 }
  0x51   :  { %84 = vsyncpa [#allocation3 + $0x1], 0  ;;  %s5630_s15 = smov 0   ;;  %s5632_s16 = smov 0  }
  0x52   :  { %s5634_s18 = smov 0   ;;  %s5636_s22 = smov 0  }
  0x53 LB: > { %s6319_s12 = sld [smem:[#allocation11_spill]]  ;;  %s5651_s0 = sadd.s32 4294967295, %s5386_s22   ;;  %s5382_s18 = sphi %s5634_s18, %s6351_s18   ;;  %s5378_s16 = sphi %s5632_s16, %s6350_s16   ;;  %s5374_s15 = sphi %s5630_s15, %s6349_s15   ;;  %s5386_s22 = sphi %s5636_s22, %s6352_s22  }
  0x54   : > { %s6320_s9 = sld [smem:[#allocation6_spill]]  ;;  %s4125_s23 = sadd.s32 4294967294, %s5386_s22  }
  0x55   : > { %s6321_s8 = sld [smem:[#allocation9_spill]]  ;;  %s5655_s26 = sadd.s32 1, %s5386_s22  }
  0x56   : > { %s900_s28 = sadd.s32 1, %s5382_s18  ;;  %s897_s1 = ssub.s32 %s5386_s22, %s5655_s26 }
  0x57   : > { %p910_p0 = scmp.ne.s32.totalorder %s5382_s18, %s5378_s16  ;;  %p898_p1 = scmp.eq.s32.totalorder %s897_s1, 0 }
  0x58   : > { %p911_p2 = scmp.eq.s32.totalorder %s5651_s0, 1  ;;  %p916_p3 = scmp.ne.s32.totalorder %s5378_s16, %s5374_s15 }
  0x59   : > { %p917_p4 = scmp.eq.s32.totalorder %s4125_s23, 1  ;;  %p4128_p7 = scmp.ge.s32.totalorder %s5386_s22, 1 }
  0x5a   : > { %s5666_s2 = scalar_select %p898_p1, %s5382_s18, %s900_s28  }
  0x5b   : > { %p5668_p5 = por %p911_p2, %p910_p0  ;;  %p5672_p6 = por %p917_p4, %p916_p3 }
  0x5c   : > { %p1054_p8 = scmp.lt.s32.totalorder %s5386_s22, 3 }
  0x5e   : > { %p1055_p9 = pnand %p4128_p7, %p1054_p8 }
  0x5f   : > { %s6324_s5 = sld [smem:[#allocation5_spill]] (!%p1055_p9)  ;;  %p1147_p10 = scmp.lt.s32.totalorder (!%p1055_p9), %s5651_s0, 1 }
  0x60   : > { %1058 = sbr.rel (%p1055_p9) target bundleno = 4238 (0x108e), region = 172  ;;  %s6325_s13 = sld [smem:[#allocation7_spill]] (!%p1055_p9) }
  0x61   : > { %s6326_s3 = sld [smem:[#allocation8_spill]] (!%p1055_p9) }
  0x62   : > { %s6327_s1 = sld [smem:[#allocation10_spill]] (!%p1055_p9) }
  0x63   : > { %s6348_s4 = sld [smem:[#allocation32_spill]] (!%p1055_p9) }
  0x65   : > { %v5024_v0 = vld [vmem:[%s6320_s9 + $0x38] sm:$0xff]   ;;  %v5025_v1 = vld [vmem:[%s6320_s9 + $0x30] sm:$0xff]   ;;  %s1148_s11 = scalar_select %p1147_p10, %s5651_s0, 1  ;;  %v5026_v2 = vld [vmem:[%s6320_s9 + $0x28] sm:$0xff]   ;;  %v1389_v63 = vlaneseq  ;;  %vm1608_vm0 = vcmask 523264   ;;  %vm5427_vm1 = vmmov 0  }
  0x66   : > { %4624 = vmatprep.subr.bf16.mxu0 %v5024_v0  ;;  %v5027_v3 = vld [vmem:[%s6320_s9 + $0x20] sm:$0xff]   ;;  %v5028_v7 = vld [vmem:[%s6320_s9 + $0x18] sm:$0xff]   ;;  %v5029_v8 = vld [vmem:[%s6320_s9 + $0x10] sm:$0xff]   ;;  %vm3362_vm2 = vcmask 130048  }
  0x67   : > { %4625 = vmatpush3.bf16.msra.mxu0 %v5024_v0  ;;  %s4351_s23 = sshll.u32 %s1148_s11, 6  ;;  %v5030_v9 = vld [vmem:[%s6320_s9 + $0x8] sm:$0xff]   ;;  %v5031_v10 = vld [vmem:[%s6320_s9] sm:$0xff]   ;;  %v1390_v0 = vshrl.u32 %v1389_v63, 7  ;;  %s6328_s11 = sld [smem:[#allocation12_spill]] }
  0x68   : > { %4626 = vmatprep.subr.bf16.mxu0 %v5025_v1  ;;  %s1151_s28 = scalar_lea.vmem %s6324_s5, %s4351_s23  ;;  %v5034_v20 = vld [vmem:[%s5453_s17 + $0x4] ss:$20 sps:$4 sm:$0xff]   ;;  %v5037_v21 = vld [vmem:[%s5453_s17 + $0xc] ss:$20 sps:$4 sm:$0xff]   ;;  %s6329_s23 = sld [smem:[#allocation14_spill]] }
  0x69   : > { %v1153_v4 = vld [vmem:[%s1151_s28] sm:$0xff]  ;;  %v1154_v5 = vld [vmem:[%s1151_s28 + $0x8] sm:$0xff]  ;;  %v1155_v11 = vld [vmem:[%s1151_s28 + $0x10] sm:$0xff]  ;;  %1653 = vmatprep.mubr.bf16.mxu1 %v5034_v20  ;;  %s6338_s5 = sld [smem:[#allocation21_spill]] }
  0x6a   : > { %v1161_v6 = vpack.c.bf16 %v1154_v5, %v1153_v4  ;;  %v1156_v12 = vld [vmem:[%s1151_s28 + $0x18] sm:$0xff]  ;;  %v1157_v13 = vld [vmem:[%s1151_s28 + $0x20] sm:$0xff]  ;;  %v1158_v14 = vld [vmem:[%s1151_s28 + $0x28] sm:$0xff] }
  0x6b   : > { %4627 = vmatpush3.bf16.msra.mxu0 %v5025_v1  ;;  %v1162_v15 = vpack.c.bf16 %v1156_v12, %v1155_v11  ;;  %v1163_v16 = vpack.c.bf16 %v1158_v14, %v1157_v13  ;;  %v1159_v17 = vld [vmem:[%s1151_s28 + $0x30] sm:$0xff]  ;;  %v1160_v18 = vld [vmem:[%s1151_s28 + $0x38] sm:$0xff]  ;;  %v4131_v24 = vld [vmem:[%s6325_s13] ss:$0 sm:$0xff]  ;;  %s6330_s28 = sld [smem:[#allocation13_spill]] }
  0x6c   : > { %4628 = vmatprep.subr.bf16.mxu0 %v5026_v2  ;;  %4640 = vmatprep.mubr.bf16.mxu0 %v1161_v6  ;;  %v1164_v19 = vpack.c.bf16 %v1160_v18, %v1159_v17  ;;  %v4150_v1 = vld [vmem:[%s5458_s21 + $0x3] sm:$0x1]  ;;  %v4152_v5 = vld [vmem:[%s5458_s21 + $0x5] sm:$0x1] }
  0x6d   : > { %v1452_v13 = vpack.i.b16 %v4152_v5, %v4152_v5 }
  0x6f   : > { %4629 = vmatpush3.bf16.msra.mxu0 %v5026_v2  ;;  %v4154_v2 = vld [vmem:[%s5458_s21 + $0x7] sm:$0x1] }
  0x70   : > { %4630 = vmatprep.subr.bf16.mxu0 %v5027_v3 }
  0x73   : > { %4631 = vmatpush3.bf16.msra.mxu0 %v5027_v3  ;;  %v4148_v3 = vld [vmem:[%s5458_s21 + $0x1] sm:$0x1] }
  0x74   : > { %4632 = vmatprep.subr.bf16.mxu0 %v5028_v7  ;;  %v1400_v11 = vpack.i.b16 %v4148_v3, %v4148_v3 }
  0x77   : > { %4633 = vmatpush3.bf16.msra.mxu0 %v5028_v7  ;;  %v5714_v7 = vsub.s32 0, %v1390_v0 }
  0x78   : > { %4634 = vmatprep.subr.bf16.mxu0 %v5029_v8 }
  0x7b   : > { %4635 = vmatpush3.bf16.msra.mxu0 %v5029_v8  ;;  %v1426_v8 = vpack.i.b16 %v4150_v1, %v4150_v1 }
  0x7c   : > { %4636 = vmatprep.subr.bf16.mxu0 %v5030_v9 }
  0x7f   : > { %4637 = vmatpush3.bf16.msra.mxu0 %v5030_v9  ;;  %v1478_v9 = vpack.i.b16 %v4154_v2, %v4154_v2 }
  0x80   : > { %4638 = vmatprep.subr.bf16.mxu0 %v5031_v10 }
  0x81   : > { %v1483_v20 = vrot.slane %v1478_v9, %v5714_v7 }
  0x83   : > { %4639 = vmatpush3.bf16.msra.mxu0 %v5031_v10 }
  0x86   : > { %4641 = vmatmul.mubr.bf16.vlgmr.msra.gmra.mxu0 %v1162_v15 }
  0x87   : > { %4644 = vmatprep.mubr.bf16.mxu0 %v1163_v16 }
  0x8e   : > { %4645 = vmatmul.mubr.bf16.gmra.mxu0 %v1164_v19  ;;  %v1431_v19 = vrot.slane %v1426_v8, %v5714_v7 }
  0x8f   : > { %1718 = vmatprep.mubr.bf16.mxu0 %v5037_v21 }
 0x146   : > { %v4642_v22 = vpop.f32.mrf.mxu0 }
 0x147   : > { %v5694_v27 = vadd.f32 %v4642_v22, %v4131_v24 }
 0x148   : > { %v1270_v23 = vpop.f32.mrf.mxu0 }
 0x149   : > { %v4142_v33 = vmul.f32 -1.442695, %v5694_v27  ;;  %v5702_v34 = vadd.f32 %v4131_v24, %v1270_v23 }
 0x14a   : > { %v4643_v25 = vpop.f32.mrf.mxu0 }
 0x14b   : > { %v5692_v26 = vadd.f32 %v4643_v25, %v4131_v24  ;;  %v4140_v42 = vmul.f32 -1.442695, %v5702_v34 }
 0x14c   : > { %v1273_v28 = vpop.f32.mrf.mxu0 }
 0x14d   : > { %v4143_v29 = vmul.f32 -1.442695, %v5692_v26  ;;  %v5697_v30 = vadd.f32 %v4131_v24, %v1273_v28 }
 0x14e   : > { %v4646_v31 = vpop.f32.mrf.mxu0 }
 0x14f   : > { %v5699_v32 = vadd.f32 %v4646_v31, %v4131_v24  ;;  %5174 = vpow2.f32 %v4143_v29  ;;  %v4141_v38 = vmul.f32 -1.442695, %v5697_v30  ;;  %v1457_v29 = vrot.slane %v1452_v13, %v5714_v7 }
 0x150   : > { %v1286_v35 = vpop.f32.mrf.mxu0 }
 0x151   : > { %v4146_v36 = vmul.f32 -1.442695, %v5699_v32  ;;  %v5705_v37 = vadd.f32 %v4131_v24, %v1286_v35 }
 0x152   : > { %v4647_v39 = vpop.f32.mrf.mxu0 }
 0x153   : > { %5176 = vpow2.f32 %v4146_v36  ;;  %v4144_v40 = vmul.f32 -1.442695, %v5705_v37  ;;  %v1298_v41 = vadd.f32 %v4647_v39, %v4131_v24 }
 0x154   : > { %5178 = vpow2.f32 %v4142_v33  ;;  %v1289_v43 = vpop.f32.mrf.mxu0 }
 0x155   : > { %5180 = vpow2.f32 %v4144_v40  ;;  %v4147_v44 = vmul.f32 -1.442695, %v1298_v41  ;;  %v1290_v45 = vadd.f32 %v4131_v24, %v1289_v43  ;;  %v1405_v24 = vrot.slane %v1400_v11, %v5714_v7  ;;  %v4149_v43 = vld [vmem:[%s5458_s21 + $0x2] sm:$0x1] }
 0x156   : > { %5182 = vpow2.f32 %v4141_v38 }
 0x157   : > { %5184 = vpow2.f32 %v4147_v44  ;;  %v4145_v46 = vmul.f32 -1.442695, %v1290_v45 }
 0x158   : > { %5186 = vpow2.f32 %v4140_v42 }
 0x159   : > { %5188 = vpow2.f32 %v4145_v46 }
 0x15c   : > { %v5175_v47 = vpop.eup %5174 }
 0x15d   : > { %v1328_v49 = vadd.f32 1.0, %v5175_v47 }
 0x15f   : > { %5190 = vrcp.f32 %v1328_v49  ;;  %v4151_v49 = vld [vmem:[%s5458_s21 + $0x4] sm:$0x1] }
 0x160   : > { %v5177_v48 = vpop.eup %5176 }
 0x161   : > { %v5179_v50 = vpop.eup %5178  ;;  %v1331_v51 = vadd.f32 1.0, %v5177_v48  ;;  %v1385_v48 = vld [vmem:[%s5458_s21] sm:$0x1] }
 0x162   : > { %v5181_v52 = vpop.eup %5180  ;;  %v1327_v56 = vadd.f32 1.0, %v5179_v50 }
 0x163   : > { %v5183_v53 = vpop.eup %5182  ;;  %v1329_v54 = vadd.f32 1.0, %v5181_v52  ;;  %5192 = vrcp.f32 %v1331_v51 }
 0x164   : > { %v5185_v55 = vpop.eup %5184  ;;  %v1326_v60 = vadd.f32 1.0, %v5183_v53 }
 0x165   : > { %v5187_v57 = vpop.eup %5186  ;;  %v1332_v58 = vadd.f32 1.0, %v5185_v55  ;;  %5194 = vrcp.f32 %v1329_v54  ;;  %v1387_v54 = vpack.i.b16 %v1385_v48, %v1385_v48  ;;  %v1439_v55 = vpack.i.b16 %v4151_v49, %v4151_v49  ;;  %v5063_v48 = vld [vmem:[%s5468_s29 + $0x20] sm:$0xff]   ;;  %v5064_v49 = vld [vmem:[%s5468_s29 + $0x18] sm:$0xff]  }
 0x166   : > { %v5189_v59 = vpop.eup %5188  ;;  %v1325_v62 = vadd.f32 1.0, %v5187_v57 }
 0x167   : > { %5196 = vrcp.f32 %v1332_v58  ;;  %v1330_v61 = vadd.f32 1.0, %v5189_v59  ;;  %v1444_v63 = vrot.slane %v1439_v55, %v5714_v7 }
 0x168   : > { %5198 = vrcp.f32 %v1327_v56 }
 0x169   : > { %5200 = vrcp.f32 %v1330_v61 }
 0x16a   : > { %5202 = vrcp.f32 %v1326_v60 }
 0x16b   : > { %5204 = vrcp.f32 %v1325_v62  ;;  %v1392_v62 = vrot.slane %v1387_v54, %v5714_v7 }
 0x16c   : > { %v5191_v4 = vpop.eup %5190 }
 0x16d   : > { %v1352_v18 = vmul.f32 %v5191_v4, %v5692_v26 }
 0x170   : > { %v5193_v6 = vpop.eup %5192 }
 0x171   : > { %v1355_v15 = vmul.f32 %v5193_v6, %v5699_v32  ;;  %v4155_v6 = vld [vmem:[%s5458_s21 + $0x8] sm:$0x1] }
 0x172   : > { %v5195_v10 = vpop.eup %5194 }
 0x173   : > { %v1353_v21 = vmul.f32 %v5195_v10, %v5705_v37  ;;  %v1491_v10 = vpack.i.b16 %v4155_v6, %v4155_v6 }
 0x174   : > { %v5197_v12 = vpop.eup %5196 }
 0x175   : > { %v5199_v14 = vpop.eup %5198  ;;  %v1356_v16 = vmul.f32 %v5197_v12, %v1298_v41 }
 0x176   : > { %v5201_v17 = vpop.eup %5200  ;;  %v1351_v28 = vmul.f32 %v5199_v14, %v5694_v27 }
 0x177   : > { %v5721_v22 = vpack.c.bf16 %v1356_v16, %v1355_v15  ;;  %v1354_v23 = vmul.f32 %v5201_v17, %v1290_v45  ;;  %v5203_v25 = vpop.eup %5202  ;;  %v1496_v15 = vrot.slane %v1491_v10, %v5714_v7 }
 0x178   : > { %v5205_v35 = vpop.eup %5204  ;;  %v5731_v36 = vpack.c.bf16 %v1352_v18, %v1351_v28  ;;  %v1350_v38 = vmul.f32 %v5203_v25, %v5697_v30  ;;  %v4153_v30 = vld [vmem:[%s5458_s21 + $0x6] sm:$0x1]  ;;  %v5040_v28 = vld [vmem:[%s5453_s17 + $0x28] ss:$20 sps:$4 sm:$0xff]  }
 0x179   : > { %v5726_v31 = vpack.c.bf16 %v1354_v23, %v1353_v21  ;;  %v1435_v26 = vmul.bf16 %v1431_v19, %v5721_v22  ;;  %v1487_v32 = vmul.bf16 %v1483_v20, %v5721_v22  ;;  %v1409_v33 = vmul.bf16 %v1405_v24, %v5721_v22  ;;  %v5038_v21 = vld [vmem:[%s5453_s17 + $0x2c] ss:$20 sps:$4 sm:$0xff]   ;;  %v5041_v23 = vld [vmem:[%s5453_s17 + $0x34] ss:$20 sps:$4 sm:$0xff]  }
 0x17a   : > { %v1461_v37 = vmul.bf16 %v1457_v29, %v5721_v22  ;;  %v1349_v40 = vmul.f32 %v5205_v35, %v5702_v34  ;;  %v1433_v45 = vmul.bf16 %v1431_v19, %v5731_v36  ;;  %v1485_v46 = vmul.bf16 %v1483_v20, %v5731_v36  ;;  %v5046_v35 = vld [vmem:[%s5453_s17 + $0x50] ss:$20 sps:$4 sm:$0xff]  }
 0x17b   : > { %4364 = vmatprep.subr.bf16.mxu1 %v1435_v26  ;;  %4404 = vmatprep.subr.bf16.mxu0 %v1487_v32  ;;  %v1434_v27 = vmul.bf16 %v1431_v19, %v5726_v31  ;;  %v1486_v39 = vmul.bf16 %v1483_v20, %v5726_v31  ;;  %v1408_v41 = vmul.bf16 %v1405_v24, %v5726_v31  ;;  %v5044_v26 = vld [vmem:[%s5453_s17 + $0x54] ss:$20 sps:$4 sm:$0xff]   ;;  %v5047_v32 = vld [vmem:[%s5453_s17 + $0x5c] ss:$20 sps:$4 sm:$0xff]  }
 0x17c   : > { %4365 = vmatpush3.bf16.msra.mxu1 %v1409_v33  ;;  %4405 = vmatpush3.bf16.msra.mxu0 %v1461_v37  ;;  %v1460_v42 = vmul.bf16 %v1457_v29, %v5726_v31  ;;  %v5742_v44 = vpack.c.bf16 %v1350_v38, %v1349_v40  ;;  %v1413_v34 = vpack.i.b16 %v4149_v43, %v4149_v43  ;;  %v5049_v37 = vld [vmem:[%s5453_s17 + $0x58] ss:$20 sps:$4 sm:$0xff]   ;;  %v5050_v38 = vld [vmem:[%s5453_s17 + $0x7c] ss:$20 sps:$4 sm:$0xff]   ;;  %v5055_v40 = vld [vmem:[%s5453_s17 + $0x80] ss:$20 sps:$4 sm:$0xff]  }
 0x17d   : > { %4366 = vmatprep.subr.bf16.mxu1 %v1434_v27  ;;  %4406 = vmatprep.subr.bf16.mxu0 %v1486_v39  ;;  %v1465_v47 = vpack.i.b16 %v4153_v30, %v4153_v30  ;;  %v1407_v50 = vmul.bf16 %v1405_v24, %v5731_v36  ;;  %v1459_v51 = vmul.bf16 %v1457_v29, %v5731_v36  ;;  %v5053_v27 = vld [vmem:[%s5453_s17 + $0x84] ss:$20 sps:$4 sm:$0xff]   ;;  %v5058_v43 = vld [vmem:[%s5453_s17 + $0x60] ss:$20 sps:$4 sm:$0xff]   ;;  %v5059_v30 = vld [vmem:[%s5453_s17 + $0x88] ss:$20 sps:$4 sm:$0xff]  }
 0x17e   : > { %v1432_v52 = vmul.bf16 %v1431_v19, %v5742_v44  ;;  %v1484_v53 = vmul.bf16 %v1483_v20, %v5742_v44  ;;  %v1418_v56 = vrot.slane %v1413_v34, %v5714_v7  ;;  %v1406_v58 = vmul.bf16 %v1405_v24, %v5742_v44  ;;  %v5032_v19 = vld [vmem:[%s5453_s17] ss:$20 sps:$4 sm:$0xff]   ;;  %v5035_v20 = vld [vmem:[%s5453_s17 + $0x8] ss:$20 sps:$4 sm:$0xff]   ;;  %v5052_v39 = vld [vmem:[%s5453_s17 + $0x78] ss:$20 sps:$4 sm:$0xff]  }
 0x17f   : > { %v1470_v57 = vrot.slane %v1465_v47, %v5714_v7  ;;  %v1458_v59 = vmul.bf16 %v1457_v29, %v5742_v44  ;;  %v1396_v0 = vmul.bf16 %v1392_v62, %v5721_v22  ;;  %v1448_v1 = vmul.bf16 %v1444_v63, %v5721_v22  ;;  %v5043_v29 = vld [vmem:[%s5453_s17 + $0x30] ss:$20 sps:$4 sm:$0xff]   ;;  %v5062_v47 = vld [vmem:[%s5468_s29 + $0x28] sm:$0xff]  }
 0x180   : > { %4367 = vmatpush3.bf16.msra.mxu1 %v1408_v41  ;;  %4407 = vmatpush3.bf16.msra.mxu0 %v1460_v42  ;;  %v1422_v60 = vmul.bf16 %v1418_v56, %v5721_v22  ;;  %v1421_v2 = vmul.bf16 %v1418_v56, %v5726_v31  ;;  %v1395_v4 = vmul.bf16 %v1392_v62, %v5726_v31  ;;  %v5056_v41 = vld [vmem:[%s5453_s17 + $0x10] ss:$20 sps:$4 sm:$0xff]   ;;  %v5057_v42 = vld [vmem:[%s5453_s17 + $0x38] ss:$20 sps:$4 sm:$0xff]  }
 0x181   : > { %4368 = vmatprep.subr.bf16.mxu1 %v1433_v45  ;;  %4408 = vmatprep.subr.bf16.mxu0 %v1485_v46  ;;  %v1474_v61 = vmul.bf16 %v1470_v57, %v5721_v22  ;;  %v1473_v3 = vmul.bf16 %v1470_v57, %v5726_v31  ;;  %v1447_v5 = vmul.bf16 %v1444_v63, %v5726_v31  ;;  %v5060_v45 = vld [vmem:[%s5468_s29 + $0x38] sm:$0xff]   ;;  %v5426_v46 = vmov 0.0   ;;  %v5061_v34 = vld [vmem:[%s5468_s29 + $0x30] sm:$0xff]  }
 0x182   : > { %v1420_v8 = vmul.bf16 %v1418_v56, %v5731_v36  ;;  %v1472_v9 = vmul.bf16 %v1470_v57, %v5731_v36  ;;  %v1394_v11 = vmul.bf16 %v1392_v62, %v5731_v36  ;;  %v1446_v12 = vmul.bf16 %v1444_v63, %v5731_v36 }
 0x183   : > { %v1419_v13 = vmul.bf16 %v1418_v56, %v5742_v44  ;;  %v1471_v14 = vmul.bf16 %v1470_v57, %v5742_v44  ;;  %v1393_v16 = vmul.bf16 %v1392_v62, %v5742_v44  ;;  %v1445_v17 = vmul.bf16 %v1444_v63, %v5742_v44 }
 0x184   : > { %4369 = vmatpush3.bf16.msra.mxu1 %v1407_v50  ;;  %4409 = vmatpush3.bf16.msra.mxu0 %v1459_v51  ;;  %v1500_v18 = vmul.bf16 %v1496_v15, %v5721_v22  ;;  %v1499_v24 = vmul.bf16 %v1496_v15, %v5726_v31  ;;  %v1498_v25 = vmul.bf16 %v1496_v15, %v5731_v36  ;;  %v5065_v50 = vld [vmem:[%s5468_s29 + $0x10] sm:$0xff]   ;;  %v5066_v51 = vld [vmem:[%s5468_s29 + $0x8] sm:$0xff]  }
 0x185   : > { %4370 = vmatprep.subr.bf16.mxu1 %v1432_v52  ;;  %4410 = vmatprep.subr.bf16.mxu0 %v1484_v53  ;;  %v1497_v33 = vmul.bf16 %v1496_v15, %v5742_v44  ;;  %v5067_v52 = vld [vmem:[%s5468_s29] sm:$0xff]  }
 0x188   : > { %4371 = vmatpush3.bf16.msra.mxu1 %v1406_v58  ;;  %4411 = vmatpush3.bf16.msra.mxu0 %v1458_v59 }
 0x189   : > { %4372 = vmatprep.subr.bf16.mxu1 %v1422_v60  ;;  %4412 = vmatprep.subr.bf16.mxu0 %v1474_v61 }
 0x18c   : > { %4373 = vmatpush3.bf16.msra.mxu1 %v1396_v0  ;;  %4413 = vmatpush3.bf16.msra.mxu0 %v1448_v1 }
 0x18d   : > { %4374 = vmatprep.subr.bf16.mxu1 %v1421_v2  ;;  %4414 = vmatprep.subr.bf16.mxu0 %v1473_v3 }
 0x190   : > { %4375 = vmatpush3.bf16.msra.mxu1 %v1395_v4  ;;  %4415 = vmatpush3.bf16.msra.mxu0 %v1447_v5 }
 0x191   : > { %4376 = vmatprep.subr.bf16.mxu1 %v1420_v8  ;;  %4416 = vmatprep.subr.bf16.mxu0 %v1472_v9 }
 0x194   : > { %4377 = vmatpush3.bf16.msra.mxu1 %v1394_v11  ;;  %4417 = vmatpush3.bf16.msra.mxu0 %v1446_v12 }
 0x195   : > { %4378 = vmatprep.subr.bf16.mxu1 %v1419_v13  ;;  %4418 = vmatprep.subr.bf16.mxu0 %v1471_v14 }
 0x198   : > { %4379 = vmatpush3.bf16.msra.mxu1 %v1393_v16  ;;  %4419 = vmatpush3.bf16.msra.mxu0 %v1445_v17 }
 0x199   : > { %4648 = vmatprep.subr.bf16.mxu1 %v1500_v18  ;;  %4664 = vmatprep.subr.bf16.mxu0 %v5426_v46 }
 0x19b   : > { %1654 = vmatmul.mubr.bf16.vlgmr.msra.gmra.mxu1 %v5032_v19  ;;  %1719 = vmatmul.mubr.bf16.vlgmr.msra.gmra.mxu0 %v5035_v20 }
 0x19c   : > { %4649 = vmatpush3.bf16.msra.mxu1 %v1500_v18  ;;  %1661 = vmatprep.mubr.bf16.mxu1 %v5038_v21  ;;  %v4156_v18 = vld [vmem:[%s5463_s25] ss:$0 sm:$0xff] }
 0x19d   : > { %4650 = vmatprep.subr.bf16.mxu1 %v1499_v24  ;;  %1726 = vmatprep.mubr.bf16.mxu0 %v5041_v23 }
 0x19e   : > { %4665 = vmatpush3.bf16.msra.mxu0 %v5060_v45 }
 0x19f   : > { %4666 = vmatprep.subr.bf16.mxu0 %v5426_v46 }
 0x1a0   : > { %4651 = vmatpush3.bf16.msra.mxu1 %v1499_v24 }
 0x1a1   : > { %4652 = vmatprep.subr.bf16.mxu1 %v1498_v25 }
 0x1a2   : > { %4667 = vmatpush3.bf16.msra.mxu0 %v5061_v34 }
 0x1a3   : > { %1662 = vmatmul.mubr.bf16.gmra.mxu1 %v5040_v28  ;;  %1727 = vmatmul.mubr.bf16.gmra.mxu0 %v5043_v29 }
 0x1a4   : > { %4653 = vmatpush3.bf16.msra.mxu1 %v1498_v25  ;;  %1669 = vmatprep.mubr.bf16.mxu1 %v5044_v26 }
 0x1a5   : > { %4654 = vmatprep.subr.bf16.mxu1 %v1497_v33  ;;  %1734 = vmatprep.mubr.bf16.mxu0 %v5047_v32 }
 0x1a6   : > { %4668 = vmatprep.subr.bf16.mxu0 %v5426_v46 }
 0x1a7   : > { %4669 = vmatpush3.bf16.msra.mxu0 %v5062_v47 }
 0x1a8   : > { %4655 = vmatpush3.bf16.msra.mxu1 %v1497_v33  ;;  %4670 = vmatprep.subr.bf16.mxu0 %v5426_v46 }
 0x1a9   : > { %4684 = vmatprep.subr.bf16.mxu1 %v5426_v46 }
 0x1ab   : > { %1670 = vmatmul.mubr.bf16.gmra.mxu1 %v5046_v35  ;;  %1735 = vmatmul.mubr.bf16.gmra.mxu0 %v5049_v37 }
 0x1ac   : > { %1677 = vmatprep.mubr.bf16.mxu1 %v5050_v38  ;;  %1742 = vmatprep.mubr.bf16.mxu0 %v5053_v27 }
 0x1ad   : > { %4671 = vmatpush3.bf16.msra.mxu0 %v5063_v48 }
 0x1ae   : > { %4672 = vmatprep.subr.bf16.mxu0 %v5426_v46 }
 0x1b1   : > { %4673 = vmatpush3.bf16.msra.mxu0 %v5064_v49 }
 0x1b2   : > { %4674 = vmatprep.subr.bf16.mxu0 %v5426_v46 }
 0x1b3   : > { %1678 = vmatmul.mubr.bf16.gmra.mxu1 %v5052_v39  ;;  %1743 = vmatmul.mubr.bf16.gmra.mxu0 %v5055_v40 }
 0x1b4   : > { %4656 = vmatprep.mubr.msk.bf16.mxu1 %vm1608_vm0, %v5056_v41  ;;  %4680 = vmatprep.mubr.msk.bf16.mxu0 %vm5427_vm1, %v5426_v46 }
 0x1b5   : > { %4675 = vmatpush3.bf16.msra.mxu0 %v5065_v50 }
 0x1b6   : > { %4676 = vmatprep.subr.bf16.mxu0 %v5426_v46 }
 0x1b9   : > { %4677 = vmatpush3.bf16.msra.mxu0 %v5066_v51 }
 0x1ba   : > { %4678 = vmatprep.subr.bf16.mxu0 %v5426_v46 }
 0x1bb   : > { %4657 = vmatmul.mubr.msk.bf16.vlgmr.msra.gmra.mxu1 %vm1608_vm0, %v5057_v42 }
 0x1bc   : > { %4660 = vmatprep.mubr.msk.bf16.mxu1 %vm1608_vm0, %v5058_v43 }
 0x1bd   : > { %4679 = vmatpush3.bf16.msra.mxu0 %v5067_v52 }
 0x1c3   : > { %4661 = vmatmul.mubr.msk.bf16.gmra.mxu1 %vm1608_vm0, %v5059_v30 }
 0x1c4   : > { %4700 = vmatprep.mubr.msk.bf16.mxu1 %vm5427_vm1, %v5426_v46 }
 0x25b   : > { %v4380_v53 = vpop.f32.mrf.mxu1  ;;  %v4420_v54 = vpop.f32.mrf.mxu0 }
 0x25d   : > { %v4381_v55 = vpop.f32.mrf.mxu1  ;;  %v4421_v56 = vpop.f32.mrf.mxu0 }
 0x25e   : > { %v4382_v17 = vadd.f32 %v4381_v55, %v4380_v53  ;;  %v4422_v29 = vadd.f32 %v4421_v56, %v4420_v54 }
 0x25f   : > { %v4383_v57 = vpop.f32.mrf.mxu1  ;;  %v4423_v58 = vpop.f32.mrf.mxu0 }
 0x260   : > { %v1656_v28 = vadd.f32 %v4382_v17, %v4156_v18 }
 0x261   : > { %v4384_v59 = vpop.f32.mrf.mxu1  ;;  %v4424_v60 = vpop.f32.mrf.mxu0 }
 0x262   : > { %v4385_v26 = vadd.f32 %v4384_v59, %v4383_v57  ;;  %v4425_v42 = vadd.f32 %v4424_v60, %v4423_v58  ;;  %v1721_v30 = vadd.f32 %v4422_v29, %v1656_v28 }
 0x263   : > { %v4386_v61 = vpop.f32.mrf.mxu1  ;;  %v4426_v62 = vpop.f32.mrf.mxu0 }
 0x264   : > { %v1659_v41 = vadd.f32 %v4385_v26, %v4156_v18 }
 0x265   : > { %v4387_v63 = vpop.f32.mrf.mxu1  ;;  %v4427_v0 = vpop.f32.mrf.mxu0 }
 0x266   : > { %v4388_v14 = vadd.f32 %v4387_v63, %v4386_v61  ;;  %v4428_v21 = vadd.f32 %v4427_v0, %v4426_v62  ;;  %v1724_v59 = vadd.f32 %v4425_v42, %v1659_v41 }
 0x267   : > { %v4389_v1 = vpop.f32.mrf.mxu1  ;;  %v4429_v2 = vpop.f32.mrf.mxu0 }
 0x268   : > { %v1664_v20 = vadd.f32 %v4388_v14, %v4156_v18 }
 0x269   : > { %v4390_v3 = vpop.f32.mrf.mxu1  ;;  %v4430_v4 = vpop.f32.mrf.mxu0 }
 0x26a   : > { %v4391_v23 = vadd.f32 %v4390_v3, %v4389_v1  ;;  %v4431_v37 = vadd.f32 %v4430_v4, %v4429_v2  ;;  %v1729_v27 = vadd.f32 %v4428_v21, %v1664_v20 }
 0x26b   : > { %v4392_v5 = vpop.f32.mrf.mxu1  ;;  %v4432_v6 = vpop.f32.mrf.mxu0 }
 0x26c   : > { %v1667_v35 = vadd.f32 %v4391_v23, %v4156_v18 }
 0x26d   : > { %v4393_v8 = vpop.f32.mrf.mxu1  ;;  %v4433_v9 = vpop.f32.mrf.mxu0 }
 0x26e   : > { %v4394_v39 = vadd.f32 %v4393_v8, %v4392_v5  ;;  %v1732_v52 = vadd.f32 %v4431_v37, %v1667_v35  ;;  %v4434_v54 = vadd.f32 %v4433_v9, %v4432_v6 }
 0x26f   : > { %v4395_v10 = vpop.f32.mrf.mxu1  ;;  %v4435_v11 = vpop.f32.mrf.mxu0 }
 0x270   : > { %v1672_v53 = vadd.f32 %v4394_v39, %v4156_v18 }
 0x271   : > { %v4396_v12 = vpop.f32.mrf.mxu1  ;;  %v4436_v13 = vpop.f32.mrf.mxu0 }
 0x272   : > { %v4397_v56 = vadd.f32 %v4396_v12, %v4395_v10  ;;  %v4437_v2 = vadd.f32 %v4436_v13, %v4435_v11  ;;  %v1737_v4 = vadd.f32 %v4434_v54, %v1672_v53 }
 0x273   : > { %v4398_v15 = vpop.f32.mrf.mxu1  ;;  %v4438_v16 = vpop.f32.mrf.mxu0 }
 0x274   : > { %v1675_v5 = vadd.f32 %v4397_v56, %v4156_v18 }
 0x275   : > { %v4399_v19 = vpop.f32.mrf.mxu1  ;;  %v4439_v24 = vpop.f32.mrf.mxu0 }
 0x276   : > { %v4400_v32 = vadd.f32 %v4399_v19, %v4398_v15  ;;  %v4440_v34 = vadd.f32 %v4439_v24, %v4438_v16  ;;  %v1740_v19 = vadd.f32 %v4437_v2, %v1675_v5 }
 0x277   : > { %v4401_v25 = vpop.f32.mrf.mxu1  ;;  %v4441_v38 = vpop.f32.mrf.mxu0 }
 0x278   : > { %v1680_v45 = vadd.f32 %v4400_v32, %v4156_v18 }
 0x279   : > { %v4402_v33 = vpop.f32.mrf.mxu1  ;;  %v4442_v49 = vpop.f32.mrf.mxu0 }
 0x27a   : > { %v4403_v48 = vadd.f32 %v4402_v33, %v4401_v25  ;;  %v4443_v60 = vadd.f32 %v4442_v49, %v4441_v38  ;;  %v1745_v62 = vadd.f32 %v4440_v34, %v1680_v45 }
 0x27b   : > { %v4658_v40 = vpop.f32.mrf.mxu1 }
 0x27c   : > { %v5824_v43 = vadd.f32 %v4658_v40, %v1729_v27  ;;  %v1683_v63 = vadd.f32 %v4403_v48, %v4156_v18 }
 0x27d   : > { %v1785_v47 = vpop.f32.mrf.mxu1 }
 0x27e   : > { %v4183_v50 = vmul.f32 -1.442695, %v5824_v43  ;;  %v5827_v51 = vadd.f32 %v1785_v47, %v1721_v30  ;;  %v1748_v14 = vadd.f32 %v4443_v60, %v1683_v63 }
 0x27f   : > { %v4659_v55 = vpop.f32.mrf.mxu1 }
 0x280   : > { %v4181_v57 = vmul.f32 -1.442695, %v5827_v51  ;;  %v5830_v58 = vadd.f32 %v4659_v55, %v1732_v52  ;;  %5206 = vpow2.f32 %v4183_v50 }
 0x281   : > { %v1788_v61 = vpop.f32.mrf.mxu1 }
 0x282   : > { %5208 = vpow2.f32 %v4181_v57  ;;  %v4184_v0 = vmul.f32 -1.442695, %v5830_v58  ;;  %v1789_v1 = vadd.f32 %v1788_v61, %v1724_v59 }
 0x283   : > { %v4662_v3 = vpop.f32.mrf.mxu1 }
 0x284   : > { %5210 = vpow2.f32 %v4184_v0  ;;  %v4182_v6 = vmul.f32 -1.442695, %v1789_v1  ;;  %v1810_v8 = vadd.f32 %v4662_v3, %v1745_v62 }
 0x285   : > { %v1801_v9 = vpop.f32.mrf.mxu1 }
 0x286   : > { %5212 = vpow2.f32 %v4182_v6  ;;  %v4187_v10 = vmul.f32 -1.442695, %v1810_v8  ;;  %v1802_v12 = vadd.f32 %v1801_v9, %v1737_v4 }
 0x287   : > { %v4663_v15 = vpop.f32.mrf.mxu1 }
 0x288   : > { %v4185_v16 = vmul.f32 -1.442695, %v1802_v12  ;;  %v1813_v17 = vadd.f32 %v4663_v15, %v1748_v14  ;;  %5214 = vpow2.f32 %v4187_v10  ;;  %v5068_v10 = vld [vmem:[%s6321_s8 + $0x38] sm:$0xff]   ;;  %v5070_v14 = vld [vmem:[%s6321_s8 + $0x28] sm:$0xff]   ;;  %v5071_v15 = vld [vmem:[%s6321_s8 + $0x20] sm:$0xff]  }
 0x289   : > { %v1804_v20 = vpop.f32.mrf.mxu1  ;;  %4685 = vmatpush3.bf16.msra.mxu1 %v5068_v10 }
 0x28a   : > { %5216 = vpow2.f32 %v4185_v16  ;;  %v4188_v21 = vmul.f32 -1.442695, %v1813_v17  ;;  %v1805_v11 = vadd.f32 %v1804_v20, %v1740_v19  ;;  %4686 = vmatprep.subr.bf16.mxu1 %v5426_v46  ;;  %v5072_v16 = vld [vmem:[%s6321_s8 + $0x18] sm:$0xff]   ;;  %v5074_v19 = vld [vmem:[%s6321_s8 + $0x8] sm:$0xff]   ;;  %v5075_v20 = vld [vmem:[%s6321_s8] sm:$0xff]  }
 0x28c   : > { %5218 = vpow2.f32 %v4188_v21  ;;  %v4186_v13 = vmul.f32 -1.442695, %v1805_v11  ;;  %v1904_v21 = vld [vmem:[%s6326_s3] sm:$0x1]  ;;  %s6333_s3 = sld [smem:[#allocation18_spill]] }
 0x28d   : > { %v5207_v18 = vpop.eup %5206 }
 0x28e   : > { %5220 = vpow2.f32 %v4186_v13  ;;  %v1842_v28 = vadd.f32 1.0, %v5207_v18 }
 0x28f   : > { %v5209_v23 = vpop.eup %5208 }
 0x290   : > { %v1840_v24 = vadd.f32 1.0, %v5209_v23 }
 0x291   : > { %v5211_v25 = vpop.eup %5210 }
 0x292   : > { %5222 = vrcp.f32 %v1840_v24  ;;  %v1843_v26 = vadd.f32 1.0, %v5211_v25 }
 0x293   : > { %v5213_v29 = vpop.eup %5212  ;;  %5224 = vrcp.f32 %v1842_v28 }
 0x294   : > { %v1841_v32 = vadd.f32 1.0, %v5213_v29 }
 0x295   : > { %v5215_v33 = vpop.eup %5214 }
 0x296   : > { %5226 = vrcp.f32 %v1841_v32  ;;  %v1846_v27 = vadd.f32 1.0, %v5215_v33 }
 0x297   : > { %v5217_v35 = vpop.eup %5216  ;;  %5228 = vrcp.f32 %v1843_v26 }
 0x298   : > { %v1844_v37 = vadd.f32 1.0, %v5217_v35  ;;  %v5076_v35 = vld [vmem:[%s5488_s19 + $0x38] sm:$0xff]  }
 0x299   : > { %v5219_v38 = vpop.eup %5218  ;;  %4704 = vmatprep.subr.bf16.mxu0 %v5076_v35 }
 0x29a   : > { %5230 = vrcp.f32 %v1844_v37  ;;  %v1847_v40 = vadd.f32 1.0, %v5219_v38  ;;  %v5077_v37 = vld [vmem:[%s5488_s19 + $0x30] sm:$0xff]   ;;  %v5078_v38 = vld [vmem:[%s5488_s19 + $0x28] sm:$0xff]  }
 0x29b   : > { %v5221_v39 = vpop.eup %5220  ;;  %5232 = vrcp.f32 %v1846_v27  ;;  %v5079_v27 = vld [vmem:[%s5488_s19 + $0x20] sm:$0xff]  }
 0x29c   : > { %v1845_v41 = vadd.f32 1.0, %v5221_v39  ;;  %v5080_v39 = vld [vmem:[%s5488_s19 + $0x18] sm:$0xff]  }
 0x29e   : > { %5234 = vrcp.f32 %v1845_v41  ;;  %v5082_v41 = vld [vmem:[%s5488_s19 + $0x8] sm:$0xff]  }
 0x29f   : > { %5236 = vrcp.f32 %v1847_v40  ;;  %v5223_v42 = vpop.eup %5222  ;;  %v5081_v40 = vld [vmem:[%s5488_s19 + $0x10] sm:$0xff]  }
 0x2a0   : > { %v5225_v30 = vpop.eup %5224  ;;  %v5834_v34 = vmul.f32 %v5223_v42, %v5827_v51  ;;  %v5083_v42 = vld [vmem:[%s5488_s19] sm:$0xff]  }
 0x2a1   : > { %v5839_v49 = vmul.f32 %v5225_v30, %v5824_v43  ;;  %v5084_v30 = vld [vmem:[%s5498_s30 + $0x38] sm:$0xff]  }
 0x2a3   : > { %v5227_v45 = vpop.eup %5226 }
 0x2a4   : > { %v5836_v47 = vmul.f32 %v5227_v45, %v1789_v1  ;;  %v5229_v48 = vpop.eup %5228  ;;  %v5085_v45 = vld [vmem:[%s5498_s30 + $0x30] sm:$0xff]  }
 0x2a5   : > { %v5844_v53 = vmul.f32 %v5229_v48, %v5830_v58  ;;  %v5086_v48 = vld [vmem:[%s5498_s30 + $0x28] sm:$0xff]  }
 0x2a6   : > { %v1872_v50 = vadd.f32 %v5836_v47, %v5834_v34 }
 0x2a7   : > { %v5231_v52 = vpop.eup %5230 }
 0x2a8   : > { %v1873_v54 = vadd.f32 %v1872_v50, %v5839_v49  ;;  %v5233_v55 = vpop.eup %5232  ;;  %v5847_v56 = vmul.f32 %v5231_v52, %v1802_v12  ;;  %v5069_v12 = vld [vmem:[%s6321_s8 + $0x30] sm:$0xff]   ;;  %v5087_v50 = vld [vmem:[%s5498_s30 + $0x20] sm:$0xff]   ;;  %v5088_v52 = vld [vmem:[%s5498_s30 + $0x18] sm:$0xff]  }
 0x2a9   : > { %v5853_v61 = vmul.f32 %v5233_v55, %v1810_v8  ;;  %4687 = vmatpush3.bf16.msra.mxu1 %v5069_v12 }
 0x2aa   : > { %v1874_v51 = vadd.f32 %v1873_v54, %v5844_v53  ;;  %4688 = vmatprep.subr.bf16.mxu1 %v5426_v46  ;;  %v2017_v54 = vld [vmem:[%s5483_s14] sm:$0x1] }
 0x2ab   : > { %v5235_v57 = vpop.eup %5234 }
 0x2ac   : > { %v1875_v59 = vadd.f32 %v1874_v51, %v5847_v56  ;;  %v5851_v60 = vmul.f32 %v5235_v57, %v1805_v11  ;;  %v5237_v43 = vpop.eup %5236 }
 0x2ad   : > { %v5856_v58 = vmul.f32 %v5237_v43, %v1813_v17  ;;  %4689 = vmatpush3.bf16.msra.mxu1 %v5070_v14  ;;  %v5073_v17 = vld [vmem:[%s6321_s8 + $0x10] sm:$0xff]  }
 0x2ae   : > { %v1876_v62 = vadd.f32 %v1875_v59, %v5851_v60  ;;  %4690 = vmatprep.subr.bf16.mxu1 %v5426_v46 }
 0x2b0   : > { %v1877_v63 = vadd.f32 %v1876_v62, %v5853_v61 }
 0x2b1   : > { %4691 = vmatpush3.bf16.msra.mxu1 %v5071_v15 }
 0x2b2   : > { %v1878_v0 = vadd.f32 %v1877_v63, %v5856_v58  ;;  %4692 = vmatprep.subr.bf16.mxu1 %v5426_v46 }
 0x2b4   : > { %v1879_v1 = vrot.slane %v1878_v0, 4 }
 0x2b5   : > { %4693 = vmatpush3.bf16.msra.mxu1 %v5072_v16 }
 0x2b6   : > { %v1880_v2 = vadd.f32 %v1879_v1, %v1878_v0  ;;  %4694 = vmatprep.subr.bf16.mxu1 %v5426_v46 }
 0x2b8   : > { %v1881_v3 = vrot.slane %v1880_v2, 2 }
 0x2b9   : > { %4695 = vmatpush3.bf16.msra.mxu1 %v5073_v17  ;;  %v4207_v17 = vld [vmem:[%s5493_s24] ss:$0 sm:$0xff] }
 0x2ba   : > { %v1882_v4 = vadd.f32 %v1881_v3, %v1880_v2  ;;  %4696 = vmatprep.subr.bf16.mxu1 %v5426_v46 }
 0x2bc   : > { %v1883_v5 = vrot.slane %v1882_v4, 1 }
 0x2bd   : > { %4697 = vmatpush3.bf16.msra.mxu1 %v5074_v19 }
 0x2be   : > { %v1884_v6 = vadd.f32 %v1883_v5, %v1882_v4  ;;  %4698 = vmatprep.subr.bf16.mxu1 %v5426_v46 }
 0x2c0   : > { %v1886_v8 = vmul.f32 0.015625, %v1884_v6 }
 0x2c1   : > { %4699 = vmatpush3.bf16.msra.mxu1 %v5075_v20 }
 0x2c2   : > { %v1887_v9 = vpack.c.bf16 %v1886_v8, %v1886_v8  ;;  %4728 = vmatprep.subr.bf16.mxu1 %v5084_v30 }
 0x2c4   : > { %4681 = vmatmul.mubr.bf16.vlgmr.msra.gmra.mxu0 %v1887_v9 }
 0x2c5   : > { %4705 = vmatpush3.bf16.msra.mxu0 %v5076_v35 }
 0x2c6   : > { %4706 = vmatprep.subr.bf16.mxu0 %v5077_v37 }
 0x2c9   : > { %4707 = vmatpush3.bf16.msra.mxu0 %v5077_v37 }
 0x2ca   : > { %4708 = vmatprep.subr.bf16.mxu0 %v5078_v38 }
 0x2cd   : > { %4709 = vmatpush3.bf16.msra.mxu0 %v5078_v38 }
 0x2ce   : > { %4710 = vmatprep.subr.bf16.mxu0 %v5079_v27 }
 0x2d1   : > { %4711 = vmatpush3.bf16.msra.mxu0 %v5079_v27 }
 0x2d2   : > { %4712 = vmatprep.subr.bf16.mxu0 %v5080_v39 }
 0x2d5   : > { %4713 = vmatpush3.bf16.msra.mxu0 %v5080_v39 }
 0x2d6   : > { %4714 = vmatprep.subr.bf16.mxu0 %v5081_v40 }
 0x2d9   : > { %4715 = vmatpush3.bf16.msra.mxu0 %v5081_v40 }
 0x2da   : > { %4716 = vmatprep.subr.bf16.mxu0 %v5082_v41 }
 0x2dd   : > { %4717 = vmatpush3.bf16.msra.mxu0 %v5082_v41  ;;  %v2271_v41 = vunpack.c.h.bf16 %v5721_v22 }
 0x2de   : > { %4718 = vmatprep.subr.bf16.mxu0 %v5083_v42 }
 0x2e1   : > { %4719 = vmatpush3.bf16.msra.mxu0 %v5083_v42 }
 0x384   : > { %v1987_v11 = vpop.f32.mrf.mxu0 }
 0x385   : > { %v1988_v13 = vadd.f32 %v1987_v11, %v1904_v21 }
 0x386   : > { %v4682_v18 = vpop.f32.mrf.mxu0 }
 0x387   : > { %v4197_v23 = vmul.f32 -1.442695, %v1988_v13 }
 0x388   : > { %v1990_v24 = vpop.f32.mrf.mxu0 }
 0x389   : > { %5238 = vpow2.f32 %v4197_v23  ;;  %v2265_v23 = vunpack.c.h.bf16 %v5742_v44  ;;  %v2266_v24 = vunpack.c.l.bf16 %v5731_v36 }
 0x38a   : > { %v4683_v25 = vpop.f32.mrf.mxu0 }
 0x396   : > { %v5239_v28 = vpop.eup %5238 }
 0x397   : > { %v1996_v29 = vadd.f32 1.0, %v5239_v28 }
 0x399   : > { %5240 = vrcp.f32 %v1996_v29 }
 0x3a6   : > { %v5241_v26 = vpop.eup %5240 }
 0x3a7   : > { %v1999_v32 = vmul.f32 %v5241_v26, %v1988_v13  ;;  %v2264_v13 = vunpack.c.l.bf16 %v5742_v44 }
 0x3a9   : > { %v2000_v33 = vpack.c.bf16 %v1999_v32, %v1999_v32 }
 0x3ab   : > { %4701 = vmatmul.mubr.bf16.vlgmr.msra.gmra.mxu1 %v2000_v33 }
 0x3ac   : > { %4729 = vmatpush3.bf16.msra.mxu1 %v5084_v30  ;;  %v2269_v30 = vunpack.c.h.bf16 %v5726_v31 }
 0x3ad   : > { %4730 = vmatprep.subr.bf16.mxu1 %v5085_v45 }
 0x3b0   : > { %4731 = vmatpush3.bf16.msra.mxu1 %v5085_v45  ;;  %v2270_v45 = vunpack.c.l.bf16 %v5721_v22 }
 0x3b1   : > { %4732 = vmatprep.subr.bf16.mxu1 %v5086_v48 }
 0x3b4   : > { %4733 = vmatpush3.bf16.msra.mxu1 %v5086_v48 }
 0x3b5   : > { %4734 = vmatprep.subr.bf16.mxu1 %v5087_v50 }
 0x3b8   : > { %4735 = vmatpush3.bf16.msra.mxu1 %v5087_v50 }
 0x3b9   : > { %4736 = vmatprep.subr.bf16.mxu1 %v5088_v52 }
 0x3bc   : > { %4737 = vmatpush3.bf16.msra.mxu1 %v5088_v52 }
 0x46b   : > { %v2100_v55 = vpop.f32.mrf.mxu1 }
 0x46c   : > { %v2101_v51 = vadd.f32 %v2100_v55, %v2017_v54 }
 0x46d   : > { %v4702_v57 = vpop.f32.mrf.mxu1 }
 0x46e   : > { %v4206_v59 = vmul.f32 -1.442695, %v2101_v51  ;;  %v5094_v57 = vld [vmem:[%s6319_s12 + $0x4] ss:$20 sps:$4 sm:$0xff]  }
 0x46f   : > { %v2103_v43 = vpop.f32.mrf.mxu1 }
 0x470   : > { %5242 = vpow2.f32 %v4206_v59  ;;  %v5097_v59 = vld [vmem:[%s6319_s12 + $0xc] ss:$20 sps:$4 sm:$0xff]  }
 0x471   : > { %v4703_v62 = vpop.f32.mrf.mxu1 }
 0x47d   : > { %v5243_v63 = vpop.eup %5242 }
 0x47e   : > { %v2109_v0 = vadd.f32 1.0, %v5243_v63  ;;  %v4216_v63 = vld [vmem:[%s6327_s1] ss:$0 sm:$0xff]  ;;  %s6331_s1 = sld [smem:[#allocation16_spill]] }
 0x480   : > { %5244 = vrcp.f32 %v2109_v0 }
 0x48d   : > { %v5245_v1 = vpop.eup %5244 }
 0x48e   : > { %v2115_v2 = vrot.slane %v5245_v1, %v5714_v7 }
 0x490   : > { %v2116_v3 = vmul.f32 %v2115_v2, %v5834_v34  ;;  %v2117_v4 = vmul.f32 %v2115_v2, %v5836_v47  ;;  %v2118_v5 = vmul.f32 %v2115_v2, %v5839_v49  ;;  %v2119_v6 = vmul.f32 %v2115_v2, %v5844_v53  ;;  %v5089_v53 = vld [vmem:[%s5498_s30 + $0x10] sm:$0xff]  }
 0x491   : > { %v2120_v8 = vmul.f32 %v2115_v2, %v5847_v56  ;;  %v2121_v9 = vmul.f32 %v2115_v2, %v5851_v60  ;;  %v2122_v34 = vmul.f32 %v2115_v2, %v5853_v61  ;;  %v2123_v47 = vmul.f32 %v2115_v2, %v5856_v58  ;;  %4738 = vmatprep.subr.bf16.mxu1 %v5089_v53  ;;  %v5090_v56 = vld [vmem:[%s5498_s30 + $0x8] sm:$0xff]   ;;  %v5091_v60 = vld [vmem:[%s5498_s30] sm:$0xff]  }
 0x492   : > { %v2124_v10 = vpack.c.bf16 %v2117_v4, %v2116_v3  ;;  %v2125_v12 = vpack.c.bf16 %v2119_v6, %v2118_v5  ;;  %4739 = vmatpush3.bf16.msra.mxu1 %v5089_v53  ;;  %v2267_v58 = vunpack.c.h.bf16 %v5731_v36  ;;  %v2268_v36 = vunpack.c.l.bf16 %v5726_v31 }
 0x493   : > { %v2126_v14 = vpack.c.bf16 %v2121_v9, %v2120_v8  ;;  %v2127_v49 = vpack.c.bf16 %v2123_v47, %v2122_v34  ;;  %4740 = vmatprep.subr.bf16.mxu1 %v5090_v56 }
 0x494   : > { %4720 = vmatprep.mubr.bf16.mxu0 %v2124_v10 }
 0x495   : > { %4721 = vmatmul.mubr.bf16.vlgmr.msra.gmra.mxu0 %v2125_v12 }
 0x496   : > { %4724 = vmatprep.mubr.bf16.mxu0 %v2126_v14  ;;  %4741 = vmatpush3.bf16.msra.mxu1 %v5090_v56 }
 0x497   : > { %4742 = vmatprep.subr.bf16.mxu1 %v5091_v60 }
 0x49a   : > { %4743 = vmatpush3.bf16.msra.mxu1 %v5091_v60 }
 0x49d   : > { %4725 = vmatmul.mubr.bf16.gmra.mxu0 %v2127_v49 }
 0x49e   : > { %2669 = vmatprep.mubr.bf16.mxu0 %v5094_v57 }
 0x555   : > { %v4722_v15 = vpop.f32.mrf.mxu0 }
 0x556   : > { %v2242_v61 = vadd.f32 %v4722_v15, %v4207_v17 }
 0x557   : > { %v2233_v16 = vpop.f32.mrf.mxu0 }
 0x558   : > { %v2234_v20 = vadd.f32 %v4207_v17, %v2233_v16  ;;  %v2274_v32 = vadd.f32 %v2266_v24, %v2242_v61 }
 0x559   : > { %v4723_v19 = vpop.f32.mrf.mxu0 }
 0x55a   : > { %v2245_v21 = vadd.f32 %v4723_v19, %v4207_v17  ;;  %v2272_v29 = vadd.f32 %v2264_v13, %v2234_v20 }
 0x55b   : > { %v2236_v11 = vpop.f32.mrf.mxu0 }
 0x55c   : > { %v2237_v18 = vadd.f32 %v4207_v17, %v2236_v11  ;;  %v2275_v25 = vadd.f32 %v2267_v58, %v2245_v21 }
 0x55d   : > { %v4726_v28 = vpop.f32.mrf.mxu0 }
 0x55e   : > { %v2273_v26 = vadd.f32 %v2265_v23, %v2237_v18  ;;  %v2281_v37 = vpack.c.bf16 %v2275_v25, %v2274_v32  ;;  %v2258_v40 = vadd.f32 %v4726_v28, %v4207_v17 }
 0x55f   : > { %v2249_v33 = vpop.f32.mrf.mxu0 }
 0x560   : > { %v2280_v35 = vpack.c.bf16 %v2273_v26, %v2272_v29  ;;  %v2250_v27 = vadd.f32 %v4207_v17, %v2249_v33  ;;  %v2278_v54 = vadd.f32 %v2270_v45, %v2258_v40  ;;  %v4235_v33 = vld [vmem:[%s6328_s11 + $0x3] sm:$0x1] }
 0x561   : > { %v4727_v38 = vpop.f32.mrf.mxu0  ;;  %v2527_v40 = vpack.i.b16 %v4235_v33, %v4235_v33 }
 0x562   : > { %v2261_v39 = vadd.f32 %v4727_v38, %v4207_v17  ;;  %4744 = vmatprep.mubr.bf16.mxu1 %v2280_v35  ;;  %v2276_v50 = vadd.f32 %v2268_v36, %v2250_v27  ;;  %v4239_v35 = vld [vmem:[%s6328_s11 + $0x7] sm:$0x1]  ;;  %v4237_v27 = vld [vmem:[%s6328_s11 + $0x5] sm:$0x1] }
 0x563   : > { %v2252_v42 = vpop.f32.mrf.mxu0  ;;  %4745 = vmatmul.mubr.bf16.vlgmr.msra.gmra.mxu1 %v2281_v37  ;;  %v4233_v37 = vld [vmem:[%s6328_s11 + $0x1] sm:$0x1] }
 0x564   : > { %v2253_v44 = vadd.f32 %v4207_v17, %v2252_v42  ;;  %v2279_v48 = vadd.f32 %v2271_v41, %v2261_v39  ;;  %v2579_v41 = vpack.i.b16 %v4239_v35, %v4239_v35  ;;  %v2501_v36 = vpack.i.b16 %v4233_v37, %v4233_v37 }
 0x566   : > { %v2277_v52 = vadd.f32 %v2269_v30, %v2253_v44  ;;  %v2283_v51 = vpack.c.bf16 %v2279_v48, %v2278_v54  ;;  %v2553_v30 = vpack.i.b16 %v4237_v27, %v4237_v27 }
 0x568   : > { %v2282_v55 = vpack.c.bf16 %v2277_v52, %v2276_v50 }
 0x56a   : > { %4748 = vmatprep.mubr.bf16.mxu1 %v2282_v55  ;;  %v2532_v55 = vrot.slane %v2527_v40, %v5714_v7 }
 0x56b   : > { %4749 = vmatmul.mubr.bf16.gmra.mxu1 %v2283_v51  ;;  %v2584_v51 = vrot.slane %v2579_v41, %v5714_v7 }
 0x56c   : > { %2710 = vmatprep.mubr.bf16.mxu1 %v5097_v59 }
 0x623   : > { %v4746_v43 = vpop.f32.mrf.mxu1 }
 0x624   : > { %v5916_v1 = vadd.f32 %v4746_v43, %v4216_v63 }
 0x625   : > { %v2389_v62 = vpop.f32.mrf.mxu1 }
 0x626   : > { %v4227_v6 = vmul.f32 -1.442695, %v5916_v1  ;;  %v5922_v8 = vadd.f32 %v4216_v63, %v2389_v62  ;;  %v2506_v62 = vrot.slane %v2501_v36, %v5714_v7 }
 0x627   : > { %v4747_v0 = vpop.f32.mrf.mxu1 }
 0x628   : > { %v5914_v31 = vadd.f32 %v4747_v0, %v4216_v63  ;;  %v4225_v53 = vmul.f32 -1.442695, %v5922_v8 }
 0x629   : > { %v2392_v22 = vpop.f32.mrf.mxu1 }
 0x62a   : > { %v4228_v2 = vmul.f32 -1.442695, %v5914_v31  ;;  %v5919_v3 = vadd.f32 %v4216_v63, %v2392_v22  ;;  %v2558_v22 = vrot.slane %v2553_v30, %v5714_v7 }
 0x62b   : > { %v4750_v4 = vpop.f32.mrf.mxu1 }
 0x62c   : > { %v2414_v5 = vadd.f32 %v4750_v4, %v4216_v63  ;;  %5246 = vpow2.f32 %v4228_v2  ;;  %v4226_v14 = vmul.f32 -1.442695, %v5919_v3 }
 0x62d   : > { %v2405_v9 = vpop.f32.mrf.mxu1 }
 0x62e   : > { %v4231_v10 = vmul.f32 -1.442695, %v2414_v5  ;;  %v2406_v12 = vadd.f32 %v4216_v63, %v2405_v9 }
 0x62f   : > { %v4751_v34 = vpop.f32.mrf.mxu1 }
 0x630   : > { %5248 = vpow2.f32 %v4231_v10  ;;  %v4229_v47 = vmul.f32 -1.442695, %v2406_v12  ;;  %v2417_v49 = vadd.f32 %v4751_v34, %v4216_v63 }
 0x631   : > { %5250 = vpow2.f32 %v4227_v6  ;;  %v2408_v56 = vpop.f32.mrf.mxu1 }
 0x632   : > { %5252 = vpow2.f32 %v4229_v47  ;;  %v4232_v60 = vmul.f32 -1.442695, %v2417_v49  ;;  %v2409_v15 = vadd.f32 %v4216_v63, %v2408_v56 }
 0x633   : > { %5254 = vpow2.f32 %v4226_v14 }
 0x634   : > { %5256 = vpow2.f32 %v4232_v60  ;;  %v4230_v16 = vmul.f32 -1.442695, %v2409_v15 }
 0x635   : > { %5258 = vpow2.f32 %v4225_v53  ;;  %v4234_v53 = vld [vmem:[%s6328_s11 + $0x2] sm:$0x1] }
 0x636   : > { %5260 = vpow2.f32 %v4230_v16 }
 0x639   : > { %v5247_v17 = vpop.eup %5246 }
 0x63a   : > { %v2447_v20 = vadd.f32 1.0, %v5247_v17  ;;  %v2486_v17 = vld [vmem:[%s6328_s11] sm:$0x1] }
 0x63c   : > { %5262 = vrcp.f32 %v2447_v20 }
 0x63d   : > { %v5249_v19 = vpop.eup %5248 }
 0x63e   : > { %v5251_v21 = vpop.eup %5250  ;;  %v2450_v61 = vadd.f32 1.0, %v5249_v19  ;;  %v4236_v19 = vld [vmem:[%s6328_s11 + $0x4] sm:$0x1] }
 0x63f   : > { %v5253_v58 = vpop.eup %5252  ;;  %v2446_v23 = vadd.f32 1.0, %v5251_v21 }
 0x640   : > { %v5255_v11 = vpop.eup %5254  ;;  %v2448_v13 = vadd.f32 1.0, %v5253_v58  ;;  %5264 = vrcp.f32 %v2450_v61 }
 0x641   : > { %v5257_v18 = vpop.eup %5256  ;;  %v2445_v29 = vadd.f32 1.0, %v5255_v11  ;;  %v2488_v11 = vpack.i.b16 %v2486_v17, %v2486_v17 }
 0x642   : > { %v5259_v24 = vpop.eup %5258  ;;  %v2451_v25 = vadd.f32 1.0, %v5257_v18  ;;  %5266 = vrcp.f32 %v2448_v13  ;;  %v2540_v13 = vpack.i.b16 %v4236_v19, %v4236_v19 }
 0x643   : > { %v5261_v28 = vpop.eup %5260  ;;  %v2444_v32 = vadd.f32 1.0, %v5259_v24 }
 0x644   : > { %5268 = vrcp.f32 %v2451_v25  ;;  %v2449_v26 = vadd.f32 1.0, %v5261_v28 }
 0x645   : > { %5270 = vrcp.f32 %v2446_v23 }
 0x646   : > { %5272 = vrcp.f32 %v2449_v26  ;;  %v2493_v26 = vrot.slane %v2488_v11, %v5714_v7 }
 0x647   : > { %5274 = vrcp.f32 %v2445_v29 }
 0x648   : > { %5276 = vrcp.f32 %v2444_v32  ;;  %v2545_v32 = vrot.slane %v2540_v13, %v5714_v7 }
 0x649   : > { %v5263_v38 = vpop.eup %5262 }
 0x64a   : > { %v2471_v54 = vmul.f32 %v5263_v38, %v5914_v31 }
 0x64d   : > { %v5265_v39 = vpop.eup %5264 }
 0x64e   : > { %v2474_v48 = vmul.f32 %v5265_v39, %v2414_v5 }
 0x64f   : > { %v5267_v42 = vpop.eup %5266 }
 0x650   : > { %v2472_v57 = vmul.f32 %v5267_v42, %v2406_v12  ;;  %v4240_v42 = vld [vmem:[%s6328_s11 + $0x8] sm:$0x1] }
 0x651   : > { %v5269_v44 = vpop.eup %5268 }
 0x652   : > { %v5271_v45 = vpop.eup %5270  ;;  %v2475_v50 = vmul.f32 %v5269_v44, %v2417_v49 }
 0x653   : > { %v5273_v52 = vpop.eup %5272  ;;  %v2470_v0 = vmul.f32 %v5271_v45, %v5916_v1 }
 0x654   : > { %v5933_v59 = vpack.c.bf16 %v2475_v50, %v2474_v48  ;;  %v2473_v43 = vmul.f32 %v5273_v52, %v2409_v15  ;;  %v5275_v63 = vpop.eup %5274  ;;  %v2592_v48 = vpack.i.b16 %v4240_v42, %v4240_v42 }
 0x655   : > { %v5277_v6 = vpop.eup %5276  ;;  %v5943_v9 = vpack.c.bf16 %v2471_v54, %v2470_v0  ;;  %v2469_v12 = vmul.f32 %v5275_v63, %v5919_v3  ;;  %v4238_v3 = vld [vmem:[%s6328_s11 + $0x6] sm:$0x1]  ;;  %v5092_v54 = vld [vmem:[%s6319_s12] ss:$20 sps:$4 sm:$0xff]   ;;  %v5099_v0 = vld [vmem:[%s6329_s23 + $0x38] sm:$0xff]  }
 0x656   : > { %v5938_v2 = vpack.c.bf16 %v2473_v43, %v2472_v57  ;;  %v2536_v4 = vmul.bf16 %v2532_v55, %v5933_v59  ;;  %v2588_v31 = vmul.bf16 %v2584_v51, %v5933_v59  ;;  %v2510_v5 = vmul.bf16 %v2506_v62, %v5933_v59  ;;  %v5098_v63 = vld [vmem:[%s6319_s12 + $0x10] ss:$20 sps:$4 sm:$0xff]  }
 0x657   : > { %v2562_v10 = vmul.bf16 %v2558_v22, %v5933_v59  ;;  %v2468_v34 = vmul.f32 %v5277_v6, %v5922_v8  ;;  %v2534_v60 = vmul.bf16 %v2532_v55, %v5943_v9  ;;  %v2586_v15 = vmul.bf16 %v2584_v51, %v5943_v9  ;;  %v5105_v6 = vld [vmem:[%s6329_s23 + $0x8] sm:$0xff]  }
 0x658   : > { %4494 = vmatprep.subr.bf16.mxu0 %v2536_v4  ;;  %4516 = vmatprep.subr.bf16.mxu1 %v2588_v31  ;;  %v2535_v1 = vmul.bf16 %v2532_v55, %v5938_v2  ;;  %v2587_v14 = vmul.bf16 %v2584_v51, %v5938_v2  ;;  %v2509_v47 = vmul.bf16 %v2506_v62, %v5938_v2  ;;  %v5102_v4 = vld [vmem:[%s6329_s23 + $0x20] sm:$0xff]   ;;  %v5103_v31 = vld [vmem:[%s6329_s23 + $0x18] sm:$0xff]  }
 0x659   : > { %4495 = vmatpush3.bf16.msra.mxu0 %v2510_v5  ;;  %4517 = vmatpush3.bf16.msra.mxu1 %v2562_v10  ;;  %v2561_v49 = vmul.bf16 %v2558_v22, %v5938_v2  ;;  %v5954_v56 = vpack.c.bf16 %v2469_v12, %v2468_v34  ;;  %v2514_v8 = vpack.i.b16 %v4234_v53, %v4234_v53  ;;  %v5104_v5 = vld [vmem:[%s6329_s23 + $0x10] sm:$0xff]  }
 0x65a   : > { %4496 = vmatprep.subr.bf16.mxu0 %v2535_v1  ;;  %4518 = vmatprep.subr.bf16.mxu1 %v2587_v14  ;;  %v2566_v16 = vpack.i.b16 %v4238_v3, %v4238_v3  ;;  %v2508_v20 = vmul.bf16 %v2506_v62, %v5943_v9  ;;  %v2560_v21 = vmul.bf16 %v2558_v22, %v5943_v9 }
 0x65b   : > { %v2533_v61 = vmul.bf16 %v2532_v55, %v5954_v56  ;;  %v2585_v58 = vmul.bf16 %v2584_v51, %v5954_v56  ;;  %v2519_v18 = vrot.slane %v2514_v8, %v5714_v7  ;;  %v2507_v24 = vmul.bf16 %v2506_v62, %v5954_v56  ;;  %v5095_v55 = vld [vmem:[%s6319_s12 + $0x8] ss:$20 sps:$4 sm:$0xff]  }
 0x65c   : > { %v2571_v23 = vrot.slane %v2566_v16, %v5714_v7  ;;  %v2559_v25 = vmul.bf16 %v2558_v22, %v5954_v56  ;;  %v2497_v33 = vmul.bf16 %v2493_v26, %v5933_v59  ;;  %v2549_v35 = vmul.bf16 %v2545_v32, %v5933_v59  ;;  %v5100_v22 = vld [vmem:[%s6329_s23 + $0x30] sm:$0xff]  }
 0x65d   : > { %4497 = vmatpush3.bf16.msra.mxu0 %v2509_v47  ;;  %4519 = vmatpush3.bf16.msra.mxu1 %v2561_v49  ;;  %v2523_v28 = vmul.bf16 %v2519_v18, %v5933_v59  ;;  %v2522_v37 = vmul.bf16 %v2519_v18, %v5938_v2  ;;  %v2496_v27 = vmul.bf16 %v2493_v26, %v5938_v2  ;;  %v4241_v49 = vld [vmem:[%s6330_s28] ss:$0 sm:$0xff]  ;;  %s6332_s28 = sld [smem:[#allocation15_spill]] }
 0x65e   : > { %4498 = vmatprep.subr.bf16.mxu0 %v2534_v60  ;;  %4520 = vmatprep.subr.bf16.mxu1 %v2586_v15  ;;  %v2575_v29 = vmul.bf16 %v2571_v23, %v5933_v59  ;;  %v2574_v38 = vmul.bf16 %v2571_v23, %v5938_v2  ;;  %v2548_v39 = vmul.bf16 %v2545_v32, %v5938_v2 }
 0x65f   : > { %v2521_v40 = vmul.bf16 %v2519_v18, %v5943_v9  ;;  %v2573_v41 = vmul.bf16 %v2571_v23, %v5943_v9  ;;  %v2495_v36 = vmul.bf16 %v2493_v26, %v5943_v9  ;;  %v2547_v44 = vmul.bf16 %v2545_v32, %v5943_v9 }
 0x660   : > { %v2520_v30 = vmul.bf16 %v2519_v18, %v5954_v56  ;;  %v2572_v45 = vmul.bf16 %v2571_v23, %v5954_v56  ;;  %v2494_v50 = vmul.bf16 %v2493_v26, %v5954_v56  ;;  %v2546_v52 = vmul.bf16 %v2545_v32, %v5954_v56 }
 0x661   : > { %4499 = vmatpush3.bf16.msra.mxu0 %v2508_v20  ;;  %4521 = vmatpush3.bf16.msra.mxu1 %v2560_v21  ;;  %v2597_v51 = vrot.slane %v2592_v48, %v5714_v7  ;;  %v5108_v48 = vld [vmem:[%s6331_s1 + $0x30] sm:$0xff]  }
 0x662   : > { %4500 = vmatprep.subr.bf16.mxu0 %v2533_v61  ;;  %4522 = vmatprep.subr.bf16.mxu1 %v2585_v58 }
 0x663   : > { %v2601_v57 = vmul.bf16 %v2597_v51, %v5933_v59  ;;  %v2600_v43 = vmul.bf16 %v2597_v51, %v5938_v2  ;;  %v2599_v59 = vmul.bf16 %v2597_v51, %v5943_v9  ;;  %v2598_v62 = vmul.bf16 %v2597_v51, %v5954_v56  ;;  %v5101_v2 = vld [vmem:[%s6329_s23 + $0x28] sm:$0xff]   ;;  %v5106_v9 = vld [vmem:[%s6329_s23] sm:$0xff]  }
 0x664   : > { %v5113_v51 = vld [vmem:[%s6331_s1 + $0x8] sm:$0xff]  }
 0x665   : > { %4501 = vmatpush3.bf16.msra.mxu0 %v2507_v24  ;;  %4523 = vmatpush3.bf16.msra.mxu1 %v2559_v25 }
 0x666   : > { %4502 = vmatprep.subr.bf16.mxu0 %v2523_v28  ;;  %4524 = vmatprep.subr.bf16.mxu1 %v2575_v29 }
 0x669   : > { %4503 = vmatpush3.bf16.msra.mxu0 %v2497_v33  ;;  %4525 = vmatpush3.bf16.msra.mxu1 %v2549_v35 }
 0x66a   : > { %4504 = vmatprep.subr.bf16.mxu0 %v2522_v37  ;;  %4526 = vmatprep.subr.bf16.mxu1 %v2574_v38 }
 0x66d   : > { %4505 = vmatpush3.bf16.msra.mxu0 %v2496_v27  ;;  %4527 = vmatpush3.bf16.msra.mxu1 %v2548_v39 }
 0x66e   : > { %4506 = vmatprep.subr.bf16.mxu0 %v2521_v40  ;;  %4528 = vmatprep.subr.bf16.mxu1 %v2573_v41 }
 0x671   : > { %4507 = vmatpush3.bf16.msra.mxu0 %v2495_v36  ;;  %4529 = vmatpush3.bf16.msra.mxu1 %v2547_v44 }
 0x672   : > { %4508 = vmatprep.subr.bf16.mxu0 %v2520_v30  ;;  %4530 = vmatprep.subr.bf16.mxu1 %v2572_v45  ;;  %v5107_v45 = vld [vmem:[%s6331_s1 + $0x38] sm:$0xff]  }
 0x675   : > { %4509 = vmatpush3.bf16.msra.mxu0 %v2494_v50  ;;  %4531 = vmatpush3.bf16.msra.mxu1 %v2546_v52  ;;  %v5109_v50 = vld [vmem:[%s6331_s1 + $0x28] sm:$0xff]   ;;  %v5110_v52 = vld [vmem:[%s6331_s1 + $0x20] sm:$0xff]  }
 0x676   : > { %4752 = vmatprep.subr.bf16.mxu0 %v5426_v46  ;;  %4764 = vmatprep.subr.bf16.mxu1 %v5426_v46 }
 0x678   : > { %2670 = vmatmul.mubr.bf16.vlgmr.msra.gmra.mxu0 %v5092_v54  ;;  %2711 = vmatmul.mubr.bf16.vlgmr.msra.gmra.mxu1 %v5095_v55  ;;  %v5111_v54 = vld [vmem:[%s6331_s1 + $0x18] sm:$0xff]   ;;  %v5112_v55 = vld [vmem:[%s6331_s1 + $0x10] sm:$0xff]  }
 0x679   : > { %4753 = vmatpush3.bf16.msra.mxu0 %v2601_v57  ;;  %4760 = vmatprep.mubr.msk.bf16.mxu0 %vm5427_vm1, %v5426_v46  ;;  %v5114_v57 = vld [vmem:[%s6331_s1] sm:$0xff]   ;;  %s6335_s1 = sld [smem:[#allocation17_spill]] }
 0x67a   : > { %4754 = vmatprep.subr.bf16.mxu0 %v5426_v46  ;;  %4780 = vmatprep.mubr.msk.bf16.mxu1 %vm5427_vm1, %v5426_v46 }
 0x67b   : > { %4765 = vmatpush3.bf16.msra.mxu1 %v5099_v0 }
 0x67c   : > { %4766 = vmatprep.subr.bf16.mxu1 %v5426_v46 }
 0x67d   : > { %4755 = vmatpush3.bf16.msra.mxu0 %v2600_v43  ;;  %v2800_v43 = vld [vmem:[%s6332_s28] sm:$0x1]  ;;  %s6334_s28 = sld [smem:[#allocation20_spill]] }
 0x67e   : > { %4756 = vmatprep.subr.bf16.mxu0 %v5426_v46 }
 0x67f   : > { %4767 = vmatpush3.bf16.msra.mxu1 %v5100_v22 }
 0x680   : > { %4768 = vmatprep.subr.bf16.mxu1 %v5426_v46 }
 0x681   : > { %4757 = vmatpush3.bf16.msra.mxu0 %v2599_v59 }
 0x682   : > { %4758 = vmatprep.subr.bf16.mxu0 %v5426_v46 }
 0x683   : > { %4769 = vmatpush3.bf16.msra.mxu1 %v5101_v2 }
 0x684   : > { %4770 = vmatprep.subr.bf16.mxu1 %v5426_v46 }
 0x685   : > { %4759 = vmatpush3.bf16.msra.mxu0 %v2598_v62 }
 0x686   : > { %4784 = vmatprep.subr.bf16.mxu0 %v5426_v46 }
 0x687   : > { %4771 = vmatpush3.bf16.msra.mxu1 %v5102_v4 }
 0x688   : > { %4761 = vmatmul.mubr.msk.bf16.vlgmr.msra.gmra.mxu0 %vm1608_vm0, %v5098_v63  ;;  %4772 = vmatprep.subr.bf16.mxu1 %v5426_v46 }
 0x689   : > { %4800 = vmatprep.mubr.msk.bf16.mxu0 %vm5427_vm1, %v5426_v46  ;;  %4785 = vmatpush3.bf16.msra.mxu0 %v5107_v45 }
 0x68a   : > { %4786 = vmatprep.subr.bf16.mxu0 %v5426_v46 }
 0x68b   : > { %4773 = vmatpush3.bf16.msra.mxu1 %v5103_v31 }
 0x68c   : > { %4774 = vmatprep.subr.bf16.mxu1 %v5426_v46 }
 0x68d   : > { %4787 = vmatpush3.bf16.msra.mxu0 %v5108_v48 }
 0x68e   : > { %4788 = vmatprep.subr.bf16.mxu0 %v5426_v46 }
 0x68f   : > { %4775 = vmatpush3.bf16.msra.mxu1 %v5104_v5 }
 0x690   : > { %4776 = vmatprep.subr.bf16.mxu1 %v5426_v46 }
 0x691   : > { %4789 = vmatpush3.bf16.msra.mxu0 %v5109_v50 }
 0x692   : > { %4790 = vmatprep.subr.bf16.mxu0 %v5426_v46 }
 0x693   : > { %4777 = vmatpush3.bf16.msra.mxu1 %v5105_v6 }
 0x694   : > { %4778 = vmatprep.subr.bf16.mxu1 %v5426_v46 }
 0x695   : > { %4791 = vmatpush3.bf16.msra.mxu0 %v5110_v52 }
 0x696   : > { %4792 = vmatprep.subr.bf16.mxu0 %v5426_v46 }
 0x697   : > { %4779 = vmatpush3.bf16.msra.mxu1 %v5106_v9 }
 0x698   : > { %4804 = vmatprep.subr.bf16.mxu1 %v5426_v46 }
 0x699   : > { %4793 = vmatpush3.bf16.msra.mxu0 %v5111_v54 }
 0x69a   : > { %4794 = vmatprep.subr.bf16.mxu0 %v5426_v46 }
 0x69d   : > { %4795 = vmatpush3.bf16.msra.mxu0 %v5112_v55 }
 0x69e   : > { %4796 = vmatprep.subr.bf16.mxu0 %v5426_v46 }
 0x6a1   : > { %4797 = vmatpush3.bf16.msra.mxu0 %v5113_v51 }
 0x6a2   : > { %4798 = vmatprep.subr.bf16.mxu0 %v5426_v46 }
 0x6a5   : > { %4799 = vmatpush3.bf16.msra.mxu0 %v5114_v57 }
 0x6a6   : > { %4824 = vmatprep.subr.bf16.mxu0 %v5426_v46 }
 0x738   : > { %v4510_v10 = vpop.f32.mrf.mxu0  ;;  %v4532_v12 = vpop.f32.mrf.mxu1 }
 0x73a   : > { %v4511_v1 = vpop.f32.mrf.mxu0  ;;  %v4533_v34 = vpop.f32.mrf.mxu1 }
 0x73b   : > { %v4512_v47 = vadd.f32 %v4511_v1, %v4510_v10  ;;  %v4534_v60 = vadd.f32 %v4533_v34, %v4532_v12  ;;  %v5115_v10 = vld [vmem:[%s6333_s3 + $0x38] sm:$0xff]   ;;  %v5116_v12 = vld [vmem:[%s6333_s3 + $0x30] sm:$0xff]   ;;  %v5117_v1 = vld [vmem:[%s6333_s3 + $0x28] sm:$0xff]  }
 0x73c   : > { %v4513_v14 = vpop.f32.mrf.mxu0  ;;  %v4535_v3 = vpop.f32.mrf.mxu1  ;;  %v5119_v34 = vld [vmem:[%s6333_s3 + $0x18] sm:$0xff]  }
 0x73d   : > { %v2672_v56 = vadd.f32 %v4512_v47, %v4241_v49  ;;  %v5120_v47 = vld [vmem:[%s6333_s3 + $0x10] sm:$0xff]  }
 0x73e   : > { %v4514_v53 = vpop.f32.mrf.mxu0  ;;  %v4536_v8 = vpop.f32.mrf.mxu1 }
 0x73f   : > { %v4515_v15 = vadd.f32 %v4514_v53, %v4513_v14  ;;  %v4537_v17 = vadd.f32 %v4536_v8, %v4535_v3  ;;  %v2713_v19 = vadd.f32 %v4534_v60, %v2672_v56  ;;  %v5118_v14 = vld [vmem:[%s6333_s3 + $0x20] sm:$0xff]   ;;  %v5123_v3 = vld [vmem:[%s6334_s28 + $0x38] sm:$0xff]   ;;  %v5124_v56 = vld [vmem:[%s6334_s28 + $0x30] sm:$0xff]  }
 0x740   : > { %v5122_v53 = vld [vmem:[%s6333_s3] sm:$0xff]   ;;  %v5125_v60 = vld [vmem:[%s6334_s28 + $0x28] sm:$0xff]   ;;  %v5127_v8 = vld [vmem:[%s6334_s28 + $0x18] sm:$0xff]  }
 0x741   : > { %v2675_v16 = vadd.f32 %v4515_v15, %v4241_v49  ;;  %v5121_v49 = vld [vmem:[%s6333_s3 + $0x8] sm:$0xff]   ;;  %v5126_v15 = vld [vmem:[%s6334_s28 + $0x20] sm:$0xff]   ;;  %s6336_s3 = sld [smem:[#allocation19_spill]] }
 0x743   : > { %v2716_v11 = vadd.f32 %v4537_v17, %v2675_v16  ;;  %v5128_v16 = vld [vmem:[%s6334_s28 + $0x10] sm:$0xff]   ;;  %v2913_v17 = vld [vmem:[%s6335_s1] sm:$0x1]  ;;  %s6337_s1 = sld [smem:[#allocation22_spill]] }
 0x748   : > { %v2753_v20 = vpop.f32.mrf.mxu0 }
 0x749   : > { %v2754_v21 = vadd.f32 %v2753_v20, %v2713_v19 }
 0x74a   : > { %v4762_v61 = vpop.f32.mrf.mxu0 }
 0x74b   : > { %v4248_v58 = vmul.f32 -1.442695, %v2754_v21 }
 0x74c   : > { %v2756_v13 = vpop.f32.mrf.mxu0 }
 0x74d   : > { %5278 = vpow2.f32 %v4248_v58  ;;  %v2757_v18 = vadd.f32 %v2756_v13, %v2716_v11 }
 0x74e   : > { %v4763_v23 = vpop.f32.mrf.mxu0 }
 0x74f   : > { %v4249_v24 = vmul.f32 -1.442695, %v2757_v18 }
 0x751   : > { %5280 = vpow2.f32 %v4249_v24 }
 0x75a   : > { %v5279_v25 = vpop.eup %5278 }
 0x75b   : > { %v2766_v28 = vadd.f32 1.0, %v5279_v25 }
 0x75d   : > { %5282 = vrcp.f32 %v2766_v28 }
 0x75e   : > { %v5281_v29 = vpop.eup %5280 }
 0x75f   : > { %v2767_v26 = vadd.f32 1.0, %v5281_v29 }
 0x761   : > { %5284 = vrcp.f32 %v2767_v26  ;;  %v5129_v26 = vld [vmem:[%s6334_s28 + $0x8] sm:$0xff]  }
 0x76a   : > { %v5283_v32 = vpop.eup %5282 }
 0x76b   : > { %v6025_v35 = vmul.f32 %v5283_v32, %v2754_v21  ;;  %v5130_v32 = vld [vmem:[%s6334_s28] sm:$0xff]  }
 0x76e   : > { %v5285_v33 = vpop.eup %5284 }
 0x76f   : > { %v6027_v37 = vmul.f32 %v5285_v33, %v2757_v18 }
 0x771   : > { %v2774_v38 = vadd.f32 %v6027_v37, %v6025_v35 }
 0x773   : > { %v2775_v27 = vrot.slane %v2774_v38, 4 }
 0x775   : > { %v2776_v39 = vadd.f32 %v2775_v27, %v2774_v38  ;;  %v4268_v38 = vld [vmem:[%s6336_s3] ss:$0 sm:$0xff]  ;;  %s6339_s3 = sld [smem:[#allocation23_spill]] }
 0x777   : > { %v2777_v40 = vrot.slane %v2776_v39, 2 }
 0x779   : > { %v2778_v41 = vadd.f32 %v2777_v40, %v2776_v39 }
 0x77b   : > { %v2779_v42 = vrot.slane %v2778_v41, 1 }
 0x77d   : > { %v2780_v36 = vadd.f32 %v2779_v42, %v2778_v41  ;;  %v5428_v42 = vmov 0  }
 0x77f   : > { %v2782_v44 = vmul.f32 0.0625, %v2780_v36  ;;  %v5131_v36 = vld [vmem:[%s6337_s1 + $0x4] ss:$8 sps:$4 sm:$0xff]  }
 0x781   : > { %v2783_v30 = vpack.c.bf16 %v2782_v44, %v2782_v44  ;;  %v4277_v44 = vld [vmem:[%s6338_s5] ss:$0 sm:$0xff]  ;;  %s6340_s5 = sld [smem:[#allocation25_spill]] }
 0x783   : > { %4781 = vmatmul.mubr.bf16.vlgmr.msra.gmra.mxu1 %v2783_v30 }
 0x784   : > { %4820 = vmatprep.mubr.msk.bf16.mxu1 %vm5427_vm1, %v5426_v46  ;;  %4805 = vmatpush3.bf16.msra.mxu1 %v5115_v10  ;;  %v4292_v10 = vld [vmem:[%s6339_s3 + $0x5] sm:$0x1] }
 0x785   : > { %4806 = vmatprep.subr.bf16.mxu1 %v5426_v46 }
 0x788   : > { %4807 = vmatpush3.bf16.msra.mxu1 %v5116_v12 }
 0x789   : > { %4808 = vmatprep.subr.bf16.mxu1 %v5426_v46 }
 0x78c   : > { %4809 = vmatpush3.bf16.msra.mxu1 %v5117_v1 }
 0x78d   : > { %4810 = vmatprep.subr.bf16.mxu1 %v5426_v46 }
 0x790   : > { %4811 = vmatpush3.bf16.msra.mxu1 %v5118_v14 }
 0x791   : > { %4812 = vmatprep.subr.bf16.mxu1 %v5426_v46 }
 0x794   : > { %4813 = vmatpush3.bf16.msra.mxu1 %v5119_v34  ;;  %v3309_v34 = vpack.i.b16 %v4292_v10, %v4292_v10 }
 0x795   : > { %4814 = vmatprep.subr.bf16.mxu1 %v5426_v46 }
 0x798   : > { %4815 = vmatpush3.bf16.msra.mxu1 %v5120_v47  ;;  %v4291_v47 = vld [vmem:[%s6339_s3 + $0x4] sm:$0x1] }
 0x799   : > { %4816 = vmatprep.subr.bf16.mxu1 %v5426_v46 }
 0x79c   : > { %4817 = vmatpush3.bf16.msra.mxu1 %v5121_v49 }
 0x79d   : > { %4818 = vmatprep.subr.bf16.mxu1 %v5426_v46 }
 0x7a0   : > { %4819 = vmatpush3.bf16.msra.mxu1 %v5122_v53  ;;  %v3314_v53 = vrot.slane %v3309_v34, %v5714_v7 }
 0x7a1   : > { %3366 = vmatprep.subr.bf16.mxu1 %v5428_v42 }
 0x843   : > { %v2883_v59 = vpop.f32.mrf.mxu1 }
 0x844   : > { %v2884_v62 = vadd.f32 %v2883_v59, %v2800_v43 }
 0x845   : > { %v4782_v63 = vpop.f32.mrf.mxu1 }
 0x846   : > { %v4258_v0 = vmul.f32 -1.442695, %v2884_v62  ;;  %v4294_v63 = vld [vmem:[%s6339_s3 + $0x7] sm:$0x1] }
 0x847   : > { %v2886_v22 = vpop.f32.mrf.mxu1 }
 0x848   : > { %5286 = vpow2.f32 %v4258_v0  ;;  %v3329_v0 = vpack.i.b16 %v4294_v63, %v4294_v63 }
 0x849   : > { %v4783_v2 = vpop.f32.mrf.mxu1 }
 0x84a   : > { %v4293_v2 = vld [vmem:[%s6339_s3 + $0x6] sm:$0x1] }
 0x855   : > { %v5287_v4 = vpop.eup %5286 }
 0x856   : > { %v2892_v31 = vadd.f32 1.0, %v5287_v4 }
 0x858   : > { %5288 = vrcp.f32 %v2892_v31 }
 0x865   : > { %v5289_v5 = vpop.eup %5288 }
 0x866   : > { %v2895_v6 = vmul.f32 %v5289_v5, %v2884_v62 }
 0x868   : > { %v2896_v9 = vpack.c.bf16 %v2895_v6, %v2895_v6  ;;  %v3334_v6 = vrot.slane %v3329_v0, %v5714_v7 }
 0x86a   : > { %4801 = vmatmul.mubr.bf16.vlgmr.msra.gmra.mxu0 %v2896_v9  ;;  %v3319_v9 = vpack.i.b16 %v4293_v2, %v4293_v2 }
 0x86b   : > { %4840 = vmatprep.mubr.msk.bf16.mxu0 %vm5427_vm1, %v5426_v46  ;;  %4825 = vmatpush3.bf16.msra.mxu0 %v5123_v3  ;;  %v3299_v3 = vpack.i.b16 %v4291_v47, %v4291_v47 }
 0x86c   : > { %4826 = vmatprep.subr.bf16.mxu0 %v5426_v46  ;;  %v3324_v14 = vrot.slane %v3319_v9, %v5714_v7 }
 0x86f   : > { %4827 = vmatpush3.bf16.msra.mxu0 %v5124_v56  ;;  %v4290_v56 = vld [vmem:[%s6339_s3 + $0x3] sm:$0x1] }
 0x870   : > { %4828 = vmatprep.subr.bf16.mxu0 %v5426_v46 }
 0x873   : > { %4829 = vmatpush3.bf16.msra.mxu0 %v5125_v60 }
 0x874   : > { %4830 = vmatprep.subr.bf16.mxu0 %v5426_v46 }
 0x877   : > { %4831 = vmatpush3.bf16.msra.mxu0 %v5126_v15  ;;  %v3304_v15 = vrot.slane %v3299_v3, %v5714_v7 }
 0x878   : > { %4832 = vmatprep.subr.bf16.mxu0 %v5426_v46 }
 0x87b   : > { %4833 = vmatpush3.bf16.msra.mxu0 %v5127_v8  ;;  %v3289_v8 = vpack.i.b16 %v4290_v56, %v4290_v56 }
 0x87c   : > { %4834 = vmatprep.subr.bf16.mxu0 %v5426_v46 }
 0x87f   : > { %4835 = vmatpush3.bf16.msra.mxu0 %v5128_v16  ;;  %v4289_v16 = vld [vmem:[%s6339_s3 + $0x2] sm:$0x1] }
 0x880   : > { %4836 = vmatprep.subr.bf16.mxu0 %v5426_v46 }
 0x883   : > { %4837 = vmatpush3.bf16.msra.mxu0 %v5129_v26 }
 0x884   : > { %4838 = vmatprep.subr.bf16.mxu0 %v5426_v46 }
 0x887   : > { %4839 = vmatpush3.bf16.msra.mxu0 %v5130_v32 }
 0x888   : > { %4844 = vmatprep.subr.bf16.mxu0 %v5426_v46 }
 0x92a   : > { %v2996_v19 = vpop.f32.mrf.mxu0 }
 0x92b   : > { %v2997_v20 = vadd.f32 %v2996_v19, %v2913_v17  ;;  %v3294_v19 = vrot.slane %v3289_v8, %v5714_v7 }
 0x92c   : > { %v4802_v21 = vpop.f32.mrf.mxu0 }
 0x92d   : > { %v4267_v61 = vmul.f32 -1.442695, %v2997_v20  ;;  %v3279_v20 = vpack.i.b16 %v4289_v16, %v4289_v16  ;;  %v4288_v21 = vld [vmem:[%s6339_s3 + $0x1] sm:$0x1] }
 0x92e   : > { %v2999_v58 = vpop.f32.mrf.mxu0 }
 0x92f   : > { %5290 = vpow2.f32 %v4267_v61  ;;  %v3284_v58 = vrot.slane %v3279_v20, %v5714_v7 }
 0x930   : > { %v4803_v11 = vpop.f32.mrf.mxu0 }
 0x931   : > { %v3269_v11 = vpack.i.b16 %v4288_v21, %v4288_v21 }
 0x93c   : > { %v5291_v13 = vpop.eup %5290 }
 0x93d   : > { %v3005_v18 = vadd.f32 1.0, %v5291_v13  ;;  %v3257_v13 = vld [vmem:[%s6339_s3] sm:$0x1] }
 0x93f   : > { %5292 = vrcp.f32 %v3005_v18 }
 0x94c   : > { %v5293_v23 = vpop.eup %5292 }
 0x94d   : > { %v3011_v24 = vrot.slane %v5293_v23, %v5714_v7  ;;  %v3274_v23 = vrot.slane %v3269_v11, %v5714_v7 }
 0x94f   : > { %v3012_v25 = vmul.f32 %v3011_v24, %v6025_v35  ;;  %v3013_v28 = vmul.f32 %v3011_v24, %v6027_v37  ;;  %v3259_v24 = vpack.i.b16 %v3257_v13, %v3257_v13 }
 0x951   : > { %v3014_v29 = vpack.c.bf16 %v3013_v28, %v3012_v25  ;;  %v4295_v25 = vld [vmem:[%s6339_s3 + $0x8] sm:$0x1]  ;;  %s6342_s3 = sld [smem:[#allocation27_spill]] }
 0x952   : > { %v3339_v26 = vpack.i.b16 %v4295_v25, %v4295_v25 }
 0x953   : > { %4821 = vmatmul.mubr.bf16.vlgmr.msra.gmra.mxu1 %v3014_v29  ;;  %v3264_v29 = vrot.slane %v3259_v24, %v5714_v7 }
 0x954   : > { %4299 = vmatprep.mubr.msk.bf16.mxu1 %vm3362_vm2, %v5131_v36  ;;  %v5139_v36 = vld [vmem:[%s6340_s5 + $0x10] sm:$0xff]  }
 0x957   : > { %v5144_v3 = vld [vmem:[%s6342_s3 + $0x28] sm:$0xff]   ;;  %v5145_v56 = vld [vmem:[%s6342_s3 + $0x20] sm:$0xff]  }
 0x958   : > { %v5148_v8 = vld [vmem:[%s6342_s3 + $0x8] sm:$0xff]   ;;  %v5149_v16 = vld [vmem:[%s6342_s3] sm:$0xff]  }
 0xa13   : > { %v3120_v33 = vpop.f32.mrf.mxu1 }
 0xa14   : > { %v3121_v40 = vadd.f32 %v4268_v38, %v3120_v33  ;;  %v3344_v33 = vrot.slane %v3339_v26, %v5714_v7 }
 0xa15   : > { %v4822_v27 = vpop.f32.mrf.mxu1 }
 0xa16   : > { %v5133_v27 = vld [vmem:[%s6337_s1] ss:$8 sps:$4 sm:$0xff]   ;;  %s6341_s1 = sld [smem:[#allocation24_spill]] }
 0xa17   : > { %v3123_v39 = vpop.f32.mrf.mxu1 }
 0xa18   : > { %v3124_v35 = vadd.f32 %v4268_v38, %v3123_v39  ;;  %v5134_v39 = vld [vmem:[%s6340_s5 + $0x38] sm:$0xff]  }
 0xa19   : > { %v4823_v41 = vpop.f32.mrf.mxu1 }
 0xa1a   : > { %v6088_v37 = vpack.c.bf16 %v3124_v35, %v3121_v40  ;;  %v5135_v40 = vld [vmem:[%s6340_s5 + $0x30] sm:$0xff]   ;;  %v5136_v35 = vld [vmem:[%s6340_s5 + $0x28] sm:$0xff]   ;;  %v5137_v41 = vld [vmem:[%s6340_s5 + $0x20] sm:$0xff]  }
 0xa1c   : > { %4841 = vmatmul.mubr.bf16.vlgmr.msra.gmra.mxu0 %v6088_v37 }
 0xa1d   : > { %4860 = vmatprep.mubr.msk.bf16.mxu0 %vm5427_vm1, %v5426_v46  ;;  %4845 = vmatpush3.bf16.msra.mxu0 %v5134_v39 }
 0xa1e   : > { %4846 = vmatprep.subr.bf16.mxu0 %v5426_v46 }
 0xa21   : > { %4847 = vmatpush3.bf16.msra.mxu0 %v5135_v40 }
 0xa22   : > { %4848 = vmatprep.subr.bf16.mxu0 %v5426_v46 }
 0xa25   : > { %4849 = vmatpush3.bf16.msra.mxu0 %v5136_v35 }
 0xa26   : > { %4850 = vmatprep.subr.bf16.mxu0 %v5426_v46 }
 0xa29   : > { %4851 = vmatpush3.bf16.msra.mxu0 %v5137_v41 }
 0xa2a   : > { %4852 = vmatprep.subr.bf16.mxu0 %v5426_v46 }
 0xadc   : > { %v3233_v30 = vpop.f32.mrf.mxu0 }
 0xadd   : > { %v3234_v45 = vadd.f32 %v4277_v44, %v3233_v30  ;;  %v5141_v30 = vld [vmem:[%s6340_s5] sm:$0xff]  }
 0xade   : > { %v4842_v48 = vpop.f32.mrf.mxu0 }
 0xadf   : > { %v4286_v50 = vmul.f32 -1.442695, %v3234_v45 }
 0xae0   : > { %v3236_v52 = vpop.f32.mrf.mxu0 }
 0xae1   : > { %5294 = vpow2.f32 %v4286_v50  ;;  %v3237_v54 = vadd.f32 %v4277_v44, %v3236_v52  ;;  %v5140_v44 = vld [vmem:[%s6340_s5 + $0x8] sm:$0xff]  }
 0xae2   : > { %v4843_v55 = vpop.f32.mrf.mxu0 }
 0xae3   : > { %v4287_v51 = vmul.f32 -1.442695, %v3237_v54 }
 0xae5   : > { %5296 = vpow2.f32 %v4287_v51 }
 0xaee   : > { %v5295_v57 = vpop.eup %5294 }
 0xaef   : > { %v3246_v43 = vadd.f32 1.0, %v5295_v57 }
 0xaf1   : > { %5298 = vrcp.f32 %v3246_v43 }
 0xaf2   : > { %v5297_v59 = vpop.eup %5296 }
 0xaf3   : > { %v3247_v62 = vadd.f32 1.0, %v5297_v59 }
 0xaf5   : > { %5300 = vrcp.f32 %v3247_v62 }
 0xafe   : > { %v5299_v22 = vpop.eup %5298 }
 0xaff   : > { %v3252_v31 = vmul.f32 %v5299_v22, %v3234_v45  ;;  %v4296_v45 = vld [vmem:[%s6341_s1] ss:$0 sm:$0xff]  ;;  %s6343_s1 = sld [smem:[#allocation26_spill]] }
 0xb02   : > { %v5301_v4 = vpop.eup %5300 }
 0xb03   : > { %v3253_v5 = vmul.f32 %v5301_v4, %v3237_v54 }
 0xb05   : > { %v3254_v12 = vpack.c.bf16 %v3253_v5, %v3252_v31 }
 0xb07   : > { %v3335_v1 = vmul.bf16 %v3334_v6, %v3254_v12  ;;  %v3325_v49 = vmul.bf16 %v3324_v14, %v3254_v12  ;;  %v3315_v60 = vmul.bf16 %v3314_v53, %v3254_v12  ;;  %v3305_v17 = vmul.bf16 %v3304_v15, %v3254_v12  ;;  %v5143_v53 = vld [vmem:[%s6342_s3 + $0x30] sm:$0xff]  }
 0xb08   : > { %v3295_v61 = vmul.bf16 %v3294_v19, %v3254_v12  ;;  %v3285_v18 = vmul.bf16 %v3284_v58, %v3254_v12  ;;  %v3275_v28 = vmul.bf16 %v3274_v23, %v3254_v12  ;;  %v3265_v32 = vmul.bf16 %v3264_v29, %v3254_v12  ;;  %v5147_v15 = vld [vmem:[%s6342_s3 + $0x10] sm:$0xff]  }
 0xb09   : > { %3367 = vmatpush1.bf16.msra.mxu1 %v3335_v1  ;;  %v3345_v38 = vmul.bf16 %v3344_v33, %v3254_v12 }
 0xb0a   : > { %3368 = vmatprep.subr.bf16.mxu1 %v5428_v42 }
 0xb0d   : > { %3369 = vmatpush1.bf16.msra.mxu1 %v3325_v49  ;;  %v5142_v49 = vld [vmem:[%s6342_s3 + $0x38] sm:$0xff]  }
 0xb0e   : > { %3370 = vmatprep.subr.bf16.mxu1 %v5428_v42 }
 0xb11   : > { %3371 = vmatpush1.bf16.msra.mxu1 %v3315_v60  ;;  %v5146_v60 = vld [vmem:[%s6342_s3 + $0x18] sm:$0xff]   ;;  %s6346_s3 = sld [smem:[#allocation28_spill]] }
 0xb12   : > { %3372 = vmatprep.subr.bf16.mxu1 %v5428_v42 }
 0xb15   : > { %3373 = vmatpush1.bf16.msra.mxu1 %v3305_v17  ;;  %v3446_v17 = vld [vmem:[%s6343_s1] sm:$0x1]  ;;  %s6345_s1 = sld [smem:[#allocation31_spill]] }
 0xb16   : > { %3374 = vmatprep.subr.bf16.mxu1 %v5428_v42 }
 0xb19   : > { %3375 = vmatpush1.bf16.msra.mxu1 %v3295_v61 }
 0xb1a   : > { %3376 = vmatprep.subr.bf16.mxu1 %v5428_v42 }
 0xb1b   : > { %v5158_v40 = vld [vmem:[%s6345_s1 + $0x38] sm:$0xff]   ;;  %v5159_v35 = vld [vmem:[%s6345_s1 + $0x30] sm:$0xff]   ;;  %v5160_v41 = vld [vmem:[%s6345_s1 + $0x28] sm:$0xff]  }
 0xb1d   : > { %3377 = vmatpush1.bf16.msra.mxu1 %v3285_v18 }
 0xb1e   : > { %3378 = vmatprep.subr.bf16.mxu1 %v5428_v42 }
 0xb21   : > { %3379 = vmatpush1.bf16.msra.mxu1 %v3275_v28 }
 0xb22   : > { %3380 = vmatprep.subr.bf16.mxu1 %v5428_v42 }
 0xb25   : > { %3381 = vmatpush1.bf16.msra.mxu1 %v3265_v32 }
 0xb26   : > { %3396 = vmatprep.subr.bf16.mxu1 %v5428_v42  ;;  %v5138_v42 = vld [vmem:[%s6340_s5 + $0x18] sm:$0xff]   ;;  %s6344_s5 = sld [smem:[#allocation29_spill]] }
 0xb27   : > { %4853 = vmatpush3.bf16.msra.mxu0 %v5138_v42  ;;  %v5161_v42 = vld [vmem:[%s6345_s1 + $0x20] sm:$0xff]  }
 0xb28   : > { %4854 = vmatprep.subr.bf16.mxu0 %v5426_v46 }
 0xb29   : > { %3397 = vmatpush2.bf16.msra.mxu1 %v3345_v38 }
 0xb2a   : > { %4864 = vmatprep.subr.bf16.mxu1 %v5426_v46 }
 0xb2b   : > { %4855 = vmatpush3.bf16.msra.mxu0 %v5139_v36  ;;  %v5162_v36 = vld [vmem:[%s6345_s1 + $0x18] sm:$0xff]  }
 0xb2c   : > { %3399 = vmatmul.mubr.bf16.vlgmr.msra.gmra.mxu1 %v5133_v27  ;;  %4856 = vmatprep.subr.bf16.mxu0 %v5426_v46  ;;  %v5150_v28 = vld [vmem:[%s6344_s5 + $0x38] sm:$0xff]   ;;  %v5151_v29 = vld [vmem:[%s6344_s5 + $0x30] sm:$0xff]   ;;  %v5152_v26 = vld [vmem:[%s6344_s5 + $0x28] sm:$0xff]  }
 0xb2d   : > { %4880 = vmatprep.mubr.msk.bf16.mxu1 %vm5427_vm1, %v5426_v46  ;;  %4865 = vmatpush3.bf16.msra.mxu1 %v5142_v49  ;;  %v5153_v32 = vld [vmem:[%s6344_s5 + $0x20] sm:$0xff]   ;;  %v5154_v33 = vld [vmem:[%s6344_s5 + $0x18] sm:$0xff]   ;;  %v5155_v38 = vld [vmem:[%s6344_s5 + $0x10] sm:$0xff]  }
 0xb2e   : > { %4866 = vmatprep.subr.bf16.mxu1 %v5426_v46  ;;  %v5156_v27 = vld [vmem:[%s6344_s5 + $0x8] sm:$0xff]   ;;  %v5157_v39 = vld [vmem:[%s6344_s5] sm:$0xff]   ;;  %s6347_s5 = sld [smem:[#allocation30_spill]]  ;;  %v5166_v49 = vld [vmem:[%s5618_s27 + $0x38] sm:$0xff]  }
 0xb2f   : > { %4857 = vmatpush3.bf16.msra.mxu0 %v5140_v44  ;;  %v3559_v44 = vld [vmem:[%s6346_s3] sm:$0x1]  ;;  %s1145_s3 = sand.u32 1, %s5378_s16  }
 0xb30   : > { %4858 = vmatprep.subr.bf16.mxu0 %v5426_v46  ;;  %s4020_s11 = scalar_lea.sflag [#allocation3], %s1145_s3 }
 0xb31   : > { %4867 = vmatpush3.bf16.msra.mxu1 %v5143_v53  ;;  %v5167_v53 = vld [vmem:[%s5618_s27 + $0x30] sm:$0xff]  }
 0xb32   : > { %4868 = vmatprep.subr.bf16.mxu1 %v5426_v46 }
 0xb33   : > { %4859 = vmatpush3.bf16.msra.mxu0 %v5141_v30 }
 0xb34   : > { %4884 = vmatprep.subr.bf16.mxu0 %v5426_v46 }
 0xb35   : > { %4869 = vmatpush3.bf16.msra.mxu1 %v5144_v3  ;;  %v5168_v3 = vld [vmem:[%s5618_s27 + $0x28] sm:$0xff]  }
 0xb36   : > { %4870 = vmatprep.subr.bf16.mxu1 %v5426_v46 }
 0xb39   : > { %4871 = vmatpush3.bf16.msra.mxu1 %v5145_v56  ;;  %v5170_v56 = vld [vmem:[%s5618_s27 + $0x18] sm:$0xff]  }
 0xb3a   : > { %4872 = vmatprep.subr.bf16.mxu1 %v5426_v46 }
 0xb3d   : > { %4873 = vmatpush3.bf16.msra.mxu1 %v5146_v60  ;;  %v5171_v60 = vld [vmem:[%s5618_s27 + $0x10] sm:$0xff]  }
 0xb3e   : > { %4874 = vmatprep.subr.bf16.mxu1 %v5426_v46 }
 0xb41   : > { %4875 = vmatpush3.bf16.msra.mxu1 %v5147_v15  ;;  %v5172_v15 = vld [vmem:[%s5618_s27 + $0x8] sm:$0xff]  }
 0xb42   : > { %4876 = vmatprep.subr.bf16.mxu1 %v5426_v46 }
 0xb45   : > { %4877 = vmatpush3.bf16.msra.mxu1 %v5148_v8  ;;  %v5173_v8 = vld [vmem:[%s5618_s27] sm:$0xff]  }
 0xb46   : > { %4878 = vmatprep.subr.bf16.mxu1 %v5426_v46 }
 0xb49   : > { %4879 = vmatpush3.bf16.msra.mxu1 %v5149_v16  ;;  %v4329_v16 = vld [vmem:[%s5613_s20] ss:$0 sm:$0xff] }
 0xb4a   : > { %4904 = vmatprep.subr.bf16.mxu1 %v5426_v46 }
 0xbec   : > { %v3400_v48 = vpop.f32.mrf.mxu1 }
 0xbed   : > { %v3401_v50 = vadd.f32 %v4296_v45, %v3400_v48 }
 0xbee   : > { %v3402_v52 = vpop.f32.mrf.mxu1 }
 0xbef   : > { %v4300_v54 = vmul.f32 -1.442695, %v3401_v50 }
 0xbf0   : > { %v3403_v55 = vpop.f32.mrf.mxu1 }
 0xbf1   : > { %5302 = vpow2.f32 %v4300_v54  ;;  %v3404_v51 = vadd.f32 %v4296_v45, %v3403_v55 }
 0xbf2   : > { %v3405_v57 = vpop.f32.mrf.mxu1 }
 0xbf3   : > { %v4301_v43 = vmul.f32 -1.442695, %v3404_v51 }
 0xbf5   : > { %5304 = vpow2.f32 %v4301_v43 }
 0xbfe   : > { %v5303_v59 = vpop.eup %5302 }
 0xbff   : > { %v3413_v62 = vadd.f32 1.0, %v5303_v59 }
 0xc01   : > { %5306 = vrcp.f32 %v3413_v62 }
 0xc02   : > { %v5305_v63 = vpop.eup %5304 }
 0xc03   : > { %v3414_v0 = vadd.f32 1.0, %v5305_v63 }
 0xc05   : > { %5308 = vrcp.f32 %v3414_v0  ;;  %v5163_v0 = vld [vmem:[%s6345_s1 + $0x10] sm:$0xff]  }
 0xc0e   : > { %v5307_v22 = vpop.eup %5306 }
 0xc0f   : > { %v6143_v4 = vmul.f32 %v5307_v22, %v3401_v50  ;;  %v5164_v22 = vld [vmem:[%s6345_s1 + $0x8] sm:$0xff]  }
 0xc12   : > { %v5309_v2 = vpop.eup %5308 }
 0xc13   : > { %v6145_v31 = vmul.f32 %v5309_v2, %v3404_v51  ;;  %v5165_v2 = vld [vmem:[%s6345_s1] sm:$0xff]   ;;  %s1146_s1 = scalar_lea.vmem [#allocation2], %s1145_s3 }
 0xc14   : > { %s4032_s8 = sshll.u32 %s1146_s1, 4  ;;  %s6232_s8 = int_to_ptr.vmem [resolvable:$true] %s4032_s8 }
 0xc15   : > { %v3421_v5 = vadd.f32 %v6145_v31, %v6143_v4  ;;  %s5326_s12 = scalar_lea.vmem %s6232_s8, 16 }
 0xc16   : > { %p5327_p11 = scmp.ne.s32.totalorder %s6232_s8, %s5326_s12 }
 0xc17   : > { %v3422_v6 = vrot.slane %v3421_v5, 4 }
 0xc18   : > { %p5328_p12 = pnand %p5327_p11, %p5668_p5 }
 0xc19   : > { %v3423_v9 = vadd.f32 %v3422_v6, %v3421_v5 }
 0xc1a   : > { %p5329_p13 = pneg %p5328_p12 }
 0xc1b   : > { %v3424_v10 = vrot.slane %v3423_v9, 2 }
 0xc1d   : > { %v3425_v12 = vadd.f32 %v3424_v10, %v3423_v9  ;;  %v3773_v9 = vunpack.c.l.bf16 %v6088_v37 }
 0xc1f   : > { %v3426_v1 = vrot.slane %v3425_v12, 1 }
 0xc21   : > { %v3427_v14 = vadd.f32 %v3426_v1, %v3425_v12  ;;  %v3774_v12 = vunpack.c.h.bf16 %v6088_v37  ;;  %v5169_v37 = vld [vmem:[%s5618_s27 + $0x20] sm:$0xff]  }
 0xc23   : > { %v3428_v34 = vmul.f32 0.0625, %v3427_v14 }
 0xc25   : > { %v3429_v47 = vpack.c.bf16 %v3428_v34, %v3428_v34 }
 0xc27   : > { %4861 = vmatmul.mubr.bf16.vlgmr.msra.gmra.mxu0 %v3429_v47 }
 0xc28   : > { %4900 = vmatprep.mubr.msk.bf16.mxu0 %vm5427_vm1, %v5426_v46  ;;  %4885 = vmatpush3.bf16.msra.mxu0 %v5150_v28 }
 0xc29   : > { %4886 = vmatprep.subr.bf16.mxu0 %v5426_v46 }
 0xc2c   : > { %4887 = vmatpush3.bf16.msra.mxu0 %v5151_v29 }
 0xc2d   : > { %4888 = vmatprep.subr.bf16.mxu0 %v5426_v46 }
 0xc30   : > { %4889 = vmatpush3.bf16.msra.mxu0 %v5152_v26 }
 0xc31   : > { %4890 = vmatprep.subr.bf16.mxu0 %v5426_v46 }
 0xc34   : > { %4891 = vmatpush3.bf16.msra.mxu0 %v5153_v32 }
 0xc35   : > { %4892 = vmatprep.subr.bf16.mxu0 %v5426_v46 }
 0xc38   : > { %4893 = vmatpush3.bf16.msra.mxu0 %v5154_v33 }
 0xc39   : > { %4894 = vmatprep.subr.bf16.mxu0 %v5426_v46 }
 0xc3c   : > { %4895 = vmatpush3.bf16.msra.mxu0 %v5155_v38 }
 0xc3d   : > { %4896 = vmatprep.subr.bf16.mxu0 %v5426_v46 }
 0xc40   : > { %4897 = vmatpush3.bf16.msra.mxu0 %v5156_v27 }
 0xc41   : > { %4898 = vmatprep.subr.bf16.mxu0 %v5426_v46 }
 0xc44   : > { %4899 = vmatpush3.bf16.msra.mxu0 %v5157_v39 }
 0xc45   : > { %4924 = vmatprep.subr.bf16.mxu0 %v5426_v46 }
 0xce7   : > { %v3529_v19 = vpop.f32.mrf.mxu0 }
 0xce8   : > { %v3530_v20 = vadd.f32 %v3529_v19, %v3446_v17 }
 0xce9   : > { %v4862_v21 = vpop.f32.mrf.mxu0 }
 0xcea   : > { %v4310_v61 = vmul.f32 -1.442695, %v3530_v20 }
 0xceb   : > { %v3532_v58 = vpop.f32.mrf.mxu0 }
 0xcec   : > { %5310 = vpow2.f32 %v4310_v61 }
 0xced   : > { %v4863_v11 = vpop.f32.mrf.mxu0 }
 0xcf9   : > { %v5311_v13 = vpop.eup %5310 }
 0xcfa   : > { %v3538_v18 = vadd.f32 1.0, %v5311_v13 }
 0xcfc   : > { %5312 = vrcp.f32 %v3538_v18 }
 0xd09   : > { %v5313_v23 = vpop.eup %5312 }
 0xd0a   : > { %v3541_v24 = vmul.f32 %v5313_v23, %v3530_v20 }
 0xd0c   : > { %v3542_v25 = vpack.c.bf16 %v3541_v24, %v3541_v24 }
 0xd0e   : > { %4881 = vmatmul.mubr.bf16.vlgmr.msra.gmra.mxu1 %v3542_v25 }
 0xd0f   : > { %4920 = vmatprep.mubr.msk.bf16.mxu1 %vm5427_vm1, %v5426_v46  ;;  %4905 = vmatpush3.bf16.msra.mxu1 %v5158_v40 }
 0xd10   : > { %4906 = vmatprep.subr.bf16.mxu1 %v5426_v46 }
 0xd13   : > { %4907 = vmatpush3.bf16.msra.mxu1 %v5159_v35 }
 0xd14   : > { %4908 = vmatprep.subr.bf16.mxu1 %v5426_v46 }
 0xd17   : > { %4909 = vmatpush3.bf16.msra.mxu1 %v5160_v41 }
 0xd18   : > { %4910 = vmatprep.subr.bf16.mxu1 %v5426_v46 }
 0xd1b   : > { %4911 = vmatpush3.bf16.msra.mxu1 %v5161_v42 }
 0xd1c   : > { %4912 = vmatprep.subr.bf16.mxu1 %v5426_v46 }
 0xd1f   : > { %4913 = vmatpush3.bf16.msra.mxu1 %v5162_v36  ;;  %v3929_v36 = vld [vmem:[%s6348_s4] sm:$0x1] }
 0xd20   : > { %4914 = vmatprep.subr.bf16.mxu1 %v5426_v46 }
 0xd23   : > { %4915 = vmatpush3.bf16.msra.mxu1 %v5163_v0 }
 0xd24   : > { %4916 = vmatprep.subr.bf16.mxu1 %v5426_v46 }
 0xd27   : > { %4917 = vmatpush3.bf16.msra.mxu1 %v5164_v22 }
 0xd28   : > { %4918 = vmatprep.subr.bf16.mxu1 %v5426_v46 }
 0xd2b   : > { %4919 = vmatpush3.bf16.msra.mxu1 %v5165_v2 }
 0xdce   : > { %v3642_v30 = vpop.f32.mrf.mxu1 }
 0xdcf   : > { %v3643_v45 = vadd.f32 %v3642_v30, %v3559_v44 }
 0xdd0   : > { %v4882_v48 = vpop.f32.mrf.mxu1 }
 0xdd1   : > { %v4319_v50 = vmul.f32 -1.442695, %v3643_v45 }
 0xdd2   : > { %v3645_v52 = vpop.f32.mrf.mxu1 }
 0xdd3   : > { %5314 = vpow2.f32 %v4319_v50 }
 0xdd4   : > { %v4883_v54 = vpop.f32.mrf.mxu1 }
 0xde0   : > { %v5315_v55 = vpop.eup %5314 }
 0xde1   : > { %v3651_v51 = vadd.f32 1.0, %v5315_v55 }
 0xde3   : > { %5316 = vrcp.f32 %v3651_v51 }
 0xdf0   : > { %v5317_v57 = vpop.eup %5316 }
 0xdf1   : > { %v3657_v43 = vrot.slane %v5317_v57, %v5714_v7  ;;  %v4320_v7 = vld [vmem:[%s6347_s5] ss:$0 sm:$0xff]  ;;  %s4348_s5 = sshll.u32 %s5651_s0, 4  ;;  %s5429_s0 = smov [#allocation2]  }
 0xdf2   : > { %s6230_s9 = scalar_lea.hbm %s5628_s6, %s4348_s5  ;;  %s5330_s4 = sshll.u32 %s5429_s0, 4  ;;  %s5331_s4 = int_to_ptr.vmem [resolvable:$false] %s5330_s4 }
 0xdf3   : > { %v3658_v59 = vmul.f32 %v3657_v43, %v6143_v4  ;;  %v3659_v62 = vmul.f32 %v3657_v43, %v6145_v31  ;;  %s5332_s13 = scalar_lea.vmem %s5331_s4, 32  ;;  %p5333_p0 = scmp.lt.s32.totalorder %s6232_s8, %s5331_s4 }
 0xdf4   : > { %p5334_p1 = scmp.lt.s32.totalorder %s5332_s13, %s5326_s12 }
 0xdf5   : > { %v3660_v63 = vpack.c.bf16 %v3659_v62, %v3658_v59 }
 0xdf6   : > { %p5335_p2 = por %p5334_p1, %p5333_p0 }
 0xdf7   : > { %4901 = vmatmul.mubr.bf16.vlgmr.msra.gmra.mxu0 %v3660_v63 }
 0xdf8   : > { %4940 = vmatprep.mubr.msk.bf16.mxu0 %vm5427_vm1, %v5426_v46  ;;  %4925 = vmatpush3.bf16.msra.mxu0 %v5166_v49  ;;  %p5336_p3 = pnand %p5335_p2, %p5329_p13 }
 0xdf9   : > { %4926 = vmatprep.subr.bf16.mxu0 %v5426_v46 }
 0xdfc   : > { %4927 = vmatpush3.bf16.msra.mxu0 %v5167_v53 }
 0xdfd   : > { %4928 = vmatprep.subr.bf16.mxu0 %v5426_v46 }
 0xe00   : > { %4929 = vmatpush3.bf16.msra.mxu0 %v5168_v3 }
 0xe01   : > { %4930 = vmatprep.subr.bf16.mxu0 %v5426_v46 }
 0xe04   : > { %4931 = vmatpush3.bf16.msra.mxu0 %v5169_v37 }
 0xe05   : > { %4932 = vmatprep.subr.bf16.mxu0 %v5426_v46 }
 0xe08   : > { %4933 = vmatpush3.bf16.msra.mxu0 %v5170_v56 }
 0xe09   : > { %4934 = vmatprep.subr.bf16.mxu0 %v5426_v46 }
 0xe0c   : > { %4935 = vmatpush3.bf16.msra.mxu0 %v5171_v60 }
 0xe0d   : > { %4936 = vmatprep.subr.bf16.mxu0 %v5426_v46 }
 0xe10   : > { %4937 = vmatpush3.bf16.msra.mxu0 %v5172_v15 }
 0xe11   : > { %4938 = vmatprep.subr.bf16.mxu0 %v5426_v46 }
 0xe14   : > { %4939 = vmatpush3.bf16.msra.mxu0 %v5173_v8 }
 0xeb7   : > { %v3766_v4 = vpop.f32.mrf.mxu0 }
 0xeb8   : > { %v3767_v5 = vadd.f32 %v4320_v7, %v3766_v4 }
 0xeb9   : > { %v4902_v31 = vpop.f32.mrf.mxu0 }
 0xeba   : > { %v3775_v14 = vadd.f32 %v3773_v9, %v3767_v5 }
 0xebb   : > { %v3769_v6 = vpop.f32.mrf.mxu0 }
 0xebc   : > { %v3770_v10 = vadd.f32 %v4320_v7, %v3769_v6 }
 0xebd   : > { %v4903_v1 = vpop.f32.mrf.mxu0 }
 0xebe   : > { %v3776_v34 = vadd.f32 %v3774_v12, %v3770_v10 }
 0xec0   : > { %v3777_v47 = vpack.c.bf16 %v3776_v34, %v3775_v14 }
 0xec2   : > { %4921 = vmatmul.mubr.bf16.vlgmr.msra.gmra.mxu1 %v3777_v47 }
 0xf82   : > { %v3883_v17 = vpop.f32.mrf.mxu1 }
 0xf83   : > { %v3884_v19 = vadd.f32 %v4329_v16, %v3883_v17 }
 0xf84   : > { %v4922_v20 = vpop.f32.mrf.mxu1 }
 0xf85   : > { %v4338_v21 = vmul.f32 -1.442695, %v3884_v19 }
 0xf86   : > { %v3886_v61 = vpop.f32.mrf.mxu1 }
 0xf87   : > { %5318 = vpow2.f32 %v4338_v21  ;;  %v3887_v58 = vadd.f32 %v4329_v16, %v3886_v61 }
 0xf88   : > { %v4923_v11 = vpop.f32.mrf.mxu1 }
 0xf89   : > { %v4339_v13 = vmul.f32 -1.442695, %v3887_v58 }
 0xf8b   : > { %5320 = vpow2.f32 %v4339_v13 }
 0xf94   : > { %v5319_v18 = vpop.eup %5318 }
 0xf95   : > { %v3896_v23 = vadd.f32 1.0, %v5319_v18 }
 0xf97   : > { %5322 = vrcp.f32 %v3896_v23 }
 0xf98   : > { %v5321_v24 = vpop.eup %5320 }
 0xf99   : > { %v3897_v25 = vadd.f32 1.0, %v5321_v24 }
 0xf9b   : > { %5324 = vrcp.f32 %v3897_v25 }
 0xfa4   : > { %v5323_v46 = vpop.eup %5322 }
 0xfa5   : > { %v3902_v29 = vmul.f32 %v5323_v46, %v3884_v19 }
 0xfa8   : > { %v5325_v28 = vpop.eup %5324 }
 0xfa9   : > { %v3903_v26 = vmul.f32 %v5325_v28, %v3887_v58 }
 0xfab   : > { %v3904_v32 = vadd.f32 %v3903_v26, %v3902_v29 }
 0xfad   : > { %v3905_v33 = vrot.slane %v3904_v32, 4 }
 0xfaf   : > { %v3906_v38 = vadd.f32 %v3905_v33, %v3904_v32 }
 0xfb1   : > { %v3907_v27 = vrot.slane %v3906_v38, 2 }
 0xfb3   : > { %v3908_v39 = vadd.f32 %v3907_v27, %v3906_v38 }
 0xfb5   : > { %v3909_v40 = vrot.slane %v3908_v39, 1 }
 0xfb7   : > { %v3910_v35 = vadd.f32 %v3909_v40, %v3908_v39 }
 0xfb9   : > { %v3911_v41 = vmul.f32 0.0625, %v3910_v35 }
 0xfbb   : > { %v3912_v42 = vpack.c.bf16 %v3911_v41, %v3911_v41 }
 0xfbd   : > { %4941 = vmatmul.mubr.bf16.vlgmr.msra.gmra.mxu0 %v3912_v42 }
0x107d   : > { %v4012_v44 = vpop.f32.mrf.mxu0 }
0x107e   : > { %v4013_v30 = vadd.f32 %v4012_v44, %v3929_v36 }
0x107f   : > { %v4942_v45 = vpop.f32.mrf.mxu0 }
0x1080   : > { %4018 = vst [vmem:[%s1146_s1] sm:$0x1] %v4013_v30 }
0x1081   : > { %v4015_v48 = vpop.f32.mrf.mxu0 }
0x1082   : > { %5339 = shalt.err (!%p5336_p3)
}
0x1083   : > { %s5340_s1 = scalar_lea.hbm %s6230_s9, 16  ;;  %s5344_s3 = scalar_lea.hbm %s5628_s6, 32 }
0x1084   : > { %p5341_p4 = scmp.ne.s32.totalorder %s6230_s9, %s5340_s1  ;;  %p5345_p9 = scmp.lt.s32.totalorder %s6230_s9, %s5628_s6 }
0x1085   : > { %p5346_p10 = scmp.lt.s32.totalorder %s5344_s3, %s5340_s1 }
0x1086   : > { %p5342_p7 = pnand %p5341_p4, %p5668_p5 }
0x1087   : > { %p5347_p11 = por %p5346_p10, %p5345_p9 }
0x1088   : > { %p5343_p8 = pneg %p5342_p7 }
0x108a   : > { %p5348_p12 = pnand %p5347_p11, %p5343_p8 }
0x108c   : > { %5351 = shalt.err (!%p5348_p12)
}
0x108d   : > { %4944 = dma.vmem_to_hbm [thread:$0]  (%p5668_p5), %s6232_s8, 16, %s6230_s9, %s4020_s11   ;;  %v4943_v50 = vpop.f32.mrf.mxu0 }
0x108e PF: > { %p4950_p13 = scmp.ge.s32.totalorder %s5386_s22, 2  ;;  %s4044_s13 = sand.u32 1, %s5374_s15  }
0x108f   : > { %s4045_s12 = scalar_lea.sflag [#allocation3], %s4044_s13 }
0x1090   : > { %p4947_p0 = pnand %p4950_p13, %p5672_p6 }
0x1092   : > { %p4948_p1 = pneg %p4947_p0 }
0x1094   : > { %5369 = dma.done.wait (%p4948_p1), %s4045_s12, 16  }
0x1095   : > { %5371 = vsyncadd (%p4948_p1), %s4045_s12, 4294967280  ;;  %p87_p2 = scmp.ge.s32.totalorder %s5655_s26, 4   ;;  %s6349_s15 = smov %s5378_s16 }
0x1096   : > { %s6350_s16 = smov %s5382_s18  ;;  %s6351_s18 = smov %s5666_s2 }
0x1097   : > { %s6352_s22 = smov %s5655_s26  ;;  %89 = sbr.rel (!%p87_p2) target bundleno = 83 (0x53), region = 269 }
0x109c   :  { %4049 = vsyncpa [#allocation3], 1 }
0x109d   :  { %4051 = vsyncpa [#allocation3 + $0x1], 1 }

</bundles_post_ra>
